<compile_context>
chip_gen: v7x
topology: tpu7x:2x2x1
jax: 0.10.0
libtpu: 0.0.40
codegen_flags: <defaults>
</compile_context>

<pallas_src>
import functools

import jax
import jax.numpy as jnp
from jax.experimental import pallas as pl
from jax.experimental.pallas import tpu as pltpu


CFG = dict(
    image_size=(16, 16),
    patch_size=(4, 4),
    dim=32,
    depth=2,
    heads=4,
    dim_head=8,
    mlp_dim=32,
    channels=3,
    target_size=(4, 4),   # target image spatial size -> target_dim = 3*4*4
    match_out=2,          # MatchHead: Conv2d(3, 2, kernel_size=1)
)


# ----------------------------------------------------------------------------
# In-kernel math helpers (f32, VPU/EUP only)
# ----------------------------------------------------------------------------
def _erf(x):
    # Abramowitz & Stegun 7.1.26, |err| <= 1.5e-7; only ops with guaranteed Mosaic
    # lowerings (abs/exp/mul/add/where).  Matches PyTorch's exact-erf GELU closely.
    a = jnp.abs(x)
    t = 1.0 / (1.0 + 0.3275911 * a)
    poly = t * (0.254829592
                + t * (-0.284496736
                       + t * (1.421413741
                              + t * (-1.453152027 + t * 1.061405429))))
    e = 1.0 - poly * jnp.exp(-a * a)
    return jnp.where(x < 0.0, -e, e)


def _gelu(x):
    return 0.5 * x * (1.0 + _erf(x * 0.7071067811865476))


def _layer_norm(v, g, b):
    mu = jnp.mean(v, axis=-1, keepdims=True)
    c = v - mu
    var = jnp.mean(c * c, axis=-1, keepdims=True)
    return c * jax.lax.rsqrt(var + 1e-5) * g + b


# ----------------------------------------------------------------------------
# Single fused kernel: embeddings -> transformer -> seq-linear -> to_up(+conv)
# ----------------------------------------------------------------------------
def _vit_kernel(patches_ref, tflat_ref, pw_ref, pb_ref, tw_ref, tb_ref, pos_ref,
                ln1g_ref, ln1b_ref, wqkv_ref, wo_ref, bo_ref,
                ln2g_ref, ln2b_ref, w1_ref, b1_ref, w2_ref, b2_ref,
                lw_ref, lb_ref, upw_ref, upb_ref,
                o_ref, x_scr,
                *, batch, n_patches, depth, heads, dim_head):
    bf16 = jnp.bfloat16
    n = n_patches
    N = n + 1                              # tokens = target token + patches
    D = pos_ref.shape[-1]
    inner = heads * dim_head
    scale = dim_head ** -0.5

    # ---- embeddings: one (B*n, patch_dim) @ (patch_dim, D) matmul (batch flattened) ----
    pe = jnp.dot(patches_ref[...].astype(bf16), pw_ref[...].astype(bf16),
                 preferred_element_type=jnp.float32) + pb_ref[...]       # (B*n, D)
    te = jnp.dot(tflat_ref[...].astype(bf16), tw_ref[...].astype(bf16),
                 preferred_element_type=jnp.float32) + tb_ref[...]       # (B, D)
    pos = pos_ref[...]                                                   # (n, D)

    # Build x0 in-kernel: target token -> row b*N, patch tokens (+pos) -> rows b*N+1..
    for b in range(batch):
        x_scr[pl.ds(b * N, 1), :] = te[b:b + 1, :]
        x_scr[pl.ds(b * N + 1, n), :] = pe[b * n:(b + 1) * n, :] + pos

    # ---- transformer stack (all layers resident; matmuls over the flat (B*N, D) slab) ----
    for l in range(depth):
        wqkv = wqkv_ref[l].astype(bf16)            # (D, 3*inner) fused [Wq | Wk | Wv]
        wo_f = wo_ref[l]                           # (inner, D) f32 (sliced per head)
        bo = bo_ref[l]                             # (1, D)
        w1 = w1_ref[l].astype(bf16)                # (D, mlp)
        b1 = b1_ref[l]
        w2 = w2_ref[l].astype(bf16)                # (mlp, D)
        b2 = b2_ref[l]

        # ---- PreNorm + Attention ----
        x = x_scr[...]                                                    # (B*N, D)
        h = _layer_norm(x, ln1g_ref[l], ln1b_ref[l])
        qkv = jnp.dot(h.astype(bf16), wqkv,
                      preferred_element_type=jnp.float32)                 # (B*N, 3*inner)
        for b in range(batch):
            qkv_b = qkv[b * N:(b + 1) * N, :]                             # (N, 3*inner)
            acc = jnp.zeros((N, D), jnp.float32)
            for hh in range(heads):
                q = qkv_b[:, hh * dim_head:(hh + 1) * dim_head]
                k = qkv_b[:, inner + hh * dim_head:inner + (hh + 1) * dim_head]
                v = qkv_b[:, 2 * inner + hh * dim_head:2 * inner + (hh + 1) * dim_head]
                # scores: contract dim 1 of both operands -> no explicit transpose
                s = jax.lax.dot_general(q, k, (((1,), (1,)), ((), ())),
                                        preferred_element_type=jnp.float32) * scale
                s = s - jnp.max(s, axis=-1, keepdims=True)
                p = jnp.exp(s)
                p = p / jnp.sum(p, axis=-1, keepdims=True)                # exact softmax
                o_h = jnp.dot(p, v, preferred_element_type=jnp.float32)   # (N, dh)
                # per-head accumulate through the output projection (no lane concat)
                acc = acc + jnp.dot(
                    o_h.astype(bf16),
                    wo_f[hh * dim_head:(hh + 1) * dim_head, :].astype(bf16),
                    preferred_element_type=jnp.float32)
            x_scr[pl.ds(b * N, N), :] = x[b * N:(b + 1) * N, :] + acc + bo

        # ---- PreNorm + FeedForward (Linear -> exact-erf GELU -> Linear) ----
        x = x_scr[...]
        h = _layer_norm(x, ln2g_ref[l], ln2b_ref[l])
        f = jnp.dot(h.astype(bf16), w1, preferred_element_type=jnp.float32) + b1
        f = _gelu(f)
        f = jnp.dot(f.astype(bf16), w2, preferred_element_type=jnp.float32) + b2
        x_scr[...] = x + f

    # ---- self.l (contract tokens N -> n) + to_up with MatchHead conv pre-fused ----
    x = x_scr[...]
    lw = lw_ref[...].astype(bf16)          # (n, N)  -- PyTorch (out, in) layout
    lb = lb_ref[...]                       # (n, 1)
    upw = upw_ref[...].astype(bf16)        # (D, ph*pw*cout)  (to_up ∘ 1x1-conv weights)
    upb = upb_ref[...]                     # (1, ph*pw*cout)
    for b in range(batch):
        xb = x[b * N:(b + 1) * N, :].astype(bf16)                         # (N, D)
        y = jnp.dot(lw, xb, preferred_element_type=jnp.float32) + lb      # (n, D)
        up = jnp.dot(y.astype(bf16), upw,
                     preferred_element_type=jnp.float32) + upb            # (n, ph*pw*cout)
        o_ref[pl.ds(b * n, n), :] = up


# ----------------------------------------------------------------------------
# Parameter initialization (deterministic, synthetic)
# ----------------------------------------------------------------------------
def init_params(key, cfg):
    def nrm(k, shape, scale=0.05):
        return scale * jax.random.normal(k, shape, jnp.float32)

    H, W = cfg["image_size"]
    ph, pw = cfg["patch_size"]
    C, dim = cfg["channels"], cfg["dim"]
    heads, dh = cfg["heads"], cfg["dim_head"]
    mlp, depth = cfg["mlp_dim"], cfg["depth"]
    th, tw = cfg["target_size"]
    n = (H // ph) * (W // pw)
    patch_dim = C * ph * pw
    target_dim = C * th * tw
    inner = heads * dh
    cout = cfg["match_out"]

    keys = iter(jax.random.split(key, 32))
    p = {
        "patch_w": nrm(next(keys), (patch_dim, dim)),
        "patch_b": nrm(next(keys), (1, dim)),
        "target_w": nrm(next(keys), (target_dim, dim)),
        "target_b": nrm(next(keys), (1, dim)),
        "pos_emb": nrm(next(keys), (n, dim), scale=1.0),
        "l_w": nrm(next(keys), (n, n + 1)),       # Linear(n+1 -> n), (out, in) layout
        "l_b": nrm(next(keys), (n, 1)),
        "up_w": nrm(next(keys), (dim, patch_dim)),
        "up_b": nrm(next(keys), (1, patch_dim)),
        "mh_w": nrm(next(keys), (cout, C)),       # 1x1 conv weights (cout, cin)
        "mh_b": nrm(next(keys), (cout,)),
        "layers": {
            "ln1_g": jnp.ones((depth, 1, dim), jnp.float32),
            "ln1_b": jnp.zeros((depth, 1, dim), jnp.float32),
            "w_qkv": nrm(next(keys), (depth, dim, 3 * inner)),   # fused [Wq | Wk | Wv]
            "w_o": nrm(next(keys), (depth, inner, dim)),
            "b_o": nrm(next(keys), (depth, 1, dim)),
            "ln2_g": jnp.ones((depth, 1, dim), jnp.float32),
            "ln2_b": jnp.zeros((depth, 1, dim), jnp.float32),
            "w1": nrm(next(keys), (depth, dim, mlp)),
            "b1": nrm(next(keys), (depth, 1, mlp)),
            "w2": nrm(next(keys), (depth, mlp, dim)),
            "b2": nrm(next(keys), (depth, 1, dim)),
        },
    }
    return p


# ----------------------------------------------------------------------------
# Forward pass: input layout ops -> ONE Pallas kernel -> output layout op
# ----------------------------------------------------------------------------
def vit_forward(params, img, target_img, cfg):
    B = img.shape[0]
    H, W = cfg["image_size"]
    ph, pw = cfg["patch_size"]
    C, dim = cfg["channels"], cfg["dim"]
    heads, dh = cfg["heads"], cfg["dim_head"]
    mlp, depth = cfg["mlp_dim"], cfg["depth"]
    cout = cfg["match_out"]
    h, w = H // ph, W // pw
    n = h * w
    N = n + 1
    patch_dim = C * ph * pw

    # to_patch_embedding rearrange: 'b c (h p1) (w p2) -> (b h w) (p1 p2 c)' (layout only)
    patches = (img.reshape(B, C, h, ph, w, pw)
                  .transpose(0, 2, 4, 3, 5, 1)
                  .reshape(B * n, patch_dim))
    # to_target_embedding rearrange: 'b c h w -> b (h w c)'
    _, tc, th_, tw_ = target_img.shape
    tflat = target_img.transpose(0, 2, 3, 1).reshape(B, th_ * tw_ * tc)
    target_dim = tflat.shape[1]

    # Pre-fuse to_up Linear with the MatchHead 1x1 conv (exact linear composition):
    #   fused_w[d,(p1,p2,c')] = sum_c up_w[d,(p1,p2,c)] * mh_w[c',c]
    mh_w, mh_b = params["mh_w"], params["mh_b"]
    fup_w = jnp.einsum("dpqc,oc->dpqo",
                       params["up_w"].reshape(dim, ph, pw, C),
                       mh_w).reshape(dim, ph * pw * cout)
    fup_b = (jnp.einsum("pqc,oc->pqo",
                        params["up_b"].reshape(ph, pw, C), mh_w)
             + mh_b).reshape(1, ph * pw * cout)

    L = params["layers"]
    args = (patches, tflat, params["patch_w"], params["patch_b"],
            params["target_w"], params["target_b"], params["pos_emb"],
            L["ln1_g"], L["ln1_b"], L["w_qkv"], L["w_o"], L["b_o"],
            L["ln2_g"], L["ln2_b"], L["w1"], L["b1"], L["w2"], L["b2"],
            params["l_w"], params["l_b"], fup_w, fup_b)

    # Advisory cost estimate for XLA scheduling around the custom call.
    inner = heads * dh
    flops = (2 * B * n * patch_dim * dim + 2 * B * target_dim * dim
             + depth * (2 * (B * N) * dim * (3 * inner)
                        + B * heads * (4 * N * N * dh + 2 * N * dh * dim)
                        + 4 * (B * N) * dim * mlp)
             + B * (2 * n * N * dim + 2 * n * dim * (ph * pw * cout)))
    transcendentals = depth * (B * heads * N * N + B * N * mlp)
    bytes_accessed = 4 * (sum(int(a.size) for a in args) + B * n * ph * pw * cout)

    kernel = functools.partial(_vit_kernel, batch=B, n_patches=n, depth=depth,
                               heads=heads, dim_head=dh)
    out_flat = pl.pallas_call(
        kernel,
        out_shape=jax.ShapeDtypeStruct((B * n, ph * pw * cout), jnp.float32),
        in_specs=[pl.BlockSpec(memory_space=pltpu.MemorySpace.VMEM)] * len(args),
        out_specs=pl.BlockSpec(memory_space=pltpu.MemorySpace.VMEM),
        scratch_shapes=[pltpu.VMEM((B * N, dim), jnp.float32)],
        cost_estimate=pl.CostEstimate(flops=flops,
                                      transcendentals=transcendentals,
                                      bytes_accessed=bytes_accessed),
    )(*args)

    # Final layout-only rearrange of the (already channel-mixed) output:
    #   'b (h w) (p1 p2 c') -> b c' (h p1) (w p2)'
    out = (out_flat.reshape(B, h, w, ph, pw, cout)
                   .transpose(0, 5, 1, 3, 2, 4)
                   .reshape(B, cout, H, W))
    return out


if __name__ == "__main__":
    key = jax.random.PRNGKey(0)
    kp, ki, kt = jax.random.split(key, 3)

    params = init_params(kp, CFG)
    B = 2
    img = jax.random.normal(ki, (B, CFG["channels"]) + CFG["image_size"], jnp.float32)
    target_img = jax.random.normal(
        kt, (B, CFG["channels"]) + CFG["target_size"], jnp.float32)

    fwd = jax.jit(lambda p, a, b: vit_forward(p, a, b, CFG))
    out = jax.block_until_ready(fwd(params, img, target_img))
    assert out.shape == (B, CFG["match_out"]) + CFG["image_size"], out.shape
    assert bool(jnp.all(jnp.isfinite(out)))
    print("KERNEL_OK")
</pallas_src>

<mosaic_0001>
module attributes {stable_mosaic.version = 11 : i64} {
  func.func @_vit_kernel(%arg0: memref<32x48xf32, #tpu.memory_space<vmem>>, %arg1: memref<2x48xf32, #tpu.memory_space<vmem>>, %arg2: memref<48x32xf32, #tpu.memory_space<vmem>>, %arg3: memref<1x32xf32, #tpu.memory_space<vmem>>, %arg4: memref<48x32xf32, #tpu.memory_space<vmem>>, %arg5: memref<1x32xf32, #tpu.memory_space<vmem>>, %arg6: memref<16x32xf32, #tpu.memory_space<vmem>>, %arg7: memref<2x1x32xf32, #tpu.memory_space<vmem>>, %arg8: memref<2x1x32xf32, #tpu.memory_space<vmem>>, %arg9: memref<2x32x96xf32, #tpu.memory_space<vmem>>, %arg10: memref<2x32x32xf32, #tpu.memory_space<vmem>>, %arg11: memref<2x1x32xf32, #tpu.memory_space<vmem>>, %arg12: memref<2x1x32xf32, #tpu.memory_space<vmem>>, %arg13: memref<2x1x32xf32, #tpu.memory_space<vmem>>, %arg14: memref<2x32x32xf32, #tpu.memory_space<vmem>>, %arg15: memref<2x1x32xf32, #tpu.memory_space<vmem>>, %arg16: memref<2x32x32xf32, #tpu.memory_space<vmem>>, %arg17: memref<2x1x32xf32, #tpu.memory_space<vmem>>, %arg18: memref<16x17xf32, #tpu.memory_space<vmem>>, %arg19: memref<16x1xf32, #tpu.memory_space<vmem>>, %arg20: memref<32x32xf32, #tpu.memory_space<vmem>>, %arg21: memref<1x32xf32, #tpu.memory_space<vmem>>, %arg22: memref<32x32xf32, #tpu.memory_space<vmem>>, %arg23: memref<34x32xf32, #tpu.memory_space<vmem>>) attributes {dimension_semantics = [], scalar_prefetch = 0 : i64, scratch_operands = 1 : i64, tpu.core_type = #tpu.core_type<tc>} {
    %c0 = arith.constant 0 : index
    %c0_0 = arith.constant 0 : index
    %0 = vector.load %arg0[%c0, %c0_0] : memref<32x48xf32, #tpu.memory_space<vmem>>, vector<32x48xf32>
    %1 = arith.truncf %0 : vector<32x48xf32> to vector<32x48xbf16>
    %c0_1 = arith.constant 0 : index
    %c0_2 = arith.constant 0 : index
    %2 = vector.load %arg2[%c0_1, %c0_2] : memref<48x32xf32, #tpu.memory_space<vmem>>, vector<48x32xf32>
    %3 = arith.truncf %2 : vector<48x32xf32> to vector<48x32xbf16>
    %cst = arith.constant dense<0.000000e+00> : vector<32x32xf32>
    %4 = tpu.matmul %1, %3, %cst {dimension_numbers = #tpu.dot_dimension_numbers<[1], [0], [0], [1], [0, 0, 1, 1], [], []>} : vector<32x48xbf16>, vector<48x32xbf16>, vector<32x32xf32> -> vector<32x32xf32>
    %c0_3 = arith.constant 0 : index
    %c0_4 = arith.constant 0 : index
    %5 = vector.load %arg3[%c0_3, %c0_4] : memref<1x32xf32, #tpu.memory_space<vmem>>, vector<1x32xf32>
    %6 = vector.broadcast %5 : vector<1x32xf32> to vector<32x32xf32>
    %7 = arith.addf %4, %6 : vector<32x32xf32>
    %c0_5 = arith.constant 0 : index
    %c0_6 = arith.constant 0 : index
    %8 = vector.load %arg1[%c0_5, %c0_6] : memref<2x48xf32, #tpu.memory_space<vmem>>, vector<2x48xf32>
    %9 = arith.truncf %8 : vector<2x48xf32> to vector<2x48xbf16>
    %c0_7 = arith.constant 0 : index
    %c0_8 = arith.constant 0 : index
    %10 = vector.load %arg4[%c0_7, %c0_8] : memref<48x32xf32, #tpu.memory_space<vmem>>, vector<48x32xf32>
    %11 = arith.truncf %10 : vector<48x32xf32> to vector<48x32xbf16>
    %cst_9 = arith.constant dense<0.000000e+00> : vector<2x32xf32>
    %12 = tpu.matmul %9, %11, %cst_9 {dimension_numbers = #tpu.dot_dimension_numbers<[1], [0], [0], [1], [0, 0, 1, 1], [], []>} : vector<2x48xbf16>, vector<48x32xbf16>, vector<2x32xf32> -> vector<2x32xf32>
    %c0_10 = arith.constant 0 : index
    %c0_11 = arith.constant 0 : index
    %13 = vector.load %arg5[%c0_10, %c0_11] : memref<1x32xf32, #tpu.memory_space<vmem>>, vector<1x32xf32>
    %14 = vector.broadcast %13 : vector<1x32xf32> to vector<2x32xf32>
    %15 = arith.addf %12, %14 : vector<2x32xf32>
    %c0_12 = arith.constant 0 : index
    %c0_13 = arith.constant 0 : index
    %16 = vector.load %arg6[%c0_12, %c0_13] : memref<16x32xf32, #tpu.memory_space<vmem>>, vector<16x32xf32>
    %17 = vector.extract_strided_slice %15 {offsets = [0, 0], sizes = [1, 32], strides = [1, 1]} : vector<2x32xf32> to vector<1x32xf32>
    %c0_14 = arith.constant 0 : index
    %c0_15 = arith.constant 0 : index
    %18 = vector.load %arg23[%c0_14, %c0_15] : memref<34x32xf32, #tpu.memory_space<vmem>>, vector<1x32xf32>
    tpu.vector_store %arg23[%c0_14, %c0_15], %17 {strides = array<i32>} : memref<34x32xf32, #tpu.memory_space<vmem>>, vector<1x32xf32>,
    %19 = vector.extract_strided_slice %7 {offsets = [0, 0], sizes = [16, 32], strides = [1, 1]} : vector<32x32xf32> to vector<16x32xf32>
    %20 = arith.addf %19, %16 : vector<16x32xf32>
    %c1 = arith.constant 1 : index
    %c0_16 = arith.constant 0 : index
    %21 = vector.load %arg23[%c1, %c0_16] : memref<34x32xf32, #tpu.memory_space<vmem>>, vector<16x32xf32>
    tpu.vector_store %arg23[%c1, %c0_16], %20 {strides = array<i32>} : memref<34x32xf32, #tpu.memory_space<vmem>>, vector<16x32xf32>,
    %22 = vector.extract_strided_slice %15 {offsets = [1, 0], sizes = [1, 32], strides = [1, 1]} : vector<2x32xf32> to vector<1x32xf32>
    %c17 = arith.constant 17 : index
    %c0_17 = arith.constant 0 : index
    %23 = vector.load %arg23[%c17, %c0_17] : memref<34x32xf32, #tpu.memory_space<vmem>>, vector<1x32xf32>
    tpu.vector_store %arg23[%c17, %c0_17], %22 {strides = array<i32>} : memref<34x32xf32, #tpu.memory_space<vmem>>, vector<1x32xf32>,
    %24 = vector.extract_strided_slice %7 {offsets = [16, 0], sizes = [16, 32], strides = [1, 1]} : vector<32x32xf32> to vector<16x32xf32>
    %25 = arith.addf %24, %16 : vector<16x32xf32>
    %c18 = arith.constant 18 : index
    %c0_18 = arith.constant 0 : index
    %26 = vector.load %arg23[%c18, %c0_18] : memref<34x32xf32, #tpu.memory_space<vmem>>, vector<16x32xf32>
    tpu.vector_store %arg23[%c18, %c0_18], %25 {strides = array<i32>} : memref<34x32xf32, #tpu.memory_space<vmem>>, vector<16x32xf32>,
    %c0_19 = arith.constant 0 : index
    %c0_20 = arith.constant 0 : index
    %c0_21 = arith.constant 0 : index
    %27 = vector.load %arg9[%c0_19, %c0_20, %c0_21] : memref<2x32x96xf32, #tpu.memory_space<vmem>>, vector<1x32x96xf32>
    %28 = vector.shape_cast %27 : vector<1x32x96xf32> to vector<32x96xf32>
    %29 = arith.truncf %28 : vector<32x96xf32> to vector<32x96xbf16>
    %c0_22 = arith.constant 0 : index
    %c0_23 = arith.constant 0 : index
    %c0_24 = arith.constant 0 : index
    %30 = vector.load %arg10[%c0_22, %c0_23, %c0_24] : memref<2x32x32xf32, #tpu.memory_space<vmem>>, vector<1x32x32xf32>
    %31 = vector.shape_cast %30 : vector<1x32x32xf32> to vector<32x32xf32>
    %c0_25 = arith.constant 0 : index
    %c0_26 = arith.constant 0 : index
    %c0_27 = arith.constant 0 : index
    %32 = vector.load %arg11[%c0_25, %c0_26, %c0_27] : memref<2x1x32xf32, #tpu.memory_space<vmem>>, vector<1x1x32xf32>
    %33 = vector.shape_cast %32 : vector<1x1x32xf32> to vector<1x32xf32>
    %c0_28 = arith.constant 0 : index
    %c0_29 = arith.constant 0 : index
    %c0_30 = arith.constant 0 : index
    %34 = vector.load %arg14[%c0_28, %c0_29, %c0_30] : memref<2x32x32xf32, #tpu.memory_space<vmem>>, vector<1x32x32xf32>
    %35 = vector.shape_cast %34 : vector<1x32x32xf32> to vector<32x32xf32>
    %36 = arith.truncf %35 : vector<32x32xf32> to vector<32x32xbf16>
    %c0_31 = arith.constant 0 : index
    %c0_32 = arith.constant 0 : index
    %c0_33 = arith.constant 0 : index
    %37 = vector.load %arg15[%c0_31, %c0_32, %c0_33] : memref<2x1x32xf32, #tpu.memory_space<vmem>>, vector<1x1x32xf32>
    %38 = vector.shape_cast %37 : vector<1x1x32xf32> to vector<1x32xf32>
    %c0_34 = arith.constant 0 : index
    %c0_35 = arith.constant 0 : index
    %c0_36 = arith.constant 0 : index
    %39 = vector.load %arg16[%c0_34, %c0_35, %c0_36] : memref<2x32x32xf32, #tpu.memory_space<vmem>>, vector<1x32x32xf32>
    %40 = vector.shape_cast %39 : vector<1x32x32xf32> to vector<32x32xf32>
    %41 = arith.truncf %40 : vector<32x32xf32> to vector<32x32xbf16>
    %c0_37 = arith.constant 0 : index
    %c0_38 = arith.constant 0 : index
    %c0_39 = arith.constant 0 : index
    %42 = vector.load %arg17[%c0_37, %c0_38, %c0_39] : memref<2x1x32xf32, #tpu.memory_space<vmem>>, vector<1x1x32xf32>
    %43 = vector.shape_cast %42 : vector<1x1x32xf32> to vector<1x32xf32>
    %c0_40 = arith.constant 0 : index
    %c0_41 = arith.constant 0 : index
    %44 = vector.load %arg23[%c0_40, %c0_41] : memref<34x32xf32, #tpu.memory_space<vmem>>, vector<34x32xf32>
    %c0_42 = arith.constant 0 : index
    %c0_43 = arith.constant 0 : index
    %c0_44 = arith.constant 0 : index
    %45 = vector.load %arg7[%c0_42, %c0_43, %c0_44] : memref<2x1x32xf32, #tpu.memory_space<vmem>>, vector<1x1x32xf32>
    %46 = vector.shape_cast %45 : vector<1x1x32xf32> to vector<1x32xf32>
    %c0_45 = arith.constant 0 : index
    %c0_46 = arith.constant 0 : index
    %c0_47 = arith.constant 0 : index
    %47 = vector.load %arg8[%c0_45, %c0_46, %c0_47] : memref<2x1x32xf32, #tpu.memory_space<vmem>>, vector<1x1x32xf32>
    %48 = vector.shape_cast %47 : vector<1x1x32xf32> to vector<1x32xf32>
    %cst_48 = arith.constant dense<0.000000e+00> : vector<34xf32>
    %49 = vector.multi_reduction <add>, %44, %cst_48 [1] : vector<34x32xf32> to vector<34xf32>
    %50 = vector.shape_cast %49 : vector<34xf32> to vector<34x1xf32>
    %cst_49 = arith.constant 3.200000e+01 : f32
    %51 = vector.broadcast %cst_49 : f32 to vector<34x1xf32>
    %52 = arith.divf %50, %51 : vector<34x1xf32>
    %53 = vector.broadcast %52 : vector<34x1xf32> to vector<34x32xf32>
    %54 = arith.subf %44, %53 : vector<34x32xf32>
    %55 = arith.mulf %54, %54 : vector<34x32xf32>
    %cst_50 = arith.constant dense<0.000000e+00> : vector<34xf32>
    %56 = vector.multi_reduction <add>, %55, %cst_50 [1] : vector<34x32xf32> to vector<34xf32>
    %57 = vector.shape_cast %56 : vector<34xf32> to vector<34x1xf32>
    %cst_51 = arith.constant 3.200000e+01 : f32
    %58 = vector.broadcast %cst_51 : f32 to vector<34x1xf32>
    %59 = arith.divf %57, %58 : vector<34x1xf32>
    %cst_52 = arith.constant 9.99999974E-6 : f32
    %60 = vector.broadcast %cst_52 : f32 to vector<34x1xf32>
    %61 = arith.addf %59, %60 : vector<34x1xf32>
    %62 = math.rsqrt %61 : vector<34x1xf32>
    %63 = vector.broadcast %62 : vector<34x1xf32> to vector<34x32xf32>
    %64 = arith.mulf %54, %63 : vector<34x32xf32>
    %65 = vector.broadcast %46 : vector<1x32xf32> to vector<34x32xf32>
    %66 = arith.mulf %64, %65 : vector<34x32xf32>
    %67 = vector.broadcast %48 : vector<1x32xf32> to vector<34x32xf32>
    %68 = arith.addf %66, %67 : vector<34x32xf32>
    %69 = arith.truncf %68 : vector<34x32xf32> to vector<34x32xbf16>
    %cst_53 = arith.constant dense<0.000000e+00> : vector<34x96xf32>
    %70 = tpu.matmul %69, %29, %cst_53 {dimension_numbers = #tpu.dot_dimension_numbers<[1], [0], [0], [1], [0, 0, 1, 1], [], []>} : vector<34x32xbf16>, vector<32x96xbf16>, vector<34x96xf32> -> vector<34x96xf32>
    %71 = vector.extract_strided_slice %70 {offsets = [0, 0], sizes = [17, 96], strides = [1, 1]} : vector<34x96xf32> to vector<17x96xf32>
    %cst_54 = arith.constant 0.000000e+00 : f32
    %72 = vector.broadcast %cst_54 : f32 to vector<17x32xf32>
    %73 = vector.extract_strided_slice %71 {offsets = [0, 0], sizes = [17, 8], strides = [1, 1]} : vector<17x96xf32> to vector<17x8xf32>
    %74 = vector.extract_strided_slice %71 {offsets = [0, 32], sizes = [17, 8], strides = [1, 1]} : vector<17x96xf32> to vector<17x8xf32>
    %75 = vector.extract_strided_slice %71 {offsets = [0, 64], sizes = [17, 8], strides = [1, 1]} : vector<17x96xf32> to vector<17x8xf32>
    %cst_55 = arith.constant dense<0.000000e+00> : vector<17x17xf32>
    %76 = tpu.matmul %73, %74, %cst_55 {dimension_numbers = #tpu.dot_dimension_numbers<[1], [1], [0], [0], [0, 0, 1, 0], [], []>} : vector<17x8xf32>, vector<17x8xf32>, vector<17x17xf32> -> vector<17x17xf32>
    %cst_56 = arith.constant 0.353553385 : f32
    %77 = vector.broadcast %cst_56 : f32 to vector<17x17xf32>
    %78 = arith.mulf %76, %77 : vector<17x17xf32>
    %cst_57 = arith.constant dense<0xFF800000> : vector<17xf32>
    %79 = vector.multi_reduction <maximumf>, %78, %cst_57 [1] : vector<17x17xf32> to vector<17xf32>
    %80 = vector.shape_cast %79 : vector<17xf32> to vector<17x1xf32>
    %81 = vector.broadcast %80 : vector<17x1xf32> to vector<17x17xf32>
    %82 = arith.subf %78, %81 : vector<17x17xf32>
    %83 = math.exp %82 : vector<17x17xf32>
    %cst_58 = arith.constant dense<0.000000e+00> : vector<17xf32>
    %84 = vector.multi_reduction <add>, %83, %cst_58 [1] : vector<17x17xf32> to vector<17xf32>
    %85 = vector.shape_cast %84 : vector<17xf32> to vector<17x1xf32>
    %86 = vector.broadcast %85 : vector<17x1xf32> to vector<17x17xf32>
    %87 = arith.divf %83, %86 : vector<17x17xf32>
    %cst_59 = arith.constant dense<0.000000e+00> : vector<17x8xf32>
    %88 = tpu.matmul %87, %75, %cst_59 {dimension_numbers = #tpu.dot_dimension_numbers<[1], [0], [0], [1], [0, 0, 1, 1], [], []>} : vector<17x17xf32>, vector<17x8xf32>, vector<17x8xf32> -> vector<17x8xf32>
    %89 = arith.truncf %88 : vector<17x8xf32> to vector<17x8xbf16>
    %90 = vector.extract_strided_slice %31 {offsets = [0, 0], sizes = [8, 32], strides = [1, 1]} : vector<32x32xf32> to vector<8x32xf32>
    %91 = arith.truncf %90 : vector<8x32xf32> to vector<8x32xbf16>
    %cst_60 = arith.constant dense<0.000000e+00> : vector<17x32xf32>
    %92 = tpu.matmul %89, %91, %cst_60 {dimension_numbers = #tpu.dot_dimension_numbers<[1], [0], [0], [1], [0, 0, 1, 1], [], []>} : vector<17x8xbf16>, vector<8x32xbf16>, vector<17x32xf32> -> vector<17x32xf32>
    %93 = arith.addf %72, %92 : vector<17x32xf32>
    %94 = vector.extract_strided_slice %71 {offsets = [0, 8], sizes = [17, 8], strides = [1, 1]} : vector<17x96xf32> to vector<17x8xf32>
    %95 = vector.extract_strided_slice %71 {offsets = [0, 40], sizes = [17, 8], strides = [1, 1]} : vector<17x96xf32> to vector<17x8xf32>
    %96 = vector.extract_strided_slice %71 {offsets = [0, 72], sizes = [17, 8], strides = [1, 1]} : vector<17x96xf32> to vector<17x8xf32>
    %cst_61 = arith.constant dense<0.000000e+00> : vector<17x17xf32>
    %97 = tpu.matmul %94, %95, %cst_61 {dimension_numbers = #tpu.dot_dimension_numbers<[1], [1], [0], [0], [0, 0, 1, 0], [], []>} : vector<17x8xf32>, vector<17x8xf32>, vector<17x17xf32> -> vector<17x17xf32>
    %cst_62 = arith.constant 0.353553385 : f32
    %98 = vector.broadcast %cst_62 : f32 to vector<17x17xf32>
    %99 = arith.mulf %97, %98 : vector<17x17xf32>
    %cst_63 = arith.constant dense<0xFF800000> : vector<17xf32>
    %100 = vector.multi_reduction <maximumf>, %99, %cst_63 [1] : vector<17x17xf32> to vector<17xf32>
    %101 = vector.shape_cast %100 : vector<17xf32> to vector<17x1xf32>
    %102 = vector.broadcast %101 : vector<17x1xf32> to vector<17x17xf32>
    %103 = arith.subf %99, %102 : vector<17x17xf32>
    %104 = math.exp %103 : vector<17x17xf32>
    %cst_64 = arith.constant dense<0.000000e+00> : vector<17xf32>
    %105 = vector.multi_reduction <add>, %104, %cst_64 [1] : vector<17x17xf32> to vector<17xf32>
    %106 = vector.shape_cast %105 : vector<17xf32> to vector<17x1xf32>
    %107 = vector.broadcast %106 : vector<17x1xf32> to vector<17x17xf32>
    %108 = arith.divf %104, %107 : vector<17x17xf32>
    %cst_65 = arith.constant dense<0.000000e+00> : vector<17x8xf32>
    %109 = tpu.matmul %108, %96, %cst_65 {dimension_numbers = #tpu.dot_dimension_numbers<[1], [0], [0], [1], [0, 0, 1, 1], [], []>} : vector<17x17xf32>, vector<17x8xf32>, vector<17x8xf32> -> vector<17x8xf32>
    %110 = arith.truncf %109 : vector<17x8xf32> to vector<17x8xbf16>
    %111 = vector.extract_strided_slice %31 {offsets = [8, 0], sizes = [8, 32], strides = [1, 1]} : vector<32x32xf32> to vector<8x32xf32>
    %112 = arith.truncf %111 : vector<8x32xf32> to vector<8x32xbf16>
    %cst_66 = arith.constant dense<0.000000e+00> : vector<17x32xf32>
    %113 = tpu.matmul %110, %112, %cst_66 {dimension_numbers = #tpu.dot_dimension_numbers<[1], [0], [0], [1], [0, 0, 1, 1], [], []>} : vector<17x8xbf16>, vector<8x32xbf16>, vector<17x32xf32> -> vector<17x32xf32>
    %114 = arith.addf %93, %113 : vector<17x32xf32>
    %115 = vector.extract_strided_slice %71 {offsets = [0, 16], sizes = [17, 8], strides = [1, 1]} : vector<17x96xf32> to vector<17x8xf32>
    %116 = vector.extract_strided_slice %71 {offsets = [0, 48], sizes = [17, 8], strides = [1, 1]} : vector<17x96xf32> to vector<17x8xf32>
    %117 = vector.extract_strided_slice %71 {offsets = [0, 80], sizes = [17, 8], strides = [1, 1]} : vector<17x96xf32> to vector<17x8xf32>
    %cst_67 = arith.constant dense<0.000000e+00> : vector<17x17xf32>
    %118 = tpu.matmul %115, %116, %cst_67 {dimension_numbers = #tpu.dot_dimension_numbers<[1], [1], [0], [0], [0, 0, 1, 0], [], []>} : vector<17x8xf32>, vector<17x8xf32>, vector<17x17xf32> -> vector<17x17xf32>
    %cst_68 = arith.constant 0.353553385 : f32
    %119 = vector.broadcast %cst_68 : f32 to vector<17x17xf32>
    %120 = arith.mulf %118, %119 : vector<17x17xf32>
    %cst_69 = arith.constant dense<0xFF800000> : vector<17xf32>
    %121 = vector.multi_reduction <maximumf>, %120, %cst_69 [1] : vector<17x17xf32> to vector<17xf32>
    %122 = vector.shape_cast %121 : vector<17xf32> to vector<17x1xf32>
    %123 = vector.broadcast %122 : vector<17x1xf32> to vector<17x17xf32>
    %124 = arith.subf %120, %123 : vector<17x17xf32>
    %125 = math.exp %124 : vector<17x17xf32>
    %cst_70 = arith.constant dense<0.000000e+00> : vector<17xf32>
    %126 = vector.multi_reduction <add>, %125, %cst_70 [1] : vector<17x17xf32> to vector<17xf32>
    %127 = vector.shape_cast %126 : vector<17xf32> to vector<17x1xf32>
    %128 = vector.broadcast %127 : vector<17x1xf32> to vector<17x17xf32>
    %129 = arith.divf %125, %128 : vector<17x17xf32>
    %cst_71 = arith.constant dense<0.000000e+00> : vector<17x8xf32>
    %130 = tpu.matmul %129, %117, %cst_71 {dimension_numbers = #tpu.dot_dimension_numbers<[1], [0], [0], [1], [0, 0, 1, 1], [], []>} : vector<17x17xf32>, vector<17x8xf32>, vector<17x8xf32> -> vector<17x8xf32>
    %131 = arith.truncf %130 : vector<17x8xf32> to vector<17x8xbf16>
    %132 = vector.extract_strided_slice %31 {offsets = [16, 0], sizes = [8, 32], strides = [1, 1]} : vector<32x32xf32> to vector<8x32xf32>
    %133 = arith.truncf %132 : vector<8x32xf32> to vector<8x32xbf16>
    %cst_72 = arith.constant dense<0.000000e+00> : vector<17x32xf32>
    %134 = tpu.matmul %131, %133, %cst_72 {dimension_numbers = #tpu.dot_dimension_numbers<[1], [0], [0], [1], [0, 0, 1, 1], [], []>} : vector<17x8xbf16>, vector<8x32xbf16>, vector<17x32xf32> -> vector<17x32xf32>
    %135 = arith.addf %114, %134 : vector<17x32xf32>
    %136 = vector.extract_strided_slice %71 {offsets = [0, 24], sizes = [17, 8], strides = [1, 1]} : vector<17x96xf32> to vector<17x8xf32>
    %137 = vector.extract_strided_slice %71 {offsets = [0, 56], sizes = [17, 8], strides = [1, 1]} : vector<17x96xf32> to vector<17x8xf32>
    %138 = vector.extract_strided_slice %71 {offsets = [0, 88], sizes = [17, 8], strides = [1, 1]} : vector<17x96xf32> to vector<17x8xf32>
    %cst_73 = arith.constant dense<0.000000e+00> : vector<17x17xf32>
    %139 = tpu.matmul %136, %137, %cst_73 {dimension_numbers = #tpu.dot_dimension_numbers<[1], [1], [0], [0], [0, 0, 1, 0], [], []>} : vector<17x8xf32>, vector<17x8xf32>, vector<17x17xf32> -> vector<17x17xf32>
    %cst_74 = arith.constant 0.353553385 : f32
    %140 = vector.broadcast %cst_74 : f32 to vector<17x17xf32>
    %141 = arith.mulf %139, %140 : vector<17x17xf32>
    %cst_75 = arith.constant dense<0xFF800000> : vector<17xf32>
    %142 = vector.multi_reduction <maximumf>, %141, %cst_75 [1] : vector<17x17xf32> to vector<17xf32>
    %143 = vector.shape_cast %142 : vector<17xf32> to vector<17x1xf32>
    %144 = vector.broadcast %143 : vector<17x1xf32> to vector<17x17xf32>
    %145 = arith.subf %141, %144 : vector<17x17xf32>
    %146 = math.exp %145 : vector<17x17xf32>
    %cst_76 = arith.constant dense<0.000000e+00> : vector<17xf32>
    %147 = vector.multi_reduction <add>, %146, %cst_76 [1] : vector<17x17xf32> to vector<17xf32>
    %148 = vector.shape_cast %147 : vector<17xf32> to vector<17x1xf32>
    %149 = vector.broadcast %148 : vector<17x1xf32> to vector<17x17xf32>
    %150 = arith.divf %146, %149 : vector<17x17xf32>
    %cst_77 = arith.constant dense<0.000000e+00> : vector<17x8xf32>
    %151 = tpu.matmul %150, %138, %cst_77 {dimension_numbers = #tpu.dot_dimension_numbers<[1], [0], [0], [1], [0, 0, 1, 1], [], []>} : vector<17x17xf32>, vector<17x8xf32>, vector<17x8xf32> -> vector<17x8xf32>
    %152 = arith.truncf %151 : vector<17x8xf32> to vector<17x8xbf16>
    %153 = vector.extract_strided_slice %31 {offsets = [24, 0], sizes = [8, 32], strides = [1, 1]} : vector<32x32xf32> to vector<8x32xf32>
    %154 = arith.truncf %153 : vector<8x32xf32> to vector<8x32xbf16>
    %cst_78 = arith.constant dense<0.000000e+00> : vector<17x32xf32>
    %155 = tpu.matmul %152, %154, %cst_78 {dimension_numbers = #tpu.dot_dimension_numbers<[1], [0], [0], [1], [0, 0, 1, 1], [], []>} : vector<17x8xbf16>, vector<8x32xbf16>, vector<17x32xf32> -> vector<17x32xf32>
    %156 = arith.addf %135, %155 : vector<17x32xf32>
    %157 = vector.extract_strided_slice %44 {offsets = [0, 0], sizes = [17, 32], strides = [1, 1]} : vector<34x32xf32> to vector<17x32xf32>
    %158 = arith.addf %157, %156 : vector<17x32xf32>
    %159 = vector.broadcast %33 : vector<1x32xf32> to vector<17x32xf32>
    %160 = arith.addf %158, %159 : vector<17x32xf32>
    %c0_79 = arith.constant 0 : index
    %c0_80 = arith.constant 0 : index
    %161 = vector.load %arg23[%c0_79, %c0_80] : memref<34x32xf32, #tpu.memory_space<vmem>>, vector<17x32xf32>
    tpu.vector_store %arg23[%c0_79, %c0_80], %160 {strides = array<i32>} : memref<34x32xf32, #tpu.memory_space<vmem>>, vector<17x32xf32>,
    %162 = vector.extract_strided_slice %70 {offsets = [17, 0], sizes = [17, 96], strides = [1, 1]} : vector<34x96xf32> to vector<17x96xf32>
    %cst_81 = arith.constant 0.000000e+00 : f32
    %163 = vector.broadcast %cst_81 : f32 to vector<17x32xf32>
    %164 = vector.extract_strided_slice %162 {offsets = [0, 0], sizes = [17, 8], strides = [1, 1]} : vector<17x96xf32> to vector<17x8xf32>
    %165 = vector.extract_strided_slice %162 {offsets = [0, 32], sizes = [17, 8], strides = [1, 1]} : vector<17x96xf32> to vector<17x8xf32>
    %166 = vector.extract_strided_slice %162 {offsets = [0, 64], sizes = [17, 8], strides = [1, 1]} : vector<17x96xf32> to vector<17x8xf32>
    %cst_82 = arith.constant dense<0.000000e+00> : vector<17x17xf32>
    %167 = tpu.matmul %164, %165, %cst_82 {dimension_numbers = #tpu.dot_dimension_numbers<[1], [1], [0], [0], [0, 0, 1, 0], [], []>} : vector<17x8xf32>, vector<17x8xf32>, vector<17x17xf32> -> vector<17x17xf32>
    %cst_83 = arith.constant 0.353553385 : f32
    %168 = vector.broadcast %cst_83 : f32 to vector<17x17xf32>
    %169 = arith.mulf %167, %168 : vector<17x17xf32>
    %cst_84 = arith.constant dense<0xFF800000> : vector<17xf32>
    %170 = vector.multi_reduction <maximumf>, %169, %cst_84 [1] : vector<17x17xf32> to vector<17xf32>
    %171 = vector.shape_cast %170 : vector<17xf32> to vector<17x1xf32>
    %172 = vector.broadcast %171 : vector<17x1xf32> to vector<17x17xf32>
    %173 = arith.subf %169, %172 : vector<17x17xf32>
    %174 = math.exp %173 : vector<17x17xf32>
    %cst_85 = arith.constant dense<0.000000e+00> : vector<17xf32>
    %175 = vector.multi_reduction <add>, %174, %cst_85 [1] : vector<17x17xf32> to vector<17xf32>
    %176 = vector.shape_cast %175 : vector<17xf32> to vector<17x1xf32>
    %177 = vector.broadcast %176 : vector<17x1xf32> to vector<17x17xf32>
    %178 = arith.divf %174, %177 : vector<17x17xf32>
    %cst_86 = arith.constant dense<0.000000e+00> : vector<17x8xf32>
    %179 = tpu.matmul %178, %166, %cst_86 {dimension_numbers = #tpu.dot_dimension_numbers<[1], [0], [0], [1], [0, 0, 1, 1], [], []>} : vector<17x17xf32>, vector<17x8xf32>, vector<17x8xf32> -> vector<17x8xf32>
    %180 = arith.truncf %179 : vector<17x8xf32> to vector<17x8xbf16>
    %181 = vector.extract_strided_slice %31 {offsets = [0, 0], sizes = [8, 32], strides = [1, 1]} : vector<32x32xf32> to vector<8x32xf32>
    %182 = arith.truncf %181 : vector<8x32xf32> to vector<8x32xbf16>
    %cst_87 = arith.constant dense<0.000000e+00> : vector<17x32xf32>
    %183 = tpu.matmul %180, %182, %cst_87 {dimension_numbers = #tpu.dot_dimension_numbers<[1], [0], [0], [1], [0, 0, 1, 1], [], []>} : vector<17x8xbf16>, vector<8x32xbf16>, vector<17x32xf32> -> vector<17x32xf32>
    %184 = arith.addf %163, %183 : vector<17x32xf32>
    %185 = vector.extract_strided_slice %162 {offsets = [0, 8], sizes = [17, 8], strides = [1, 1]} : vector<17x96xf32> to vector<17x8xf32>
    %186 = vector.extract_strided_slice %162 {offsets = [0, 40], sizes = [17, 8], strides = [1, 1]} : vector<17x96xf32> to vector<17x8xf32>
    %187 = vector.extract_strided_slice %162 {offsets = [0, 72], sizes = [17, 8], strides = [1, 1]} : vector<17x96xf32> to vector<17x8xf32>
    %cst_88 = arith.constant dense<0.000000e+00> : vector<17x17xf32>
    %188 = tpu.matmul %185, %186, %cst_88 {dimension_numbers = #tpu.dot_dimension_numbers<[1], [1], [0], [0], [0, 0, 1, 0], [], []>} : vector<17x8xf32>, vector<17x8xf32>, vector<17x17xf32> -> vector<17x17xf32>
    %cst_89 = arith.constant 0.353553385 : f32
    %189 = vector.broadcast %cst_89 : f32 to vector<17x17xf32>
    %190 = arith.mulf %188, %189 : vector<17x17xf32>
    %cst_90 = arith.constant dense<0xFF800000> : vector<17xf32>
    %191 = vector.multi_reduction <maximumf>, %190, %cst_90 [1] : vector<17x17xf32> to vector<17xf32>
    %192 = vector.shape_cast %191 : vector<17xf32> to vector<17x1xf32>
    %193 = vector.broadcast %192 : vector<17x1xf32> to vector<17x17xf32>
    %194 = arith.subf %190, %193 : vector<17x17xf32>
    %195 = math.exp %194 : vector<17x17xf32>
    %cst_91 = arith.constant dense<0.000000e+00> : vector<17xf32>
    %196 = vector.multi_reduction <add>, %195, %cst_91 [1] : vector<17x17xf32> to vector<17xf32>
    %197 = vector.shape_cast %196 : vector<17xf32> to vector<17x1xf32>
    %198 = vector.broadcast %197 : vector<17x1xf32> to vector<17x17xf32>
    %199 = arith.divf %195, %198 : vector<17x17xf32>
    %cst_92 = arith.constant dense<0.000000e+00> : vector<17x8xf32>
    %200 = tpu.matmul %199, %187, %cst_92 {dimension_numbers = #tpu.dot_dimension_numbers<[1], [0], [0], [1], [0, 0, 1, 1], [], []>} : vector<17x17xf32>, vector<17x8xf32>, vector<17x8xf32> -> vector<17x8xf32>
    %201 = arith.truncf %200 : vector<17x8xf32> to vector<17x8xbf16>
    %202 = vector.extract_strided_slice %31 {offsets = [8, 0], sizes = [8, 32], strides = [1, 1]} : vector<32x32xf32> to vector<8x32xf32>
    %203 = arith.truncf %202 : vector<8x32xf32> to vector<8x32xbf16>
    %cst_93 = arith.constant dense<0.000000e+00> : vector<17x32xf32>
    %204 = tpu.matmul %201, %203, %cst_93 {dimension_numbers = #tpu.dot_dimension_numbers<[1], [0], [0], [1], [0, 0, 1, 1], [], []>} : vector<17x8xbf16>, vector<8x32xbf16>, vector<17x32xf32> -> vector<17x32xf32>
    %205 = arith.addf %184, %204 : vector<17x32xf32>
    %206 = vector.extract_strided_slice %162 {offsets = [0, 16], sizes = [17, 8], strides = [1, 1]} : vector<17x96xf32> to vector<17x8xf32>
    %207 = vector.extract_strided_slice %162 {offsets = [0, 48], sizes = [17, 8], strides = [1, 1]} : vector<17x96xf32> to vector<17x8xf32>
    %208 = vector.extract_strided_slice %162 {offsets = [0, 80], sizes = [17, 8], strides = [1, 1]} : vector<17x96xf32> to vector<17x8xf32>
    %cst_94 = arith.constant dense<0.000000e+00> : vector<17x17xf32>
    %209 = tpu.matmul %206, %207, %cst_94 {dimension_numbers = #tpu.dot_dimension_numbers<[1], [1], [0], [0], [0, 0, 1, 0], [], []>} : vector<17x8xf32>, vector<17x8xf32>, vector<17x17xf32> -> vector<17x17xf32>
    %cst_95 = arith.constant 0.353553385 : f32
    %210 = vector.broadcast %cst_95 : f32 to vector<17x17xf32>
    %211 = arith.mulf %209, %210 : vector<17x17xf32>
    %cst_96 = arith.constant dense<0xFF800000> : vector<17xf32>
    %212 = vector.multi_reduction <maximumf>, %211, %cst_96 [1] : vector<17x17xf32> to vector<17xf32>
    %213 = vector.shape_cast %212 : vector<17xf32> to vector<17x1xf32>
    %214 = vector.broadcast %213 : vector<17x1xf32> to vector<17x17xf32>
    %215 = arith.subf %211, %214 : vector<17x17xf32>
    %216 = math.exp %215 : vector<17x17xf32>
    %cst_97 = arith.constant dense<0.000000e+00> : vector<17xf32>
    %217 = vector.multi_reduction <add>, %216, %cst_97 [1] : vector<17x17xf32> to vector<17xf32>
    %218 = vector.shape_cast %217 : vector<17xf32> to vector<17x1xf32>
    %219 = vector.broadcast %218 : vector<17x1xf32> to vector<17x17xf32>
    %220 = arith.divf %216, %219 : vector<17x17xf32>
    %cst_98 = arith.constant dense<0.000000e+00> : vector<17x8xf32>
    %221 = tpu.matmul %220, %208, %cst_98 {dimension_numbers = #tpu.dot_dimension_numbers<[1], [0], [0], [1], [0, 0, 1, 1], [], []>} : vector<17x17xf32>, vector<17x8xf32>, vector<17x8xf32> -> vector<17x8xf32>
    %222 = arith.truncf %221 : vector<17x8xf32> to vector<17x8xbf16>
    %223 = vector.extract_strided_slice %31 {offsets = [16, 0], sizes = [8, 32], strides = [1, 1]} : vector<32x32xf32> to vector<8x32xf32>
    %224 = arith.truncf %223 : vector<8x32xf32> to vector<8x32xbf16>
    %cst_99 = arith.constant dense<0.000000e+00> : vector<17x32xf32>
    %225 = tpu.matmul %222, %224, %cst_99 {dimension_numbers = #tpu.dot_dimension_numbers<[1], [0], [0], [1], [0, 0, 1, 1], [], []>} : vector<17x8xbf16>, vector<8x32xbf16>, vector<17x32xf32> -> vector<17x32xf32>
    %226 = arith.addf %205, %225 : vector<17x32xf32>
    %227 = vector.extract_strided_slice %162 {offsets = [0, 24], sizes = [17, 8], strides = [1, 1]} : vector<17x96xf32> to vector<17x8xf32>
    %228 = vector.extract_strided_slice %162 {offsets = [0, 56], sizes = [17, 8], strides = [1, 1]} : vector<17x96xf32> to vector<17x8xf32>
    %229 = vector.extract_strided_slice %162 {offsets = [0, 88], sizes = [17, 8], strides = [1, 1]} : vector<17x96xf32> to vector<17x8xf32>
    %cst_100 = arith.constant dense<0.000000e+00> : vector<17x17xf32>
    %230 = tpu.matmul %227, %228, %cst_100 {dimension_numbers = #tpu.dot_dimension_numbers<[1], [1], [0], [0], [0, 0, 1, 0], [], []>} : vector<17x8xf32>, vector<17x8xf32>, vector<17x17xf32> -> vector<17x17xf32>
    %cst_101 = arith.constant 0.353553385 : f32
    %231 = vector.broadcast %cst_101 : f32 to vector<17x17xf32>
    %232 = arith.mulf %230, %231 : vector<17x17xf32>
    %cst_102 = arith.constant dense<0xFF800000> : vector<17xf32>
    %233 = vector.multi_reduction <maximumf>, %232, %cst_102 [1] : vector<17x17xf32> to vector<17xf32>
    %234 = vector.shape_cast %233 : vector<17xf32> to vector<17x1xf32>
    %235 = vector.broadcast %234 : vector<17x1xf32> to vector<17x17xf32>
    %236 = arith.subf %232, %235 : vector<17x17xf32>
    %237 = math.exp %236 : vector<17x17xf32>
    %cst_103 = arith.constant dense<0.000000e+00> : vector<17xf32>
    %238 = vector.multi_reduction <add>, %237, %cst_103 [1] : vector<17x17xf32> to vector<17xf32>
    %239 = vector.shape_cast %238 : vector<17xf32> to vector<17x1xf32>
    %240 = vector.broadcast %239 : vector<17x1xf32> to vector<17x17xf32>
    %241 = arith.divf %237, %240 : vector<17x17xf32>
    %cst_104 = arith.constant dense<0.000000e+00> : vector<17x8xf32>
    %242 = tpu.matmul %241, %229, %cst_104 {dimension_numbers = #tpu.dot_dimension_numbers<[1], [0], [0], [1], [0, 0, 1, 1], [], []>} : vector<17x17xf32>, vector<17x8xf32>, vector<17x8xf32> -> vector<17x8xf32>
    %243 = arith.truncf %242 : vector<17x8xf32> to vector<17x8xbf16>
    %244 = vector.extract_strided_slice %31 {offsets = [24, 0], sizes = [8, 32], strides = [1, 1]} : vector<32x32xf32> to vector<8x32xf32>
    %245 = arith.truncf %244 : vector<8x32xf32> to vector<8x32xbf16>
    %cst_105 = arith.constant dense<0.000000e+00> : vector<17x32xf32>
    %246 = tpu.matmul %243, %245, %cst_105 {dimension_numbers = #tpu.dot_dimension_numbers<[1], [0], [0], [1], [0, 0, 1, 1], [], []>} : vector<17x8xbf16>, vector<8x32xbf16>, vector<17x32xf32> -> vector<17x32xf32>
    %247 = arith.addf %226, %246 : vector<17x32xf32>
    %248 = vector.extract_strided_slice %44 {offsets = [17, 0], sizes = [17, 32], strides = [1, 1]} : vector<34x32xf32> to vector<17x32xf32>
    %249 = arith.addf %248, %247 : vector<17x32xf32>
    %250 = vector.broadcast %33 : vector<1x32xf32> to vector<17x32xf32>
    %251 = arith.addf %249, %250 : vector<17x32xf32>
    %c17_106 = arith.constant 17 : index
    %c0_107 = arith.constant 0 : index
    %252 = vector.load %arg23[%c17_106, %c0_107] : memref<34x32xf32, #tpu.memory_space<vmem>>, vector<17x32xf32>
    tpu.vector_store %arg23[%c17_106, %c0_107], %251 {strides = array<i32>} : memref<34x32xf32, #tpu.memory_space<vmem>>, vector<17x32xf32>,
    %c0_108 = arith.constant 0 : index
    %c0_109 = arith.constant 0 : index
    %253 = vector.load %arg23[%c0_108, %c0_109] : memref<34x32xf32, #tpu.memory_space<vmem>>, vector<34x32xf32>
    %c0_110 = arith.constant 0 : index
    %c0_111 = arith.constant 0 : index
    %c0_112 = arith.constant 0 : index
    %254 = vector.load %arg12[%c0_110, %c0_111, %c0_112] : memref<2x1x32xf32, #tpu.memory_space<vmem>>, vector<1x1x32xf32>
    %255 = vector.shape_cast %254 : vector<1x1x32xf32> to vector<1x32xf32>
    %c0_113 = arith.constant 0 : index
    %c0_114 = arith.constant 0 : index
    %c0_115 = arith.constant 0 : index
    %256 = vector.load %arg13[%c0_113, %c0_114, %c0_115] : memref<2x1x32xf32, #tpu.memory_space<vmem>>, vector<1x1x32xf32>
    %257 = vector.shape_cast %256 : vector<1x1x32xf32> to vector<1x32xf32>
    %cst_116 = arith.constant dense<0.000000e+00> : vector<34xf32>
    %258 = vector.multi_reduction <add>, %253, %cst_116 [1] : vector<34x32xf32> to vector<34xf32>
    %259 = vector.shape_cast %258 : vector<34xf32> to vector<34x1xf32>
    %cst_117 = arith.constant 3.200000e+01 : f32
    %260 = vector.broadcast %cst_117 : f32 to vector<34x1xf32>
    %261 = arith.divf %259, %260 : vector<34x1xf32>
    %262 = vector.broadcast %261 : vector<34x1xf32> to vector<34x32xf32>
    %263 = arith.subf %253, %262 : vector<34x32xf32>
    %264 = arith.mulf %263, %263 : vector<34x32xf32>
    %cst_118 = arith.constant dense<0.000000e+00> : vector<34xf32>
    %265 = vector.multi_reduction <add>, %264, %cst_118 [1] : vector<34x32xf32> to vector<34xf32>
    %266 = vector.shape_cast %265 : vector<34xf32> to vector<34x1xf32>
    %cst_119 = arith.constant 3.200000e+01 : f32
    %267 = vector.broadcast %cst_119 : f32 to vector<34x1xf32>
    %268 = arith.divf %266, %267 : vector<34x1xf32>
    %cst_120 = arith.constant 9.99999974E-6 : f32
    %269 = vector.broadcast %cst_120 : f32 to vector<34x1xf32>
    %270 = arith.addf %268, %269 : vector<34x1xf32>
    %271 = math.rsqrt %270 : vector<34x1xf32>
    %272 = vector.broadcast %271 : vector<34x1xf32> to vector<34x32xf32>
    %273 = arith.mulf %263, %272 : vector<34x32xf32>
    %274 = vector.broadcast %255 : vector<1x32xf32> to vector<34x32xf32>
    %275 = arith.mulf %273, %274 : vector<34x32xf32>
    %276 = vector.broadcast %257 : vector<1x32xf32> to vector<34x32xf32>
    %277 = arith.addf %275, %276 : vector<34x32xf32>
    %278 = arith.truncf %277 : vector<34x32xf32> to vector<34x32xbf16>
    %cst_121 = arith.constant dense<0.000000e+00> : vector<34x32xf32>
    %279 = tpu.matmul %278, %36, %cst_121 {dimension_numbers = #tpu.dot_dimension_numbers<[1], [0], [0], [1], [0, 0, 1, 1], [], []>} : vector<34x32xbf16>, vector<32x32xbf16>, vector<34x32xf32> -> vector<34x32xf32>
    %280 = vector.broadcast %38 : vector<1x32xf32> to vector<34x32xf32>
    %281 = arith.addf %279, %280 : vector<34x32xf32>
    %cst_122 = arith.constant 5.000000e-01 : f32
    %282 = vector.broadcast %cst_122 : f32 to vector<34x32xf32>
    %283 = arith.mulf %282, %281 : vector<34x32xf32>
    %cst_123 = arith.constant 0.707106769 : f32
    %284 = vector.broadcast %cst_123 : f32 to vector<34x32xf32>
    %285 = arith.mulf %281, %284 : vector<34x32xf32>
    %286 = math.absf %285 : vector<34x32xf32>
    %cst_124 = arith.constant 0.327591091 : f32
    %287 = vector.broadcast %cst_124 : f32 to vector<34x32xf32>
    %288 = arith.mulf %287, %286 : vector<34x32xf32>
    %cst_125 = arith.constant 1.000000e+00 : f32
    %289 = vector.broadcast %cst_125 : f32 to vector<34x32xf32>
    %290 = arith.addf %289, %288 : vector<34x32xf32>
    %cst_126 = arith.constant 1.000000e+00 : f32
    %291 = vector.broadcast %cst_126 : f32 to vector<34x32xf32>
    %292 = arith.divf %291, %290 : vector<34x32xf32>
    %cst_127 = arith.constant 1.06140542 : f32
    %293 = vector.broadcast %cst_127 : f32 to vector<34x32xf32>
    %294 = arith.mulf %292, %293 : vector<34x32xf32>
    %cst_128 = arith.constant -1.45315206 : f32
    %295 = vector.broadcast %cst_128 : f32 to vector<34x32xf32>
    %296 = arith.addf %295, %294 : vector<34x32xf32>
    %297 = arith.mulf %292, %296 : vector<34x32xf32>
    %cst_129 = arith.constant 1.42141378 : f32
    %298 = vector.broadcast %cst_129 : f32 to vector<34x32xf32>
    %299 = arith.addf %298, %297 : vector<34x32xf32>
    %300 = arith.mulf %292, %299 : vector<34x32xf32>
    %cst_130 = arith.constant -0.284496725 : f32
    %301 = vector.broadcast %cst_130 : f32 to vector<34x32xf32>
    %302 = arith.addf %301, %300 : vector<34x32xf32>
    %303 = arith.mulf %292, %302 : vector<34x32xf32>
    %cst_131 = arith.constant 0.254829586 : f32
    %304 = vector.broadcast %cst_131 : f32 to vector<34x32xf32>
    %305 = arith.addf %304, %303 : vector<34x32xf32>
    %306 = arith.mulf %292, %305 : vector<34x32xf32>
    %cst_132 = arith.constant 0.000000e+00 : f32
    %307 = vector.broadcast %cst_132 : f32 to vector<34x32xf32>
    %308 = arith.subf %307, %286 : vector<34x32xf32>
    %309 = arith.mulf %308, %286 : vector<34x32xf32>
    %310 = math.exp %309 : vector<34x32xf32>
    %311 = arith.mulf %306, %310 : vector<34x32xf32>
    %cst_133 = arith.constant 1.000000e+00 : f32
    %312 = vector.broadcast %cst_133 : f32 to vector<34x32xf32>
    %313 = arith.subf %312, %311 : vector<34x32xf32>
    %cst_134 = arith.constant 0.000000e+00 : f32
    %314 = vector.broadcast %cst_134 : f32 to vector<34x32xf32>
    %315 = arith.cmpf olt, %285, %314 : vector<34x32xf32>
    %cst_135 = arith.constant 0.000000e+00 : f32
    %316 = vector.broadcast %cst_135 : f32 to vector<34x32xf32>
    %317 = arith.subf %316, %313 : vector<34x32xf32>
    %318 = arith.select %315, %317, %313 : vector<34x32xi1>, vector<34x32xf32>
    %cst_136 = arith.constant 1.000000e+00 : f32
    %319 = vector.broadcast %cst_136 : f32 to vector<34x32xf32>
    %320 = arith.addf %319, %318 : vector<34x32xf32>
    %321 = arith.mulf %283, %320 : vector<34x32xf32>
    %322 = arith.truncf %321 : vector<34x32xf32> to vector<34x32xbf16>
    %cst_137 = arith.constant dense<0.000000e+00> : vector<34x32xf32>
    %323 = tpu.matmul %322, %41, %cst_137 {dimension_numbers = #tpu.dot_dimension_numbers<[1], [0], [0], [1], [0, 0, 1, 1], [], []>} : vector<34x32xbf16>, vector<32x32xbf16>, vector<34x32xf32> -> vector<34x32xf32>
    %324 = vector.broadcast %43 : vector<1x32xf32> to vector<34x32xf32>
    %325 = arith.addf %323, %324 : vector<34x32xf32>
    %326 = arith.addf %253, %325 : vector<34x32xf32>
    %c0_138 = arith.constant 0 : index
    %c0_139 = arith.constant 0 : index
    %327 = vector.load %arg23[%c0_138, %c0_139] : memref<34x32xf32, #tpu.memory_space<vmem>>, vector<34x32xf32>
    tpu.vector_store %arg23[%c0_138, %c0_139], %326 {strides = array<i32>} : memref<34x32xf32, #tpu.memory_space<vmem>>, vector<34x32xf32>,
    %c1_140 = arith.constant 1 : index
    %c0_141 = arith.constant 0 : index
    %c0_142 = arith.constant 0 : index
    %328 = vector.load %arg9[%c1_140, %c0_141, %c0_142] : memref<2x32x96xf32, #tpu.memory_space<vmem>>, vector<1x32x96xf32>
    %329 = vector.shape_cast %328 : vector<1x32x96xf32> to vector<32x96xf32>
    %330 = arith.truncf %329 : vector<32x96xf32> to vector<32x96xbf16>
    %c1_143 = arith.constant 1 : index
    %c0_144 = arith.constant 0 : index
    %c0_145 = arith.constant 0 : index
    %331 = vector.load %arg10[%c1_143, %c0_144, %c0_145] : memref<2x32x32xf32, #tpu.memory_space<vmem>>, vector<1x32x32xf32>
    %332 = vector.shape_cast %331 : vector<1x32x32xf32> to vector<32x32xf32>
    %c1_146 = arith.constant 1 : index
    %c0_147 = arith.constant 0 : index
    %c0_148 = arith.constant 0 : index
    %333 = vector.load %arg11[%c1_146, %c0_147, %c0_148] : memref<2x1x32xf32, #tpu.memory_space<vmem>>, vector<1x1x32xf32>
    %334 = vector.shape_cast %333 : vector<1x1x32xf32> to vector<1x32xf32>
    %c1_149 = arith.constant 1 : index
    %c0_150 = arith.constant 0 : index
    %c0_151 = arith.constant 0 : index
    %335 = vector.load %arg14[%c1_149, %c0_150, %c0_151] : memref<2x32x32xf32, #tpu.memory_space<vmem>>, vector<1x32x32xf32>
    %336 = vector.shape_cast %335 : vector<1x32x32xf32> to vector<32x32xf32>
    %337 = arith.truncf %336 : vector<32x32xf32> to vector<32x32xbf16>
    %c1_152 = arith.constant 1 : index
    %c0_153 = arith.constant 0 : index
    %c0_154 = arith.constant 0 : index
    %338 = vector.load %arg15[%c1_152, %c0_153, %c0_154] : memref<2x1x32xf32, #tpu.memory_space<vmem>>, vector<1x1x32xf32>
    %339 = vector.shape_cast %338 : vector<1x1x32xf32> to vector<1x32xf32>
    %c1_155 = arith.constant 1 : index
    %c0_156 = arith.constant 0 : index
    %c0_157 = arith.constant 0 : index
    %340 = vector.load %arg16[%c1_155, %c0_156, %c0_157] : memref<2x32x32xf32, #tpu.memory_space<vmem>>, vector<1x32x32xf32>
    %341 = vector.shape_cast %340 : vector<1x32x32xf32> to vector<32x32xf32>
    %342 = arith.truncf %341 : vector<32x32xf32> to vector<32x32xbf16>
    %c1_158 = arith.constant 1 : index
    %c0_159 = arith.constant 0 : index
    %c0_160 = arith.constant 0 : index
    %343 = vector.load %arg17[%c1_158, %c0_159, %c0_160] : memref<2x1x32xf32, #tpu.memory_space<vmem>>, vector<1x1x32xf32>
    %344 = vector.shape_cast %343 : vector<1x1x32xf32> to vector<1x32xf32>
    %c0_161 = arith.constant 0 : index
    %c0_162 = arith.constant 0 : index
    %345 = vector.load %arg23[%c0_161, %c0_162] : memref<34x32xf32, #tpu.memory_space<vmem>>, vector<34x32xf32>
    %c1_163 = arith.constant 1 : index
    %c0_164 = arith.constant 0 : index
    %c0_165 = arith.constant 0 : index
    %346 = vector.load %arg7[%c1_163, %c0_164, %c0_165] : memref<2x1x32xf32, #tpu.memory_space<vmem>>, vector<1x1x32xf32>
    %347 = vector.shape_cast %346 : vector<1x1x32xf32> to vector<1x32xf32>
    %c1_166 = arith.constant 1 : index
    %c0_167 = arith.constant 0 : index
    %c0_168 = arith.constant 0 : index
    %348 = vector.load %arg8[%c1_166, %c0_167, %c0_168] : memref<2x1x32xf32, #tpu.memory_space<vmem>>, vector<1x1x32xf32>
    %349 = vector.shape_cast %348 : vector<1x1x32xf32> to vector<1x32xf32>
    %cst_169 = arith.constant dense<0.000000e+00> : vector<34xf32>
    %350 = vector.multi_reduction <add>, %345, %cst_169 [1] : vector<34x32xf32> to vector<34xf32>
    %351 = vector.shape_cast %350 : vector<34xf32> to vector<34x1xf32>
    %cst_170 = arith.constant 3.200000e+01 : f32
    %352 = vector.broadcast %cst_170 : f32 to vector<34x1xf32>
    %353 = arith.divf %351, %352 : vector<34x1xf32>
    %354 = vector.broadcast %353 : vector<34x1xf32> to vector<34x32xf32>
    %355 = arith.subf %345, %354 : vector<34x32xf32>
    %356 = arith.mulf %355, %355 : vector<34x32xf32>
    %cst_171 = arith.constant dense<0.000000e+00> : vector<34xf32>
    %357 = vector.multi_reduction <add>, %356, %cst_171 [1] : vector<34x32xf32> to vector<34xf32>
    %358 = vector.shape_cast %357 : vector<34xf32> to vector<34x1xf32>
    %cst_172 = arith.constant 3.200000e+01 : f32
    %359 = vector.broadcast %cst_172 : f32 to vector<34x1xf32>
    %360 = arith.divf %358, %359 : vector<34x1xf32>
    %cst_173 = arith.constant 9.99999974E-6 : f32
    %361 = vector.broadcast %cst_173 : f32 to vector<34x1xf32>
    %362 = arith.addf %360, %361 : vector<34x1xf32>
    %363 = math.rsqrt %362 : vector<34x1xf32>
    %364 = vector.broadcast %363 : vector<34x1xf32> to vector<34x32xf32>
    %365 = arith.mulf %355, %364 : vector<34x32xf32>
    %366 = vector.broadcast %347 : vector<1x32xf32> to vector<34x32xf32>
    %367 = arith.mulf %365, %366 : vector<34x32xf32>
    %368 = vector.broadcast %349 : vector<1x32xf32> to vector<34x32xf32>
    %369 = arith.addf %367, %368 : vector<34x32xf32>
    %370 = arith.truncf %369 : vector<34x32xf32> to vector<34x32xbf16>
    %cst_174 = arith.constant dense<0.000000e+00> : vector<34x96xf32>
    %371 = tpu.matmul %370, %330, %cst_174 {dimension_numbers = #tpu.dot_dimension_numbers<[1], [0], [0], [1], [0, 0, 1, 1], [], []>} : vector<34x32xbf16>, vector<32x96xbf16>, vector<34x96xf32> -> vector<34x96xf32>
    %372 = vector.extract_strided_slice %371 {offsets = [0, 0], sizes = [17, 96], strides = [1, 1]} : vector<34x96xf32> to vector<17x96xf32>
    %cst_175 = arith.constant 0.000000e+00 : f32
    %373 = vector.broadcast %cst_175 : f32 to vector<17x32xf32>
    %374 = vector.extract_strided_slice %372 {offsets = [0, 0], sizes = [17, 8], strides = [1, 1]} : vector<17x96xf32> to vector<17x8xf32>
    %375 = vector.extract_strided_slice %372 {offsets = [0, 32], sizes = [17, 8], strides = [1, 1]} : vector<17x96xf32> to vector<17x8xf32>
    %376 = vector.extract_strided_slice %372 {offsets = [0, 64], sizes = [17, 8], strides = [1, 1]} : vector<17x96xf32> to vector<17x8xf32>
    %cst_176 = arith.constant dense<0.000000e+00> : vector<17x17xf32>
    %377 = tpu.matmul %374, %375, %cst_176 {dimension_numbers = #tpu.dot_dimension_numbers<[1], [1], [0], [0], [0, 0, 1, 0], [], []>} : vector<17x8xf32>, vector<17x8xf32>, vector<17x17xf32> -> vector<17x17xf32>
    %cst_177 = arith.constant 0.353553385 : f32
    %378 = vector.broadcast %cst_177 : f32 to vector<17x17xf32>
    %379 = arith.mulf %377, %378 : vector<17x17xf32>
    %cst_178 = arith.constant dense<0xFF800000> : vector<17xf32>
    %380 = vector.multi_reduction <maximumf>, %379, %cst_178 [1] : vector<17x17xf32> to vector<17xf32>
    %381 = vector.shape_cast %380 : vector<17xf32> to vector<17x1xf32>
    %382 = vector.broadcast %381 : vector<17x1xf32> to vector<17x17xf32>
    %383 = arith.subf %379, %382 : vector<17x17xf32>
    %384 = math.exp %383 : vector<17x17xf32>
    %cst_179 = arith.constant dense<0.000000e+00> : vector<17xf32>
    %385 = vector.multi_reduction <add>, %384, %cst_179 [1] : vector<17x17xf32> to vector<17xf32>
    %386 = vector.shape_cast %385 : vector<17xf32> to vector<17x1xf32>
    %387 = vector.broadcast %386 : vector<17x1xf32> to vector<17x17xf32>
    %388 = arith.divf %384, %387 : vector<17x17xf32>
    %cst_180 = arith.constant dense<0.000000e+00> : vector<17x8xf32>
    %389 = tpu.matmul %388, %376, %cst_180 {dimension_numbers = #tpu.dot_dimension_numbers<[1], [0], [0], [1], [0, 0, 1, 1], [], []>} : vector<17x17xf32>, vector<17x8xf32>, vector<17x8xf32> -> vector<17x8xf32>
    %390 = arith.truncf %389 : vector<17x8xf32> to vector<17x8xbf16>
    %391 = vector.extract_strided_slice %332 {offsets = [0, 0], sizes = [8, 32], strides = [1, 1]} : vector<32x32xf32> to vector<8x32xf32>
    %392 = arith.truncf %391 : vector<8x32xf32> to vector<8x32xbf16>
    %cst_181 = arith.constant dense<0.000000e+00> : vector<17x32xf32>
    %393 = tpu.matmul %390, %392, %cst_181 {dimension_numbers = #tpu.dot_dimension_numbers<[1], [0], [0], [1], [0, 0, 1, 1], [], []>} : vector<17x8xbf16>, vector<8x32xbf16>, vector<17x32xf32> -> vector<17x32xf32>
    %394 = arith.addf %373, %393 : vector<17x32xf32>
    %395 = vector.extract_strided_slice %372 {offsets = [0, 8], sizes = [17, 8], strides = [1, 1]} : vector<17x96xf32> to vector<17x8xf32>
    %396 = vector.extract_strided_slice %372 {offsets = [0, 40], sizes = [17, 8], strides = [1, 1]} : vector<17x96xf32> to vector<17x8xf32>
    %397 = vector.extract_strided_slice %372 {offsets = [0, 72], sizes = [17, 8], strides = [1, 1]} : vector<17x96xf32> to vector<17x8xf32>
    %cst_182 = arith.constant dense<0.000000e+00> : vector<17x17xf32>
    %398 = tpu.matmul %395, %396, %cst_182 {dimension_numbers = #tpu.dot_dimension_numbers<[1], [1], [0], [0], [0, 0, 1, 0], [], []>} : vector<17x8xf32>, vector<17x8xf32>, vector<17x17xf32> -> vector<17x17xf32>
    %cst_183 = arith.constant 0.353553385 : f32
    %399 = vector.broadcast %cst_183 : f32 to vector<17x17xf32>
    %400 = arith.mulf %398, %399 : vector<17x17xf32>
    %cst_184 = arith.constant dense<0xFF800000> : vector<17xf32>
    %401 = vector.multi_reduction <maximumf>, %400, %cst_184 [1] : vector<17x17xf32> to vector<17xf32>
    %402 = vector.shape_cast %401 : vector<17xf32> to vector<17x1xf32>
    %403 = vector.broadcast %402 : vector<17x1xf32> to vector<17x17xf32>
    %404 = arith.subf %400, %403 : vector<17x17xf32>
    %405 = math.exp %404 : vector<17x17xf32>
    %cst_185 = arith.constant dense<0.000000e+00> : vector<17xf32>
    %406 = vector.multi_reduction <add>, %405, %cst_185 [1] : vector<17x17xf32> to vector<17xf32>
    %407 = vector.shape_cast %406 : vector<17xf32> to vector<17x1xf32>
    %408 = vector.broadcast %407 : vector<17x1xf32> to vector<17x17xf32>
    %409 = arith.divf %405, %408 : vector<17x17xf32>
    %cst_186 = arith.constant dense<0.000000e+00> : vector<17x8xf32>
    %410 = tpu.matmul %409, %397, %cst_186 {dimension_numbers = #tpu.dot_dimension_numbers<[1], [0], [0], [1], [0, 0, 1, 1], [], []>} : vector<17x17xf32>, vector<17x8xf32>, vector<17x8xf32> -> vector<17x8xf32>
    %411 = arith.truncf %410 : vector<17x8xf32> to vector<17x8xbf16>
    %412 = vector.extract_strided_slice %332 {offsets = [8, 0], sizes = [8, 32], strides = [1, 1]} : vector<32x32xf32> to vector<8x32xf32>
    %413 = arith.truncf %412 : vector<8x32xf32> to vector<8x32xbf16>
    %cst_187 = arith.constant dense<0.000000e+00> : vector<17x32xf32>
    %414 = tpu.matmul %411, %413, %cst_187 {dimension_numbers = #tpu.dot_dimension_numbers<[1], [0], [0], [1], [0, 0, 1, 1], [], []>} : vector<17x8xbf16>, vector<8x32xbf16>, vector<17x32xf32> -> vector<17x32xf32>
    %415 = arith.addf %394, %414 : vector<17x32xf32>
    %416 = vector.extract_strided_slice %372 {offsets = [0, 16], sizes = [17, 8], strides = [1, 1]} : vector<17x96xf32> to vector<17x8xf32>
    %417 = vector.extract_strided_slice %372 {offsets = [0, 48], sizes = [17, 8], strides = [1, 1]} : vector<17x96xf32> to vector<17x8xf32>
    %418 = vector.extract_strided_slice %372 {offsets = [0, 80], sizes = [17, 8], strides = [1, 1]} : vector<17x96xf32> to vector<17x8xf32>
    %cst_188 = arith.constant dense<0.000000e+00> : vector<17x17xf32>
    %419 = tpu.matmul %416, %417, %cst_188 {dimension_numbers = #tpu.dot_dimension_numbers<[1], [1], [0], [0], [0, 0, 1, 0], [], []>} : vector<17x8xf32>, vector<17x8xf32>, vector<17x17xf32> -> vector<17x17xf32>
    %cst_189 = arith.constant 0.353553385 : f32
    %420 = vector.broadcast %cst_189 : f32 to vector<17x17xf32>
    %421 = arith.mulf %419, %420 : vector<17x17xf32>
    %cst_190 = arith.constant dense<0xFF800000> : vector<17xf32>
    %422 = vector.multi_reduction <maximumf>, %421, %cst_190 [1] : vector<17x17xf32> to vector<17xf32>
    %423 = vector.shape_cast %422 : vector<17xf32> to vector<17x1xf32>
    %424 = vector.broadcast %423 : vector<17x1xf32> to vector<17x17xf32>
    %425 = arith.subf %421, %424 : vector<17x17xf32>
    %426 = math.exp %425 : vector<17x17xf32>
    %cst_191 = arith.constant dense<0.000000e+00> : vector<17xf32>
    %427 = vector.multi_reduction <add>, %426, %cst_191 [1] : vector<17x17xf32> to vector<17xf32>
    %428 = vector.shape_cast %427 : vector<17xf32> to vector<17x1xf32>
    %429 = vector.broadcast %428 : vector<17x1xf32> to vector<17x17xf32>
    %430 = arith.divf %426, %429 : vector<17x17xf32>
    %cst_192 = arith.constant dense<0.000000e+00> : vector<17x8xf32>
    %431 = tpu.matmul %430, %418, %cst_192 {dimension_numbers = #tpu.dot_dimension_numbers<[1], [0], [0], [1], [0, 0, 1, 1], [], []>} : vector<17x17xf32>, vector<17x8xf32>, vector<17x8xf32> -> vector<17x8xf32>
    %432 = arith.truncf %431 : vector<17x8xf32> to vector<17x8xbf16>
    %433 = vector.extract_strided_slice %332 {offsets = [16, 0], sizes = [8, 32], strides = [1, 1]} : vector<32x32xf32> to vector<8x32xf32>
    %434 = arith.truncf %433 : vector<8x32xf32> to vector<8x32xbf16>
    %cst_193 = arith.constant dense<0.000000e+00> : vector<17x32xf32>
    %435 = tpu.matmul %432, %434, %cst_193 {dimension_numbers = #tpu.dot_dimension_numbers<[1], [0], [0], [1], [0, 0, 1, 1], [], []>} : vector<17x8xbf16>, vector<8x32xbf16>, vector<17x32xf32> -> vector<17x32xf32>
    %436 = arith.addf %415, %435 : vector<17x32xf32>
    %437 = vector.extract_strided_slice %372 {offsets = [0, 24], sizes = [17, 8], strides = [1, 1]} : vector<17x96xf32> to vector<17x8xf32>
    %438 = vector.extract_strided_slice %372 {offsets = [0, 56], sizes = [17, 8], strides = [1, 1]} : vector<17x96xf32> to vector<17x8xf32>
    %439 = vector.extract_strided_slice %372 {offsets = [0, 88], sizes = [17, 8], strides = [1, 1]} : vector<17x96xf32> to vector<17x8xf32>
    %cst_194 = arith.constant dense<0.000000e+00> : vector<17x17xf32>
    %440 = tpu.matmul %437, %438, %cst_194 {dimension_numbers = #tpu.dot_dimension_numbers<[1], [1], [0], [0], [0, 0, 1, 0], [], []>} : vector<17x8xf32>, vector<17x8xf32>, vector<17x17xf32> -> vector<17x17xf32>
    %cst_195 = arith.constant 0.353553385 : f32
    %441 = vector.broadcast %cst_195 : f32 to vector<17x17xf32>
    %442 = arith.mulf %440, %441 : vector<17x17xf32>
    %cst_196 = arith.constant dense<0xFF800000> : vector<17xf32>
    %443 = vector.multi_reduction <maximumf>, %442, %cst_196 [1] : vector<17x17xf32> to vector<17xf32>
    %444 = vector.shape_cast %443 : vector<17xf32> to vector<17x1xf32>
    %445 = vector.broadcast %444 : vector<17x1xf32> to vector<17x17xf32>
    %446 = arith.subf %442, %445 : vector<17x17xf32>
    %447 = math.exp %446 : vector<17x17xf32>
    %cst_197 = arith.constant dense<0.000000e+00> : vector<17xf32>
    %448 = vector.multi_reduction <add>, %447, %cst_197 [1] : vector<17x17xf32> to vector<17xf32>
    %449 = vector.shape_cast %448 : vector<17xf32> to vector<17x1xf32>
    %450 = vector.broadcast %449 : vector<17x1xf32> to vector<17x17xf32>
    %451 = arith.divf %447, %450 : vector<17x17xf32>
    %cst_198 = arith.constant dense<0.000000e+00> : vector<17x8xf32>
    %452 = tpu.matmul %451, %439, %cst_198 {dimension_numbers = #tpu.dot_dimension_numbers<[1], [0], [0], [1], [0, 0, 1, 1], [], []>} : vector<17x17xf32>, vector<17x8xf32>, vector<17x8xf32> -> vector<17x8xf32>
    %453 = arith.truncf %452 : vector<17x8xf32> to vector<17x8xbf16>
    %454 = vector.extract_strided_slice %332 {offsets = [24, 0], sizes = [8, 32], strides = [1, 1]} : vector<32x32xf32> to vector<8x32xf32>
    %455 = arith.truncf %454 : vector<8x32xf32> to vector<8x32xbf16>
    %cst_199 = arith.constant dense<0.000000e+00> : vector<17x32xf32>
    %456 = tpu.matmul %453, %455, %cst_199 {dimension_numbers = #tpu.dot_dimension_numbers<[1], [0], [0], [1], [0, 0, 1, 1], [], []>} : vector<17x8xbf16>, vector<8x32xbf16>, vector<17x32xf32> -> vector<17x32xf32>
    %457 = arith.addf %436, %456 : vector<17x32xf32>
    %458 = vector.extract_strided_slice %345 {offsets = [0, 0], sizes = [17, 32], strides = [1, 1]} : vector<34x32xf32> to vector<17x32xf32>
    %459 = arith.addf %458, %457 : vector<17x32xf32>
    %460 = vector.broadcast %334 : vector<1x32xf32> to vector<17x32xf32>
    %461 = arith.addf %459, %460 : vector<17x32xf32>
    %c0_200 = arith.constant 0 : index
    %c0_201 = arith.constant 0 : index
    %462 = vector.load %arg23[%c0_200, %c0_201] : memref<34x32xf32, #tpu.memory_space<vmem>>, vector<17x32xf32>
    tpu.vector_store %arg23[%c0_200, %c0_201], %461 {strides = array<i32>} : memref<34x32xf32, #tpu.memory_space<vmem>>, vector<17x32xf32>,
    %463 = vector.extract_strided_slice %371 {offsets = [17, 0], sizes = [17, 96], strides = [1, 1]} : vector<34x96xf32> to vector<17x96xf32>
    %cst_202 = arith.constant 0.000000e+00 : f32
    %464 = vector.broadcast %cst_202 : f32 to vector<17x32xf32>
    %465 = vector.extract_strided_slice %463 {offsets = [0, 0], sizes = [17, 8], strides = [1, 1]} : vector<17x96xf32> to vector<17x8xf32>
    %466 = vector.extract_strided_slice %463 {offsets = [0, 32], sizes = [17, 8], strides = [1, 1]} : vector<17x96xf32> to vector<17x8xf32>
    %467 = vector.extract_strided_slice %463 {offsets = [0, 64], sizes = [17, 8], strides = [1, 1]} : vector<17x96xf32> to vector<17x8xf32>
    %cst_203 = arith.constant dense<0.000000e+00> : vector<17x17xf32>
    %468 = tpu.matmul %465, %466, %cst_203 {dimension_numbers = #tpu.dot_dimension_numbers<[1], [1], [0], [0], [0, 0, 1, 0], [], []>} : vector<17x8xf32>, vector<17x8xf32>, vector<17x17xf32> -> vector<17x17xf32>
    %cst_204 = arith.constant 0.353553385 : f32
    %469 = vector.broadcast %cst_204 : f32 to vector<17x17xf32>
    %470 = arith.mulf %468, %469 : vector<17x17xf32>
    %cst_205 = arith.constant dense<0xFF800000> : vector<17xf32>
    %471 = vector.multi_reduction <maximumf>, %470, %cst_205 [1] : vector<17x17xf32> to vector<17xf32>
    %472 = vector.shape_cast %471 : vector<17xf32> to vector<17x1xf32>
    %473 = vector.broadcast %472 : vector<17x1xf32> to vector<17x17xf32>
    %474 = arith.subf %470, %473 : vector<17x17xf32>
    %475 = math.exp %474 : vector<17x17xf32>
    %cst_206 = arith.constant dense<0.000000e+00> : vector<17xf32>
    %476 = vector.multi_reduction <add>, %475, %cst_206 [1] : vector<17x17xf32> to vector<17xf32>
    %477 = vector.shape_cast %476 : vector<17xf32> to vector<17x1xf32>
    %478 = vector.broadcast %477 : vector<17x1xf32> to vector<17x17xf32>
    %479 = arith.divf %475, %478 : vector<17x17xf32>
    %cst_207 = arith.constant dense<0.000000e+00> : vector<17x8xf32>
    %480 = tpu.matmul %479, %467, %cst_207 {dimension_numbers = #tpu.dot_dimension_numbers<[1], [0], [0], [1], [0, 0, 1, 1], [], []>} : vector<17x17xf32>, vector<17x8xf32>, vector<17x8xf32> -> vector<17x8xf32>
    %481 = arith.truncf %480 : vector<17x8xf32> to vector<17x8xbf16>
    %482 = vector.extract_strided_slice %332 {offsets = [0, 0], sizes = [8, 32], strides = [1, 1]} : vector<32x32xf32> to vector<8x32xf32>
    %483 = arith.truncf %482 : vector<8x32xf32> to vector<8x32xbf16>
    %cst_208 = arith.constant dense<0.000000e+00> : vector<17x32xf32>
    %484 = tpu.matmul %481, %483, %cst_208 {dimension_numbers = #tpu.dot_dimension_numbers<[1], [0], [0], [1], [0, 0, 1, 1], [], []>} : vector<17x8xbf16>, vector<8x32xbf16>, vector<17x32xf32> -> vector<17x32xf32>
    %485 = arith.addf %464, %484 : vector<17x32xf32>
    %486 = vector.extract_strided_slice %463 {offsets = [0, 8], sizes = [17, 8], strides = [1, 1]} : vector<17x96xf32> to vector<17x8xf32>
    %487 = vector.extract_strided_slice %463 {offsets = [0, 40], sizes = [17, 8], strides = [1, 1]} : vector<17x96xf32> to vector<17x8xf32>
    %488 = vector.extract_strided_slice %463 {offsets = [0, 72], sizes = [17, 8], strides = [1, 1]} : vector<17x96xf32> to vector<17x8xf32>
    %cst_209 = arith.constant dense<0.000000e+00> : vector<17x17xf32>
    %489 = tpu.matmul %486, %487, %cst_209 {dimension_numbers = #tpu.dot_dimension_numbers<[1], [1], [0], [0], [0, 0, 1, 0], [], []>} : vector<17x8xf32>, vector<17x8xf32>, vector<17x17xf32> -> vector<17x17xf32>
    %cst_210 = arith.constant 0.353553385 : f32
    %490 = vector.broadcast %cst_210 : f32 to vector<17x17xf32>
    %491 = arith.mulf %489, %490 : vector<17x17xf32>
    %cst_211 = arith.constant dense<0xFF800000> : vector<17xf32>
    %492 = vector.multi_reduction <maximumf>, %491, %cst_211 [1] : vector<17x17xf32> to vector<17xf32>
    %493 = vector.shape_cast %492 : vector<17xf32> to vector<17x1xf32>
    %494 = vector.broadcast %493 : vector<17x1xf32> to vector<17x17xf32>
    %495 = arith.subf %491, %494 : vector<17x17xf32>
    %496 = math.exp %495 : vector<17x17xf32>
    %cst_212 = arith.constant dense<0.000000e+00> : vector<17xf32>
    %497 = vector.multi_reduction <add>, %496, %cst_212 [1] : vector<17x17xf32> to vector<17xf32>
    %498 = vector.shape_cast %497 : vector<17xf32> to vector<17x1xf32>
    %499 = vector.broadcast %498 : vector<17x1xf32> to vector<17x17xf32>
    %500 = arith.divf %496, %499 : vector<17x17xf32>
    %cst_213 = arith.constant dense<0.000000e+00> : vector<17x8xf32>
    %501 = tpu.matmul %500, %488, %cst_213 {dimension_numbers = #tpu.dot_dimension_numbers<[1], [0], [0], [1], [0, 0, 1, 1], [], []>} : vector<17x17xf32>, vector<17x8xf32>, vector<17x8xf32> -> vector<17x8xf32>
    %502 = arith.truncf %501 : vector<17x8xf32> to vector<17x8xbf16>
    %503 = vector.extract_strided_slice %332 {offsets = [8, 0], sizes = [8, 32], strides = [1, 1]} : vector<32x32xf32> to vector<8x32xf32>
    %504 = arith.truncf %503 : vector<8x32xf32> to vector<8x32xbf16>
    %cst_214 = arith.constant dense<0.000000e+00> : vector<17x32xf32>
    %505 = tpu.matmul %502, %504, %cst_214 {dimension_numbers = #tpu.dot_dimension_numbers<[1], [0], [0], [1], [0, 0, 1, 1], [], []>} : vector<17x8xbf16>, vector<8x32xbf16>, vector<17x32xf32> -> vector<17x32xf32>
    %506 = arith.addf %485, %505 : vector<17x32xf32>
    %507 = vector.extract_strided_slice %463 {offsets = [0, 16], sizes = [17, 8], strides = [1, 1]} : vector<17x96xf32> to vector<17x8xf32>
    %508 = vector.extract_strided_slice %463 {offsets = [0, 48], sizes = [17, 8], strides = [1, 1]} : vector<17x96xf32> to vector<17x8xf32>
    %509 = vector.extract_strided_slice %463 {offsets = [0, 80], sizes = [17, 8], strides = [1, 1]} : vector<17x96xf32> to vector<17x8xf32>
    %cst_215 = arith.constant dense<0.000000e+00> : vector<17x17xf32>
    %510 = tpu.matmul %507, %508, %cst_215 {dimension_numbers = #tpu.dot_dimension_numbers<[1], [1], [0], [0], [0, 0, 1, 0], [], []>} : vector<17x8xf32>, vector<17x8xf32>, vector<17x17xf32> -> vector<17x17xf32>
    %cst_216 = arith.constant 0.353553385 : f32
    %511 = vector.broadcast %cst_216 : f32 to vector<17x17xf32>
    %512 = arith.mulf %510, %511 : vector<17x17xf32>
    %cst_217 = arith.constant dense<0xFF800000> : vector<17xf32>
    %513 = vector.multi_reduction <maximumf>, %512, %cst_217 [1] : vector<17x17xf32> to vector<17xf32>
    %514 = vector.shape_cast %513 : vector<17xf32> to vector<17x1xf32>
    %515 = vector.broadcast %514 : vector<17x1xf32> to vector<17x17xf32>
    %516 = arith.subf %512, %515 : vector<17x17xf32>
    %517 = math.exp %516 : vector<17x17xf32>
    %cst_218 = arith.constant dense<0.000000e+00> : vector<17xf32>
    %518 = vector.multi_reduction <add>, %517, %cst_218 [1] : vector<17x17xf32> to vector<17xf32>
    %519 = vector.shape_cast %518 : vector<17xf32> to vector<17x1xf32>
    %520 = vector.broadcast %519 : vector<17x1xf32> to vector<17x17xf32>
    %521 = arith.divf %517, %520 : vector<17x17xf32>
    %cst_219 = arith.constant dense<0.000000e+00> : vector<17x8xf32>
    %522 = tpu.matmul %521, %509, %cst_219 {dimension_numbers = #tpu.dot_dimension_numbers<[1], [0], [0], [1], [0, 0, 1, 1], [], []>} : vector<17x17xf32>, vector<17x8xf32>, vector<17x8xf32> -> vector<17x8xf32>
    %523 = arith.truncf %522 : vector<17x8xf32> to vector<17x8xbf16>
    %524 = vector.extract_strided_slice %332 {offsets = [16, 0], sizes = [8, 32], strides = [1, 1]} : vector<32x32xf32> to vector<8x32xf32>
    %525 = arith.truncf %524 : vector<8x32xf32> to vector<8x32xbf16>
    %cst_220 = arith.constant dense<0.000000e+00> : vector<17x32xf32>
    %526 = tpu.matmul %523, %525, %cst_220 {dimension_numbers = #tpu.dot_dimension_numbers<[1], [0], [0], [1], [0, 0, 1, 1], [], []>} : vector<17x8xbf16>, vector<8x32xbf16>, vector<17x32xf32> -> vector<17x32xf32>
    %527 = arith.addf %506, %526 : vector<17x32xf32>
    %528 = vector.extract_strided_slice %463 {offsets = [0, 24], sizes = [17, 8], strides = [1, 1]} : vector<17x96xf32> to vector<17x8xf32>
    %529 = vector.extract_strided_slice %463 {offsets = [0, 56], sizes = [17, 8], strides = [1, 1]} : vector<17x96xf32> to vector<17x8xf32>
    %530 = vector.extract_strided_slice %463 {offsets = [0, 88], sizes = [17, 8], strides = [1, 1]} : vector<17x96xf32> to vector<17x8xf32>
    %cst_221 = arith.constant dense<0.000000e+00> : vector<17x17xf32>
    %531 = tpu.matmul %528, %529, %cst_221 {dimension_numbers = #tpu.dot_dimension_numbers<[1], [1], [0], [0], [0, 0, 1, 0], [], []>} : vector<17x8xf32>, vector<17x8xf32>, vector<17x17xf32> -> vector<17x17xf32>
    %cst_222 = arith.constant 0.353553385 : f32
    %532 = vector.broadcast %cst_222 : f32 to vector<17x17xf32>
    %533 = arith.mulf %531, %532 : vector<17x17xf32>
    %cst_223 = arith.constant dense<0xFF800000> : vector<17xf32>
    %534 = vector.multi_reduction <maximumf>, %533, %cst_223 [1] : vector<17x17xf32> to vector<17xf32>
    %535 = vector.shape_cast %534 : vector<17xf32> to vector<17x1xf32>
    %536 = vector.broadcast %535 : vector<17x1xf32> to vector<17x17xf32>
    %537 = arith.subf %533, %536 : vector<17x17xf32>
    %538 = math.exp %537 : vector<17x17xf32>
    %cst_224 = arith.constant dense<0.000000e+00> : vector<17xf32>
    %539 = vector.multi_reduction <add>, %538, %cst_224 [1] : vector<17x17xf32> to vector<17xf32>
    %540 = vector.shape_cast %539 : vector<17xf32> to vector<17x1xf32>
    %541 = vector.broadcast %540 : vector<17x1xf32> to vector<17x17xf32>
    %542 = arith.divf %538, %541 : vector<17x17xf32>
    %cst_225 = arith.constant dense<0.000000e+00> : vector<17x8xf32>
    %543 = tpu.matmul %542, %530, %cst_225 {dimension_numbers = #tpu.dot_dimension_numbers<[1], [0], [0], [1], [0, 0, 1, 1], [], []>} : vector<17x17xf32>, vector<17x8xf32>, vector<17x8xf32> -> vector<17x8xf32>
    %544 = arith.truncf %543 : vector<17x8xf32> to vector<17x8xbf16>
    %545 = vector.extract_strided_slice %332 {offsets = [24, 0], sizes = [8, 32], strides = [1, 1]} : vector<32x32xf32> to vector<8x32xf32>
    %546 = arith.truncf %545 : vector<8x32xf32> to vector<8x32xbf16>
    %cst_226 = arith.constant dense<0.000000e+00> : vector<17x32xf32>
    %547 = tpu.matmul %544, %546, %cst_226 {dimension_numbers = #tpu.dot_dimension_numbers<[1], [0], [0], [1], [0, 0, 1, 1], [], []>} : vector<17x8xbf16>, vector<8x32xbf16>, vector<17x32xf32> -> vector<17x32xf32>
    %548 = arith.addf %527, %547 : vector<17x32xf32>
    %549 = vector.extract_strided_slice %345 {offsets = [17, 0], sizes = [17, 32], strides = [1, 1]} : vector<34x32xf32> to vector<17x32xf32>
    %550 = arith.addf %549, %548 : vector<17x32xf32>
    %551 = vector.broadcast %334 : vector<1x32xf32> to vector<17x32xf32>
    %552 = arith.addf %550, %551 : vector<17x32xf32>
    %c17_227 = arith.constant 17 : index
    %c0_228 = arith.constant 0 : index
    %553 = vector.load %arg23[%c17_227, %c0_228] : memref<34x32xf32, #tpu.memory_space<vmem>>, vector<17x32xf32>
    tpu.vector_store %arg23[%c17_227, %c0_228], %552 {strides = array<i32>} : memref<34x32xf32, #tpu.memory_space<vmem>>, vector<17x32xf32>,
    %c0_229 = arith.constant 0 : index
    %c0_230 = arith.constant 0 : index
    %554 = vector.load %arg23[%c0_229, %c0_230] : memref<34x32xf32, #tpu.memory_space<vmem>>, vector<34x32xf32>
    %c1_231 = arith.constant 1 : index
    %c0_232 = arith.constant 0 : index
    %c0_233 = arith.constant 0 : index
    %555 = vector.load %arg12[%c1_231, %c0_232, %c0_233] : memref<2x1x32xf32, #tpu.memory_space<vmem>>, vector<1x1x32xf32>
    %556 = vector.shape_cast %555 : vector<1x1x32xf32> to vector<1x32xf32>
    %c1_234 = arith.constant 1 : index
    %c0_235 = arith.constant 0 : index
    %c0_236 = arith.constant 0 : index
    %557 = vector.load %arg13[%c1_234, %c0_235, %c0_236] : memref<2x1x32xf32, #tpu.memory_space<vmem>>, vector<1x1x32xf32>
    %558 = vector.shape_cast %557 : vector<1x1x32xf32> to vector<1x32xf32>
    %cst_237 = arith.constant dense<0.000000e+00> : vector<34xf32>
    %559 = vector.multi_reduction <add>, %554, %cst_237 [1] : vector<34x32xf32> to vector<34xf32>
    %560 = vector.shape_cast %559 : vector<34xf32> to vector<34x1xf32>
    %cst_238 = arith.constant 3.200000e+01 : f32
    %561 = vector.broadcast %cst_238 : f32 to vector<34x1xf32>
    %562 = arith.divf %560, %561 : vector<34x1xf32>
    %563 = vector.broadcast %562 : vector<34x1xf32> to vector<34x32xf32>
    %564 = arith.subf %554, %563 : vector<34x32xf32>
    %565 = arith.mulf %564, %564 : vector<34x32xf32>
    %cst_239 = arith.constant dense<0.000000e+00> : vector<34xf32>
    %566 = vector.multi_reduction <add>, %565, %cst_239 [1] : vector<34x32xf32> to vector<34xf32>
    %567 = vector.shape_cast %566 : vector<34xf32> to vector<34x1xf32>
    %cst_240 = arith.constant 3.200000e+01 : f32
    %568 = vector.broadcast %cst_240 : f32 to vector<34x1xf32>
    %569 = arith.divf %567, %568 : vector<34x1xf32>
    %cst_241 = arith.constant 9.99999974E-6 : f32
    %570 = vector.broadcast %cst_241 : f32 to vector<34x1xf32>
    %571 = arith.addf %569, %570 : vector<34x1xf32>
    %572 = math.rsqrt %571 : vector<34x1xf32>
    %573 = vector.broadcast %572 : vector<34x1xf32> to vector<34x32xf32>
    %574 = arith.mulf %564, %573 : vector<34x32xf32>
    %575 = vector.broadcast %556 : vector<1x32xf32> to vector<34x32xf32>
    %576 = arith.mulf %574, %575 : vector<34x32xf32>
    %577 = vector.broadcast %558 : vector<1x32xf32> to vector<34x32xf32>
    %578 = arith.addf %576, %577 : vector<34x32xf32>
    %579 = arith.truncf %578 : vector<34x32xf32> to vector<34x32xbf16>
    %cst_242 = arith.constant dense<0.000000e+00> : vector<34x32xf32>
    %580 = tpu.matmul %579, %337, %cst_242 {dimension_numbers = #tpu.dot_dimension_numbers<[1], [0], [0], [1], [0, 0, 1, 1], [], []>} : vector<34x32xbf16>, vector<32x32xbf16>, vector<34x32xf32> -> vector<34x32xf32>
    %581 = vector.broadcast %339 : vector<1x32xf32> to vector<34x32xf32>
    %582 = arith.addf %580, %581 : vector<34x32xf32>
    %cst_243 = arith.constant 5.000000e-01 : f32
    %583 = vector.broadcast %cst_243 : f32 to vector<34x32xf32>
    %584 = arith.mulf %583, %582 : vector<34x32xf32>
    %cst_244 = arith.constant 0.707106769 : f32
    %585 = vector.broadcast %cst_244 : f32 to vector<34x32xf32>
    %586 = arith.mulf %582, %585 : vector<34x32xf32>
    %587 = math.absf %586 : vector<34x32xf32>
    %cst_245 = arith.constant 0.327591091 : f32
    %588 = vector.broadcast %cst_245 : f32 to vector<34x32xf32>
    %589 = arith.mulf %588, %587 : vector<34x32xf32>
    %cst_246 = arith.constant 1.000000e+00 : f32
    %590 = vector.broadcast %cst_246 : f32 to vector<34x32xf32>
    %591 = arith.addf %590, %589 : vector<34x32xf32>
    %cst_247 = arith.constant 1.000000e+00 : f32
    %592 = vector.broadcast %cst_247 : f32 to vector<34x32xf32>
    %593 = arith.divf %592, %591 : vector<34x32xf32>
    %cst_248 = arith.constant 1.06140542 : f32
    %594 = vector.broadcast %cst_248 : f32 to vector<34x32xf32>
    %595 = arith.mulf %593, %594 : vector<34x32xf32>
    %cst_249 = arith.constant -1.45315206 : f32
    %596 = vector.broadcast %cst_249 : f32 to vector<34x32xf32>
    %597 = arith.addf %596, %595 : vector<34x32xf32>
    %598 = arith.mulf %593, %597 : vector<34x32xf32>
    %cst_250 = arith.constant 1.42141378 : f32
    %599 = vector.broadcast %cst_250 : f32 to vector<34x32xf32>
    %600 = arith.addf %599, %598 : vector<34x32xf32>
    %601 = arith.mulf %593, %600 : vector<34x32xf32>
    %cst_251 = arith.constant -0.284496725 : f32
    %602 = vector.broadcast %cst_251 : f32 to vector<34x32xf32>
    %603 = arith.addf %602, %601 : vector<34x32xf32>
    %604 = arith.mulf %593, %603 : vector<34x32xf32>
    %cst_252 = arith.constant 0.254829586 : f32
    %605 = vector.broadcast %cst_252 : f32 to vector<34x32xf32>
    %606 = arith.addf %605, %604 : vector<34x32xf32>
    %607 = arith.mulf %593, %606 : vector<34x32xf32>
    %cst_253 = arith.constant 0.000000e+00 : f32
    %608 = vector.broadcast %cst_253 : f32 to vector<34x32xf32>
    %609 = arith.subf %608, %587 : vector<34x32xf32>
    %610 = arith.mulf %609, %587 : vector<34x32xf32>
    %611 = math.exp %610 : vector<34x32xf32>
    %612 = arith.mulf %607, %611 : vector<34x32xf32>
    %cst_254 = arith.constant 1.000000e+00 : f32
    %613 = vector.broadcast %cst_254 : f32 to vector<34x32xf32>
    %614 = arith.subf %613, %612 : vector<34x32xf32>
    %cst_255 = arith.constant 0.000000e+00 : f32
    %615 = vector.broadcast %cst_255 : f32 to vector<34x32xf32>
    %616 = arith.cmpf olt, %586, %615 : vector<34x32xf32>
    %cst_256 = arith.constant 0.000000e+00 : f32
    %617 = vector.broadcast %cst_256 : f32 to vector<34x32xf32>
    %618 = arith.subf %617, %614 : vector<34x32xf32>
    %619 = arith.select %616, %618, %614 : vector<34x32xi1>, vector<34x32xf32>
    %cst_257 = arith.constant 1.000000e+00 : f32
    %620 = vector.broadcast %cst_257 : f32 to vector<34x32xf32>
    %621 = arith.addf %620, %619 : vector<34x32xf32>
    %622 = arith.mulf %584, %621 : vector<34x32xf32>
    %623 = arith.truncf %622 : vector<34x32xf32> to vector<34x32xbf16>
    %cst_258 = arith.constant dense<0.000000e+00> : vector<34x32xf32>
    %624 = tpu.matmul %623, %342, %cst_258 {dimension_numbers = #tpu.dot_dimension_numbers<[1], [0], [0], [1], [0, 0, 1, 1], [], []>} : vector<34x32xbf16>, vector<32x32xbf16>, vector<34x32xf32> -> vector<34x32xf32>
    %625 = vector.broadcast %344 : vector<1x32xf32> to vector<34x32xf32>
    %626 = arith.addf %624, %625 : vector<34x32xf32>
    %627 = arith.addf %554, %626 : vector<34x32xf32>
    %c0_259 = arith.constant 0 : index
    %c0_260 = arith.constant 0 : index
    %628 = vector.load %arg23[%c0_259, %c0_260] : memref<34x32xf32, #tpu.memory_space<vmem>>, vector<34x32xf32>
    tpu.vector_store %arg23[%c0_259, %c0_260], %627 {strides = array<i32>} : memref<34x32xf32, #tpu.memory_space<vmem>>, vector<34x32xf32>,
    %c0_261 = arith.constant 0 : index
    %c0_262 = arith.constant 0 : index
    %629 = vector.load %arg23[%c0_261, %c0_262] : memref<34x32xf32, #tpu.memory_space<vmem>>, vector<34x32xf32>
    %c0_263 = arith.constant 0 : index
    %c0_264 = arith.constant 0 : index
    %630 = vector.load %arg18[%c0_263, %c0_264] : memref<16x17xf32, #tpu.memory_space<vmem>>, vector<16x17xf32>
    %631 = arith.truncf %630 : vector<16x17xf32> to vector<16x17xbf16>
    %c0_265 = arith.constant 0 : index
    %c0_266 = arith.constant 0 : index
    %632 = vector.load %arg19[%c0_265, %c0_266] : memref<16x1xf32, #tpu.memory_space<vmem>>, vector<16x1xf32>
    %c0_267 = arith.constant 0 : index
    %c0_268 = arith.constant 0 : index
    %633 = vector.load %arg20[%c0_267, %c0_268] : memref<32x32xf32, #tpu.memory_space<vmem>>, vector<32x32xf32>
    %634 = arith.truncf %633 : vector<32x32xf32> to vector<32x32xbf16>
    %c0_269 = arith.constant 0 : index
    %c0_270 = arith.constant 0 : index
    %635 = vector.load %arg21[%c0_269, %c0_270] : memref<1x32xf32, #tpu.memory_space<vmem>>, vector<1x32xf32>
    %636 = vector.extract_strided_slice %629 {offsets = [0, 0], sizes = [17, 32], strides = [1, 1]} : vector<34x32xf32> to vector<17x32xf32>
    %637 = arith.truncf %636 : vector<17x32xf32> to vector<17x32xbf16>
    %cst_271 = arith.constant dense<0.000000e+00> : vector<16x32xf32>
    %638 = tpu.matmul %631, %637, %cst_271 {dimension_numbers = #tpu.dot_dimension_numbers<[1], [0], [0], [1], [0, 0, 1, 1], [], []>} : vector<16x17xbf16>, vector<17x32xbf16>, vector<16x32xf32> -> vector<16x32xf32>
    %639 = vector.broadcast %632 : vector<16x1xf32> to vector<16x32xf32>
    %640 = arith.addf %638, %639 : vector<16x32xf32>
    %641 = arith.truncf %640 : vector<16x32xf32> to vector<16x32xbf16>
    %cst_272 = arith.constant dense<0.000000e+00> : vector<16x32xf32>
    %642 = tpu.matmul %641, %634, %cst_272 {dimension_numbers = #tpu.dot_dimension_numbers<[1], [0], [0], [1], [0, 0, 1, 1], [], []>} : vector<16x32xbf16>, vector<32x32xbf16>, vector<16x32xf32> -> vector<16x32xf32>
    %643 = vector.broadcast %635 : vector<1x32xf32> to vector<16x32xf32>
    %644 = arith.addf %642, %643 : vector<16x32xf32>
    %c0_273 = arith.constant 0 : index
    %c0_274 = arith.constant 0 : index
    %645 = vector.load %arg22[%c0_273, %c0_274] : memref<32x32xf32, #tpu.memory_space<vmem>>, vector<16x32xf32>
    tpu.vector_store %arg22[%c0_273, %c0_274], %644 {strides = array<i32>} : memref<32x32xf32, #tpu.memory_space<vmem>>, vector<16x32xf32>,
    %646 = vector.extract_strided_slice %629 {offsets = [17, 0], sizes = [17, 32], strides = [1, 1]} : vector<34x32xf32> to vector<17x32xf32>
    %647 = arith.truncf %646 : vector<17x32xf32> to vector<17x32xbf16>
    %cst_275 = arith.constant dense<0.000000e+00> : vector<16x32xf32>
    %648 = tpu.matmul %631, %647, %cst_275 {dimension_numbers = #tpu.dot_dimension_numbers<[1], [0], [0], [1], [0, 0, 1, 1], [], []>} : vector<16x17xbf16>, vector<17x32xbf16>, vector<16x32xf32> -> vector<16x32xf32>
    %649 = vector.broadcast %632 : vector<16x1xf32> to vector<16x32xf32>
    %650 = arith.addf %648, %649 : vector<16x32xf32>
    %651 = arith.truncf %650 : vector<16x32xf32> to vector<16x32xbf16>
    %cst_276 = arith.constant dense<0.000000e+00> : vector<16x32xf32>
    %652 = tpu.matmul %651, %634, %cst_276 {dimension_numbers = #tpu.dot_dimension_numbers<[1], [0], [0], [1], [0, 0, 1, 1], [], []>} : vector<16x32xbf16>, vector<32x32xbf16>, vector<16x32xf32> -> vector<16x32xf32>
    %653 = vector.broadcast %635 : vector<1x32xf32> to vector<16x32xf32>
    %654 = arith.addf %652, %653 : vector<16x32xf32>
    %c16 = arith.constant 16 : index
    %c0_277 = arith.constant 0 : index
    %655 = vector.load %arg22[%c16, %c0_277] : memref<32x32xf32, #tpu.memory_space<vmem>>, vector<16x32xf32>
    tpu.vector_store %arg22[%c16, %c0_277], %654 {strides = array<i32>} : memref<32x32xf32, #tpu.memory_space<vmem>>, vector<16x32xf32>,
    return
  }
}

</mosaic_0001>

<bundles_post_ra>
// kernel: _lambda_.1
= control target key start
LH: loop header
LB: loop body
LE: loop exit
PB: predicated region body
PF: predicated region fallthrough
CT: control target
= control target key end

     0   :  { %v8363_v2 = vmov 0.0   ;;  %vm8364_vm0 = vmmov 0   ;;  %vm94_vm1 = vcmask 392192   ;;  %vm213_vm2 = vcmask 253952   ;;  %s8369_s23 = smov 64   ;;  %s8371_s24 = smov 80   ;;  %s10044_s2 = inlined_call_operand.vmem [shape: f32[48,32], index: 2, kind: input, shape index: {}]   ;;  %s10045_s4 = inlined_call_operand.vmem [shape: f32[48,32], index: 4, kind: input, shape index: {}]   ;;  %s10046_s0 = inlined_call_operand.vmem [shape: f32[32,48], index: 0, kind: input, shape index: {}]   ;;  %s10047_s1 = inlined_call_operand.vmem [shape: f32[2,48], index: 1, kind: input, shape index: {}]   ;;  %s10048_s3 = inlined_call_operand.vmem [shape: f32[1,32], index: 3, kind: input, shape index: {}]   ;;  %s10049_s5 = inlined_call_operand.vmem [shape: f32[1,32], index: 5, kind: input, shape index: {}]   ;;  %s10050_s6 = inlined_call_operand.vmem [shape: f32[16,32], index: 6, kind: input, shape index: {}]   ;;  %s10051_s9 = inlined_call_operand.vmem [shape: f32[2,32,96], index: 9, kind: input, shape index: {}]   ;;  %s10052_s7 = inlined_call_operand.vmem [shape: f32[2,1,32], index: 7, kind: input, shape index: {}]   ;;  %s10053_s8 = inlined_call_operand.vmem [shape: f32[2,1,32], index: 8, kind: input, shape index: {}]   ;;  %s10054_s10 = inlined_call_operand.vmem [shape: f32[2,32,32], index: 10, kind: input, shape index: {}]   ;;  %s10055_s11 = inlined_call_operand.vmem [shape: f32[2,1,32], index: 11, kind: input, shape index: {}]   ;;  %s10056_s14 = inlined_call_operand.vmem [shape: f32[2,32,32], index: 14, kind: input, shape index: {}]   ;;  %s10057_s12 = inlined_call_operand.vmem [shape: f32[2,1,32], index: 12, kind: input, shape index: {}]   ;;  %s10058_s13 = inlined_call_operand.vmem [shape: f32[2,1,32], index: 13, kind: input, shape index: {}]   ;;  %s10059_s16 = inlined_call_operand.vmem [shape: f32[2,32,32], index: 16, kind: input, shape index: {}]   ;;  %s10060_s15 = inlined_call_operand.vmem [shape: f32[2,1,32], index: 15, kind: input, shape index: {}]   ;;  %s10061_s17 = inlined_call_operand.vmem [shape: f32[2,1,32], index: 17, kind: input, shape index: {}]   ;;  %s10062_s19 = inlined_call_operand.vmem [shape: f32[16,1], index: 19, kind: input, shape index: {}]   ;;  %s10063_s20 = inlined_call_operand.vmem [shape: f32[32,32], index: 20, kind: input, shape index: {}]   ;;  %s10064_s18 = inlined_call_operand.vmem [shape: f32[16,17], index: 18, kind: input, shape index: {}]   ;;  %s10065_s21 = inlined_call_operand.vmem [shape: f32[1,32], index: 21, kind: input, shape index: {}]   ;;  %s10066_s22 = inlined_call_operand.vmem [shape: f32[32,32], index: 22, kind: output, shape index: {}]  }
   0x1   :  { %10079 = sst [smem:[#allocation3_spill]] %s10044_s2  ;;  %7038 = vmatprep.subr.bf16.mxu1 %v8363_v2  ;;  %7044 = vmatprep.mubr.msk.bf16.mxu1 %vm8364_vm0, %v8363_v2  ;;  %vm220_vm3 = vcmask 254977   ;;  %vm217_vm4 = vcmask 261120   ;;  %vm270_vm5 = vcmask 254976   ;;  %vm1636_vm6 = vcmask 1046528   ;;  %s8368_s2 = smov 88  }
   0x2   :  { %10080 = sst [smem:[#allocation4_spill]] %s10045_s4  ;;  %s10086_s29 = sld [smem:[#allocation3_spill]]  ;;  %vm424_vm7 = vcmask 64512   ;;  %vm520_vm9 = vcmask 138240   ;;  %vm527_vm10 = vcmask 131072   ;;  %vm572_vm11 = vcmask 1040384  }
   0x3   :  { %10081 = sst [smem:[#allocation5_spill]] %s10046_s0  ;;  %s10087_s4 = sld [smem:[#allocation4_spill]]  ;;  %vm8654_vm8 = vmpackc.low %vm424_vm7, %vm424_vm7  ;;  %vm906_vm12 = vcmask 1043456   ;;  %vm2839_vm13 = vcmask 261121  }
   0x4   :  { %10082 = sst [smem:[#allocation6_spill]] %s10047_s1  ;;  %s10088_s25 = sld [smem:[#allocation5_spill]] }
   0x5   :  { %10083 = sst [smem:[#allocation7_spill]] %s10048_s3  ;;  %s8367_s3 = smov 120  }
   0x6   :  { %10084 = sst [smem:[#allocation8_spill]] %s10049_s5  ;;  %s10090_s26 = sld [smem:[#allocation7_spill]] }
   0x7   :  { %10085 = sst [smem:[#allocation9_spill]] %s10050_s6  ;;  %s10089_s6 = sld [smem:[#allocation6_spill]] }
   0x8   :  { %v78_v0 = vld [vmem:[%s10086_s29] sm:$0xff]  ;;  %v79_v1 = vld [vmem:[%s10086_s29 + $0x8] sm:$0xff]  ;;  %v80_v6 = vld [vmem:[%s10086_s29 + $0x10] sm:$0xff]  ;;  %s10091_s1 = sld [smem:[#allocation8_spill]]  ;;  %s10092_s30 = sld [smem:[#allocation9_spill]] }
   0x9   :  { %v152_v3 = vld [vmem:[%s10087_s4] sm:$0xff]  ;;  %v84_v4 = vpack.c.bf16 %v79_v1, %v78_v0  ;;  %v153_v5 = vld [vmem:[%s10087_s4 + $0x8] sm:$0xff]  ;;  %v81_v7 = vld [vmem:[%s10086_s29 + $0x18] sm:$0xff]  ;;  %s8370_s5 = smov 56   ;;  %s10077_s27 = smov 48  }
   0xa   :  { %v158_v8 = vpack.c.bf16 %v153_v5, %v152_v3  ;;  %v85_v9 = vpack.c.bf16 %v81_v7, %v80_v6  ;;  %v154_v10 = vld [vmem:[%s10087_s4 + $0x10] sm:$0xff]  ;;  %v155_v11 = vld [vmem:[%s10087_s4 + $0x18] sm:$0xff]  ;;  %v82_v12 = vld [vmem:[%s10086_s29 + $0x20] sm:$0xff]  ;;  %s10095_s0 = smov 48   ;;  %s10096_s28 = smov 72  }
   0xb   :  { %7028 = vmatprep.subr.bf16.mxu0 %v84_v4  ;;  %v83_v13 = vld [vmem:[%s10086_s29 + $0x28] sm:$0xff]  ;;  %v159_v14 = vpack.c.bf16 %v155_v11, %v154_v10  ;;  %v72_v15 = vld [vmem:[%s10088_s25] sm:$0xff]  ;;  %v74_v22 = vld [vmem:[%s10088_s25 + $0x10] sm:$0xff]  ;;  %s10073_s29 = smov 104  }
   0xc   :  { %7029 = vmatpush3.bf16.msra.mxu0 %v84_v4  ;;  %7039 = vmatpush3.bf16.msra.mxu1 %v158_v8  ;;  %v73_v16 = vld [vmem:[%s10088_s25 + $0x8] sm:$0xff]  ;;  %v86_v17 = vpack.c.bf16 %v83_v13, %v82_v12  ;;  %v156_v18 = vld [vmem:[%s10087_s4 + $0x20] sm:$0xff]  ;;  %v75_v23 = vld [vmem:[%s10088_s25 + $0x18] sm:$0xff]  ;;  %s10071_s25 = smov 40  }
   0xd   :  { %7030 = vmatprep.subr.bf16.mxu0 %v85_v9  ;;  %7040 = vmatprep.subr.bf16.mxu1 %v8363_v2  ;;  %v157_v19 = vld [vmem:[%s10087_s4 + $0x28] sm:$0xff]  ;;  %v76_v20 = vpack.c.bf16 %v73_v16, %v72_v15  ;;  %v150_v24 = vld [vmem:[%s10089_s6] sm:$0x3]  ;;  %v77_v25 = vpack.c.bf16 %v75_v23, %v74_v22  ;;  %s8372_s6 = smov 112   ;;  %s10097_s4 = smov 104  }
   0xe   :  { %v160_v21 = vpack.c.bf16 %v157_v19, %v156_v18  ;;  %v151_v26 = vpack.c.bf16 %v150_v24, %v150_v24  ;;  %v6480_v27 = vld [vmem:[%s10090_s26] ss:$0 sm:$0xff]  ;;  %v212_v38 = vld [vmem:[%s10092_s30 + $0x8] sm:$0xff]  ;;  %v228_v18 = vld [vmem:[%s10051_s9 + $0x10] sm:$0xff] }
   0xf   :  { %7034 = vmatprep.mubr.msk.bf16.mxu0 %vm94_vm1, %v76_v20  ;;  %v6483_v28 = vld [vmem:[%s10091_s1] ss:$0 sm:$0xff]  ;;  %v227_v16 = vld [vmem:[%s10051_s9 + $0x8] sm:$0xff]  ;;  %v229_v19 = vld [vmem:[%s10051_s9 + $0x18] sm:$0xff]  ;;  %s10075_s1 = smov 72  }
  0x10   :  { %7031 = vmatpush3.bf16.msra.mxu0 %v85_v9  ;;  %7041 = vmatpush3.bf16.msra.mxu1 %v159_v14  ;;  %v211_v30 = vld [vmem:[%s10092_s30] sm:$0xff]  ;;  %v231_v20 = vpack.c.bf16 %v229_v19, %v228_v18  ;;  %s8366_s30 = smov 96  }
  0x11   :  { %7032 = vmatprep.subr.bf16.mxu0 %v86_v17  ;;  %7042 = vmatprep.subr.bf16.mxu1 %v8363_v2  ;;  %v226_v15 = vld [vmem:[%s10051_s9] sm:$0xff] }
  0x14   :  { %7033 = vmatpush3.bf16.msra.mxu0 %v86_v17  ;;  %7043 = vmatpush3.bf16.msra.mxu1 %v160_v21  ;;  %v230_v17 = vpack.c.bf16 %v227_v16, %v226_v15 }
  0x15   :  { %7048 = vmatprep.subr.bf16.mxu0 %v8363_v2 }
  0x17   :  { %7035 = vmatmul.mubr.msk.bf16.vlgmr.msra.gmra.mrb[0].mxu0 %vm94_vm1, %v77_v25  ;;  %7045 = vmatmul.mubr.msk.bf16.vlgmr.msra.gmra.mrb[0].mxu1 %vm94_vm1, %v151_v26 }
  0x18   :  { %7052 = vmatprep.mubr.msk.bf16.mxu0 %vm8364_vm0, %v8363_v2  ;;  %7070 = vmatprep.mubr.msk.f32.mxu1 %vm8364_vm0, %v8363_v2 }
  0x19   :  { %7049 = vmatpush3.bf16.msra.mxu0 %v230_v17 }
  0x1a   :  { %7050 = vmatprep.subr.bf16.mxu0 %v8363_v2 }
  0x1d   :  { %7051 = vmatpush3.bf16.msra.mxu0 %v231_v20 }
  0xea   :  { %v7036_v29 = vpop.f32.mrb[0].mxu0  ;;  %v205_v31 = vpop.f32.mrb[0].mxu1 }
  0xeb   :  { %v144_v32 = vadd.f32 %v7036_v29, %v6480_v27  ;;  %v206_v33 = vadd.f32 %v6483_v28, %v205_v31  ;;  %v135_v34 = vpop.f32.mrb[1].mxu0  ;;  %v7046_v35 = vpop.f32.mrb[1].mxu1 }
  0xec   :  { %v136_v36 = vadd.f32 %v6480_v27, %v135_v34  ;;  %v7037_v37 = vpop.f32.mrb[2].mxu0  ;;  %v208_v39 = vpop.f32.mrb[2].mxu1 }
  0xed   :  { %v222_v40 = vadd.f32 %v211_v30, %v144_v32  ;;  %214 = vst.msk [vmem:[#allocation2] sm:$0x1] %vm213_vm2, %v206_v33  ;;  %v147_v41 = vadd.f32 %v7037_v37, %v6480_v27  ;;  %v138_v42 = vpop.f32.mrb[3].mxu0  ;;  %v7047_v43 = vpop.f32.mrb[3].mxu1 }
  0xee   :  { %221 = vst.msk [vmem:[#allocation2 + $0x10] sm:$0x2] %vm220_vm3, %v206_v33  ;;  %v215_v44 = vadd.f32 %v211_v30, %v136_v36  ;;  %v139_v45 = vadd.f32 %v6480_v27, %v138_v42 }
  0xef   :  { %224 = vst.msk [vmem:[#allocation2 + $0x12] sm:$0xff] %vm217_vm4, %v222_v40  ;;  %v223_v46 = vadd.f32 %v212_v38, %v147_v41  ;;  %v6485_v40 = vld [vmem:[%s10052_s7] ss:$0 sm:$0xff] }
  0xf0   :  { %218 = vst.msk [vmem:[#allocation2 + $0x1] sm:$0xff] %vm217_vm4, %v215_v44  ;;  %v216_v47 = vadd.f32 %v212_v38, %v139_v45  ;;  %v6486_v45 = vld [vmem:[%s10053_s8] ss:$0 sm:$0xff] }
  0xf1   :  { %225 = vst.msk [vmem:[#allocation2 + $0x1a] sm:$0xff] %vm217_vm4, %v223_v46 }
  0xf2   :  { %219 = vst.msk [vmem:[#allocation2 + $0x9] sm:$0xff] %vm217_vm4, %v216_v47 }
  0xf7   :  { %v251_v48 = vld [vmem:[#allocation2] sm:$0xff] }
  0xf8   :  { %v258_v49 = vsel %vm217_vm4, %v251_v48, 0.0  ;;  %v254_v53 = vld [vmem:[#allocation2 + $0x18] sm:$0xff]  ;;  %v255_v12 = vld [vmem:[#allocation2 + $0x20] sm:$0x3] }
  0xf9   :  { %259 = vadd.xlane.f32.xlu0 %v258_v49  ;;  %v253_v50 = vld [vmem:[#allocation2 + $0x10] sm:$0xff]  ;;  %v252_v51 = vld [vmem:[#allocation2 + $0x8] sm:$0xff]  ;;  %v267_v55 = vsel %vm217_vm4, %v254_v53, 0.0  ;;  %v271_v13 = vsel %vm270_vm5, %v255_v12, 0.0 }
  0xfa   :  { %v264_v52 = vsel %vm217_vm4, %v253_v50, 0.0  ;;  %v261_v54 = vsel %vm217_vm4, %v252_v51, 0.0 }
  0xfb   :  { %265 = vadd.xlane.f32.xlu1 %v264_v52 }
  0xfd   :  { %262 = vadd.xlane.f32.xlu0 %v261_v54 }
  0xff   :  { %268 = vadd.xlane.f32.xlu1 %v267_v55 }
 0x186   :  { %v260_v56 = vpop.xlane.xlu0 %259 }
 0x187   :  { %v275_v57 = vmul.f32 0.03125, %v260_v56 }
 0x188   :  { %v266_v58 = vpop.xlane.xlu1 %265 }
 0x189   :  { %v280_v59 = vsub.f32 %v251_v48, %v275_v57  ;;  %v277_v60 = vmul.f32 0.03125, %v266_v58 }
 0x18a   :  { %v263_v61 = vpop.xlane.xlu0 %262 }
 0x18b   :  { %v8578_v62 = vsub.f32 %v253_v50, %v277_v60  ;;  %v276_v63 = vmul.f32 0.03125, %v263_v61  ;;  %v285_v0 = vmul.f32 %v280_v59, %v280_v59 }
 0x18c   :  { %v269_v1 = vpop.xlane.xlu1 %268 }
 0x18d   :  { %v281_v3 = vsub.f32 %v252_v51, %v276_v63  ;;  %v278_v4 = vmul.f32 0.03125, %v269_v1  ;;  %v290_v5 = vsel %vm217_vm4, %v285_v0, 0.0  ;;  %v287_v6 = vmul.f32 %v8578_v62, %v8578_v62 }
 0x18e   :  { %291 = vadd.xlane.f32.xlu0 %v290_v5 }
 0x18f   :  { %v283_v7 = vsub.f32 %v254_v53, %v278_v4  ;;  %v286_v8 = vmul.f32 %v281_v3, %v281_v3  ;;  %v296_v9 = vsel %vm217_vm4, %v287_v6, 0.0 }
 0x191   :  { %v293_v10 = vsel %vm217_vm4, %v286_v8, 0.0  ;;  %v288_v11 = vmul.f32 %v283_v7, %v283_v7 }
 0x192   :  { %297 = vadd.xlane.f32.xlu0 %v296_v9  ;;  %294 = vadd.xlane.f32.xlu1 %v293_v10 }
 0x193   :  { %v299_v14 = vsel %vm217_vm4, %v288_v11, 0.0 }
 0x196   :  { %272 = vadd.xlane.f32.xlu0 %v271_v13  ;;  %300 = vadd.xlane.f32.xlu1 %v299_v14 }
 0x21b   :  { %v292_v21 = vpop.xlane.xlu0 %291 }
 0x21c   :  { %v305_v22 = vmul.f32 0.03125, %v292_v21 }
 0x21e   :  { %v310_v23 = vadd.f32 1e-05, %v305_v22 }
 0x21f   :  { %v295_v24 = vpop.xlane.xlu1 %294  ;;  %v298_v25 = vpop.xlane.xlu0 %297 }
 0x220   :  { %8081 = vrsqrt.f32 %v310_v23  ;;  %v306_v26 = vmul.f32 0.03125, %v295_v24  ;;  %v307_v27 = vmul.f32 0.03125, %v298_v25 }
 0x222   :  { %v311_v28 = vadd.f32 1e-05, %v306_v26  ;;  %v312_v29 = vadd.f32 1e-05, %v307_v27 }
 0x223   :  { %v301_v30 = vpop.xlane.xlu1 %300  ;;  %v273_v31 = vpop.xlane.xlu0 %272 }
 0x224   :  { %8083 = vrsqrt.f32 %v311_v28  ;;  %v308_v32 = vmul.f32 0.03125, %v301_v30  ;;  %v279_v33 = vmul.f32 0.03125, %v273_v31 }
 0x225   :  { %8085 = vrsqrt.f32 %v312_v29 }
 0x226   :  { %v313_v34 = vadd.f32 1e-05, %v308_v32  ;;  %v284_v35 = vsub.f32 %v255_v12, %v279_v33 }
 0x228   :  { %8087 = vrsqrt.f32 %v313_v34  ;;  %v289_v36 = vmul.f32 %v284_v35, %v284_v35 }
 0x22a   :  { %v8082_v37 = vpop.eup %8081  ;;  %v302_v38 = vsel %vm270_vm5, %v289_v36, 0.0 }
 0x22b   :  { %v320_v39 = vmul.f32 %v8082_v37, %v280_v59  ;;  %303 = vadd.xlane.f32.xlu1 %v302_v38 }
 0x22d   :  { %v331_v42 = vmul.f32 %v6485_v40, %v320_v39 }
 0x22e   :  { %v8084_v41 = vpop.eup %8083 }
 0x22f   :  { %v321_v43 = vmul.f32 %v8084_v41, %v281_v3  ;;  %v8086_v44 = vpop.eup %8085  ;;  %v342_v48 = vadd.f32 %v6486_v45, %v331_v42  ;;  %v8365_v3 = vmov 0.0|0.0  }
 0x230   :  { %v322_v50 = vmul.f32 %v8086_v44, %v8578_v62  ;;  %7752 = vmatprep.subr.bf16.mxu1 %v8365_v3  ;;  %7759 = vmatprep.subr.bf16.mxu0 %v8365_v3 }
 0x231   :  { %v332_v46 = vmul.f32 %v6485_v40, %v321_v43 }
 0x232   :  { %v8088_v47 = vpop.eup %8087  ;;  %v333_v54 = vmul.f32 %v6485_v40, %v322_v50 }
 0x233   :  { %v343_v49 = vadd.f32 %v6486_v45, %v332_v46  ;;  %v323_v51 = vmul.f32 %v8088_v47, %v283_v7 }
 0x234   :  { %v344_v56 = vadd.f32 %v6486_v45, %v333_v54 }
 0x235   :  { %v347_v52 = vpack.c.bf16 %v343_v49, %v342_v48  ;;  %v334_v53 = vmul.f32 %v6485_v40, %v323_v51 }
 0x237   :  { %7053 = vmatmul.mubr.msk.bf16.vlgmr.msra.gmra.mrb[4].mxu0 %vm217_vm4, %v347_v52  ;;  %v345_v55 = vadd.f32 %v6486_v45, %v334_v53 }
 0x238   :  { %7056 = vmatprep.mubr.msk.bf16.mxu0 %vm8364_vm0, %v8363_v2 }
 0x239   :  { %v348_v57 = vpack.c.bf16 %v345_v55, %v344_v56 }
 0x23f   :  { %7057 = vmatmul.mubr.msk.bf16.gmra.mrb[8].mxu0 %vm217_vm4, %v348_v57 }
 0x240   :  { %7060 = vmatprep.mubr.msk.bf16.mxu0 %vm8364_vm0, %v8363_v2 }
 0x2b8   :  { %v304_v58 = vpop.xlane.xlu1 %303 }
 0x2b9   :  { %v309_v59 = vmul.f32 0.03125, %v304_v58 }
 0x2bb   :  { %v314_v60 = vadd.f32 1e-05, %v309_v59 }
 0x2bd   :  { %8089 = vrsqrt.f32 %v314_v60 }
 0x2c7   :  { %v8090_v61 = vpop.eup %8089 }
 0x2c8   :  { %v324_v62 = vmul.f32 %v8090_v61, %v284_v35 }
 0x2ca   :  { %v335_v63 = vmul.f32 %v6485_v40, %v324_v62 }
 0x2cc   :  { %v346_v0 = vadd.f32 %v6486_v45, %v335_v63 }
 0x2ce   :  { %v349_v1 = vpack.c.bf16 %v346_v0, %v346_v0 }
 0x2d0   :  { %7061 = vmatmul.mubr.msk.bf16.gmra.mrb[12].mxu0 %vm217_vm4, %v349_v1 }
 0x2d1   :  { %7100 = vmatprep.mubr.msk.f32.mxu0 %vm8364_vm0, %v8363_v2 }
 0x30a   :  { %v8619_v4 = vpop.f32.mrb[4].mxu0 }
 0x30b   :  { %v7054_v5 = vpop.f32.mrb[5].mxu0 }
 0x30c   :  { %v8621_v6 = vpop.f32.mrb[6].mxu0 }
 0x30d   :  { %v7055_v7 = vpop.f32.mrb[7].mxu0  ;;  %v8625_v8 = vpack.i.bf16 %v8621_v6, %v8619_v4 }
 0x30f   :  { %7920 = vrot.lane.b32.xlu0 %v8625_v8, %s8366_s30 }
 0x312   :  { %v8629_v9 = vpop.f32.mrb[8].mxu0 }
 0x313   :  { %658 = vrot.lane.b32.xlu0 %v8619_v4, %s8367_s3  ;;  %v7058_v10 = vpop.f32.mrb[9].mxu0  ;;  %422 = vrot.lane.b32.xlu1 %v8629_v9, %s8366_s30  ;;  %v1637_v12 = vrot.slane %v8629_v9, 1 }
 0x314   :  { %v8635_v11 = vpop.f32.mrb[10].mxu0 }
 0x315   :  { %v1638_v13 = vrot.slane %v8635_v11, 1  ;;  %v7059_v14 = vpop.f32.mrb[11].mxu0 }
 0x317   :  { %v8642_v15 = vsel %vm1636_vm6, %v1637_v12, %v1638_v13  ;;  %662 = vrot.lane.b32.xlu0 %v8629_v9, %s8367_s3  ;;  %7925 = vrot.lane.b32.xlu1 %v8625_v8, %s8368_s2 }
 0x31b   :  { %668 = vrot.lane.b32.xlu1 %v8629_v9, %s8368_s2 }
 0x31f   :  { %660 = vrot.lane.b32.xlu1 %v8621_v6, %s8367_s3 }
 0x381   :  { %v7921_v16 = vpop.permute.xlu0 %7920 }
 0x382   :  { %v7923_v17 = vunpack.i.h.bf16 %v7921_v16  ;;  %v7922_v18 = vunpack.i.l.bf16 %v7921_v16 }
 0x384   :  { %v7753_v20 = vpack.c.bf16 %v7923_v17, %v7922_v18 }
 0x385   :  { %v423_v21 = vpop.permute.xlu1 %422  ;;  %v659_v27 = vpop.permute.xlu0 %658 }
 0x386   :  { %7755 = vmatpush3.bf16.xpose.msk.msra.mxu1 %vm8654_vm8, %v7753_v20 }
 0x387   :  { %7068 = vmatprep.subr.mxu1 %v8363_v2 }
 0x389   :  { %v7926_v22 = vpop.permute.xlu1 %7925  ;;  %v663_v29 = vpop.permute.xlu0 %662 }
 0x38a   :  { %v7928_v23 = vunpack.i.h.bf16 %v7926_v22  ;;  %v7927_v24 = vunpack.i.l.bf16 %v7926_v22 }
 0x38c   :  { %v7760_v25 = vpack.c.bf16 %v7928_v23, %v7927_v24 }
 0x38d   :  { %v669_v26 = vpop.permute.xlu1 %668 }
 0x38e   :  { %7069 = vmatpush3.xpose.msk.msra.mxu1 %vm424_vm7, %v423_v21  ;;  %7762 = vmatpush3.bf16.xpose.msk.msra.mxu0 %vm8654_vm8, %v7760_v25 }
 0x38f   :  { %7098 = vmatprep.subr.mxu0 %v8363_v2  ;;  %7756 = vmatprep.subr.bf16.mxu1 %v8365_v3 }
 0x391   :  { %7071 = vmatmul.mubr.msk.f32.vlgmr.msra.gmra.mrb[4].mxu1 %vm424_vm7, %v8619_v4  ;;  %v661_v28 = vpop.permute.xlu1 %660 }
 0x392   :  { %7073 = vmatprep.mubr.msk.f32.mxu1 %vm8364_vm0, %v8363_v2 }
 0x395   :  { %7074 = vmatmul.mubr.msk.f32.gmra.mrb[6].mxu1 %vm424_vm7, %v8621_v6 }
 0x396   :  { %7099 = vmatpush3.xpose.msk.msra.mxu0 %vm424_vm7, %v669_v26  ;;  %7076 = vmatprep.mubr.msk.f32.mxu1 %vm8364_vm0, %v8363_v2 }
 0x399   :  { %7077 = vmatmul.mubr.msk.f32.gmra.mrb[8].mxu1 %vm424_vm7, %v8629_v9  ;;  %7101 = vmatmul.mubr.msk.f32.vlgmr.msra.gmra.mrb[16].mxu0 %vm424_vm7, %v659_v27 }
 0x39a   :  { %7103 = vmatprep.mubr.msk.f32.mxu0 %vm8364_vm0, %v8363_v2  ;;  %7085 = vmatprep.mubr.msk.f32.mxu1 %vm8364_vm0, %v8363_v2 }
 0x39d   :  { %7104 = vmatmul.mubr.msk.f32.gmra.mrb[18].mxu0 %vm424_vm7, %v661_v28 }
 0x39e   :  { %7106 = vmatprep.mubr.msk.f32.mxu0 %vm8364_vm0, %v8363_v2 }
 0x3a1   :  { %7107 = vmatmul.mubr.msk.f32.gmra.mrb[20].mxu0 %vm424_vm7, %v663_v29 }
 0x3a3   :  { %v8686_v30 = vpop.f32.mrb[12].mxu0 }
 0x3a4   :  { %v7062_v31 = vpop.f32.mrb[13].mxu0 }
 0x3a5   :  { %v412_v32 = vpop.f32.mrb[14].mxu0 }
 0x3a6   :  { %v7063_v33 = vpop.f32.mrb[15].mxu0 }
 0x464   :  { %v503_v34 = vpop.f32.mrb[4].mxu1 }
 0x465   :  { %v517_v35 = vmul.f32 0.35355338, %v503_v34  ;;  %v7072_v36 = vpop.f32.mrb[5].mxu1 }
 0x467   :  { %v521_v37 = vsel %vm520_vm9, %v517_v35, -inf }
 0x468   :  { %522 = vmax.xlane.f32.xlu1 %v521_v37  ;;  %v508_v38 = vpop.f32.mrb[6].mxu1 }
 0x469   :  { %v518_v39 = vmul.f32 0.35355338, %v508_v38  ;;  %v7075_v40 = vpop.f32.mrb[7].mxu1 }
 0x46b   :  { %v524_v41 = vsel %vm520_vm9, %v518_v39, -inf }
 0x46c   :  { %v748_v42 = vpop.f32.mrb[16].mxu0  ;;  %525 = vmax.xlane.f32.xlu0 %v524_v41  ;;  %v513_v43 = vpop.f32.mrb[8].mxu1 }
 0x46d   :  { %v519_v44 = vmul.f32 0.35355338, %v513_v43  ;;  %v7078_v45 = vpop.f32.mrb[9].mxu1  ;;  %v7102_v46 = vpop.f32.mrb[17].mxu0  ;;  %v762_v47 = vmul.f32 0.35355338, %v748_v42 }
 0x46f   :  { %v528_v48 = vsel %vm527_vm10, %v519_v44, -inf  ;;  %v765_v53 = vsel %vm520_vm9, %v762_v47, -inf }
 0x470   :  { %v753_v49 = vpop.f32.mrb[18].mxu0  ;;  %529 = vmax.xlane.f32.xlu0 %v528_v48 }
 0x471   :  { %v763_v50 = vmul.f32 0.35355338, %v753_v49  ;;  %v7105_v51 = vpop.f32.mrb[19].mxu0 }
 0x473   :  { %v768_v52 = vsel %vm520_vm9, %v763_v50, -inf }
 0x474   :  { %v758_v54 = vpop.f32.mrb[20].mxu0  ;;  %769 = vmax.xlane.f32.xlu1 %v768_v52  ;;  %766 = vmax.xlane.f32.xlu0 %v765_v53 }
 0x475   :  { %v764_v55 = vmul.f32 0.35355338, %v758_v54  ;;  %v7108_v56 = vpop.f32.mrb[21].mxu0 }
 0x477   :  { %v771_v57 = vsel %vm527_vm10, %v764_v55, -inf }
 0x478   :  { %772 = vmax.xlane.f32.xlu0 %v771_v57 }
 0x4f5   :  { %v523_v58 = vpop.xlane.xlu1 %522 }
 0x4f6   :  { %v531_v59 = vsub.f32 %v517_v35, %v523_v58 }
 0x4f8   :  { %v534_v60 = vmul.f32 1.442695, %v531_v59 }
 0x4f9   :  { %v526_v61 = vpop.xlane.xlu0 %525 }
 0x4fa   :  { %8091 = vpow2.f32 %v534_v60  ;;  %v532_v63 = vsub.f32 %v518_v39, %v526_v61 }
 0x4fc   :  { %v536_v10 = vmul.f32 1.442695, %v532_v63  ;;  %v232_v63 = vld [vmem:[%s10054_s10] sm:$0xff] }
 0x4fd   :  { %v530_v62 = vpop.xlane.xlu0 %529 }
 0x4fe   :  { %v533_v22 = vsub.f32 %v519_v44, %v530_v62 }
 0x500   :  { %v538_v25 = vmul.f32 1.442695, %v533_v22 }
 0x501   :  { %v767_v0 = vpop.xlane.xlu0 %766  ;;  %v770_v20 = vpop.xlane.xlu1 %769 }
 0x502   :  { %v774_v1 = vsub.f32 %v762_v47, %v767_v0  ;;  %v775_v21 = vsub.f32 %v763_v50, %v770_v20  ;;  %v8746_v0 = vpack.c.bf16 %v232_v63, %v232_v63 }
 0x504   :  { %v8092_v5 = vpop.eup %8091  ;;  %v777_v7 = vmul.f32 1.442695, %v774_v1  ;;  %v779_v23 = vmul.f32 1.442695, %v775_v21  ;;  %v8752_v1 = vsel %vm906_vm12, %v8746_v0, 0 }
 0x505   :  { %v540_v12 = vsel %vm520_vm9, %v8092_v5, 0.0  ;;  %v773_v24 = vpop.xlane.xlu0 %772 }
 0x506   :  { %541 = vadd.xlane.f32.xlu1 %v540_v12  ;;  %8093 = vpow2.f32 %v777_v7  ;;  %v776_v26 = vsub.f32 %v764_v55, %v773_v24 }
 0x507   :  { %8095 = vpow2.f32 %v536_v10 }
 0x508   :  { %8097 = vpow2.f32 %v779_v23  ;;  %v781_v27 = vmul.f32 1.442695, %v776_v26 }
 0x509   :  { %8099 = vpow2.f32 %v538_v25 }
 0x50a   :  { %8101 = vpow2.f32 %v781_v27 }
 0x510   :  { %v8695_v14 = vpop.eup %8093 }
 0x511   :  { %v783_v16 = vsel %vm520_vm9, %v8695_v14, 0.0  ;;  %v8096_v17 = vpop.eup %8095 }
 0x512   :  { %784 = vadd.xlane.f32.xlu0 %v783_v16  ;;  %v543_v18 = vsel %vm520_vm9, %v8096_v17, 0.0  ;;  %v8098_v28 = vpop.eup %8097 }
 0x513   :  { %v786_v29 = vsel %vm520_vm9, %v8098_v28, 0.0  ;;  %v8100_v31 = vpop.eup %8099 }
 0x514   :  { %v546_v32 = vsel %vm527_vm10, %v8100_v31, 0.0  ;;  %v8102_v33 = vpop.eup %8101 }
 0x515   :  { %v789_v34 = vsel %vm527_vm10, %v8102_v33, 0.0 }
 0x516   :  { %544 = vadd.xlane.f32.xlu0 %v543_v18 }
 0x517   :  { %559 = vrot.lane.b32.xlu1 %v8629_v9, %s8369_s23 }
 0x52c   :  { %7930 = vrot.lane.b32.xlu0 %v8625_v8, %s8369_s23 }
 0x530   :  { %802 = vrot.lane.b32.xlu0 %v8629_v9, %s8370_s5 }
 0x534   :  { %1025 = vrot.lane.b32.xlu0 %v8629_v9, %s8371_s24 }
 0x538   :  { %1017 = vrot.lane.b32.xlu0 %v8621_v6, %s8372_s6 }
 0x53b   :  { %787 = vadd.xlane.f32.xlu1 %v786_v29 }
 0x53f   :  { %547 = vadd.xlane.f32.xlu1 %v546_v32 }
 0x543   :  { %790 = vadd.xlane.f32.xlu1 %v789_v34 }
 0x554   :  { %7935 = vrot.lane.b32.xlu1 %v8625_v8, %s8370_s5 }
 0x558   :  { %7940 = vrot.lane.b32.xlu1 %v8625_v8, %s8371_s24 }
 0x55c   :  { %1015 = vrot.lane.b32.xlu1 %v8619_v4, %s8372_s6 }
 0x560   :  { %1019 = vrot.lane.b32.xlu1 %v8629_v9, %s8372_s6 }
 0x593   :  { %v542_v35 = vpop.xlane.xlu1 %541 }
 0x594   :  { %8103 = vrcp.f32 %v542_v35 }
 0x597   :  { %v560_v44 = vpop.permute.xlu1 %559 }
 0x59e   :  { %v8104_v42 = vpop.eup %8103 }
 0x59f   :  { %v785_v36 = vpop.xlane.xlu0 %784  ;;  %v550_v43 = vmul.f32 %v8104_v42, %v8092_v5  ;;  %v233_v5 = vld [vmem:[%s10054_s10 + $0x8] sm:$0xff] }
 0x5a0   :  { %v8759_v7 = vpack.c.bf16 %v233_v5, %v233_v5 }
 0x5a2   :  { %7888 = vmatprep.subr.msk.bf16.mxu0 %vm906_vm12, %v8759_v7  ;;  %v8765_v10 = vsel %vm906_vm12, %v8759_v7, 0 }
 0x5a3   :  { %v545_v37 = vpop.xlane.xlu0 %544  ;;  %7125 = vmatpush3.bf16.msra.mxu0 %v8765_v10 }
 0x5a4   :  { %8105 = vrcp.f32 %v545_v37  ;;  %7766 = vmatprep.subr.bf16.mxu0 %v8365_v3 }
 0x5a7   :  { %v7931_v38 = vpop.permute.xlu0 %7930 }
 0x5a8   :  { %v7933_v39 = vunpack.i.h.bf16 %v7931_v38  ;;  %v7932_v40 = vunpack.i.l.bf16 %v7931_v38 }
 0x5aa   :  { %v7757_v41 = vpack.c.bf16 %v7933_v39, %v7932_v40 }
 0x5ab   :  { %v803_v58 = vpop.permute.xlu0 %802 }
 0x5ac   :  { %7758 = vmatpush3.bf16.msra.mxu1 %v7757_v41 }
 0x5ad   :  { %7083 = vmatprep.subr.mxu1 %v8363_v2 }
 0x5ae   :  { %v8106_v45 = vpop.eup %8105 }
 0x5af   :  { %v552_v46 = vmul.f32 %v8106_v45, %v8096_v17 }
 0x5b0   :  { %7084 = vmatpush3.msk.msra.mxu1 %vm572_vm11, %v560_v44 }
 0x5b1   :  { %7086 = vmatmul.mubr.msk.f32.vlgmr.msra.gmra.mrb[10].mxu1 %vm520_vm9, %v550_v43  ;;  %7763 = vmatprep.subr.bf16.mxu1 %v8365_v3 }
 0x5b2   :  { %7088 = vmatprep.mubr.msk.f32.mxu1 %vm8364_vm0, %v8363_v2 }
 0x5b5   :  { %7089 = vmatmul.mubr.msk.f32.gmra.mrb[12].mxu1 %vm520_vm9, %v552_v46 }
 0x5b6   :  { %7091 = vmatprep.mubr.msk.f32.mxu1 %vm8364_vm0, %v8363_v2 }
 0x5c8   :  { %v788_v47 = vpop.xlane.xlu1 %787 }
 0x5cc   :  { %v548_v48 = vpop.xlane.xlu1 %547 }
 0x5cd   :  { %8107 = vrcp.f32 %v548_v48 }
 0x5ce   :  { %8109 = vrcp.f32 %v785_v36  ;;  %v1026_v36 = vpop.permute.xlu0 %1025 }
 0x5cf   :  { %8111 = vrcp.f32 %v788_v47 }
 0x5d0   :  { %v791_v49 = vpop.xlane.xlu1 %790 }
 0x5d1   :  { %8113 = vrcp.f32 %v791_v49 }
 0x5d2   :  { %v1018_v38 = vpop.permute.xlu0 %1017 }
 0x5d4   :  { %v7936_v50 = vpop.permute.xlu1 %7935 }
 0x5d5   :  { %v7938_v51 = vunpack.i.h.bf16 %v7936_v50  ;;  %v7937_v52 = vunpack.i.l.bf16 %v7936_v50 }
 0x5d7   :  { %v8108_v53 = vpop.eup %8107  ;;  %v7764_v54 = vpack.c.bf16 %v7938_v51, %v7937_v52 }
 0x5d8   :  { %v554_v55 = vmul.f32 %v8108_v53, %v8100_v31  ;;  %v8110_v56 = vpop.eup %8109  ;;  %v7941_v25 = vpop.permute.xlu1 %7940 }
 0x5d9   :  { %7765 = vmatpush3.bf16.msra.mxu1 %v7764_v54  ;;  %v793_v57 = vmul.f32 %v8110_v56, %v8695_v14  ;;  %v8112_v59 = vpop.eup %8111  ;;  %v7943_v29 = vunpack.i.h.bf16 %v7941_v25  ;;  %v7942_v31 = vunpack.i.l.bf16 %v7941_v25 }
 0x5da   :  { %7092 = vmatmul.mubr.msk.f32.gmra.mrb[14].mxu1 %vm520_vm9, %v554_v55  ;;  %7113 = vmatprep.subr.mxu1 %v8363_v2  ;;  %v795_v60 = vmul.f32 %v8112_v59, %v8098_v28 }
 0x5db   :  { %7115 = vmatprep.mubr.msk.f32.mxu1 %vm8364_vm0, %v8363_v2  ;;  %v8114_v61 = vpop.eup %8113  ;;  %v7767_v35 = vpack.c.bf16 %v7943_v29, %v7942_v31 }
 0x5dc   :  { %v797_v62 = vmul.f32 %v8114_v61, %v8102_v33  ;;  %v1016_v37 = vpop.permute.xlu1 %1015 }
 0x5dd   :  { %7114 = vmatpush3.msk.msra.mxu1 %vm572_vm11, %v803_v58 }
 0x5de   :  { %7116 = vmatmul.mubr.msk.f32.vlgmr.msra.gmra.mrb[16].mxu1 %vm520_vm9, %v793_v57  ;;  %7889 = vmatprep.subr.msk.bf16.mxu1 %vm906_vm12, %v8746_v0 }
 0x5df   :  { %7118 = vmatprep.mubr.msk.f32.mxu1 %vm8364_vm0, %v8363_v2  ;;  %7131 = vmatpush3.bf16.msra.mxu1 %v8752_v1 }
 0x5e0   :  { %7770 = vmatprep.subr.bf16.mxu1 %v8365_v3  ;;  %v1020_v39 = vpop.permute.xlu1 %1019 }
 0x5e2   :  { %7119 = vmatmul.mubr.msk.f32.gmra.mrb[18].mxu1 %vm520_vm9, %v795_v60 }
 0x5e3   :  { %7121 = vmatprep.mubr.msk.f32.mxu1 %vm8364_vm0, %v8363_v2 }
 0x5e6   :  { %7122 = vmatmul.mubr.msk.f32.gmra.mrb[20].mxu1 %vm520_vm9, %v797_v62 }
 0x684   :  { %v641_v12 = vpop.f32.mrb[10].mxu1 }
 0x685   :  { %v7087_v14 = vpop.f32.mrb[11].mxu1 }
 0x688   :  { %v646_v16 = vpop.f32.mrb[12].mxu1 }
 0x689   :  { %v655_v17 = vpack.c.bf16 %v646_v16, %v641_v12  ;;  %v7090_v18 = vpop.f32.mrb[13].mxu1 }
 0x68b   :  { %7132 = vmatprep.mubr.msk.bf16.mxu1 %vm424_vm7, %v655_v17 }
 0x6ad   :  { %v651_v20 = vpop.f32.mrb[14].mxu1 }
 0x6ae   :  { %v656_v21 = vpack.c.bf16 %v651_v20, %v651_v20  ;;  %v7093_v22 = vpop.f32.mrb[15].mxu1 }
 0x6b0   :  { %7133 = vmatmul.mubr.msk.bf16.vlgmr.msra.gmra.mrb[24].mxu1 %vm424_vm7, %v656_v21 }
 0x6b1   :  { %v883_v23 = vpop.f32.mrb[16].mxu1  ;;  %7157 = vmatprep.mubr.msk.f32.mxu1 %vm8364_vm0, %v8363_v2 }
 0x6b2   :  { %v7117_v24 = vpop.f32.mrb[17].mxu1 }
 0x6b5   :  { %v888_v26 = vpop.f32.mrb[18].mxu1 }
 0x6b6   :  { %v897_v27 = vpack.c.bf16 %v888_v26, %v883_v23  ;;  %v7120_v28 = vpop.f32.mrb[19].mxu1 }
 0x6b8   :  { %7126 = vmatprep.mubr.msk.bf16.mxu0 %vm424_vm7, %v897_v27 }
 0x6b9   :  { %v893_v32 = vpop.f32.mrb[20].mxu1 }
 0x6ba   :  { %v898_v33 = vpack.c.bf16 %v893_v32, %v893_v32  ;;  %v7123_v34 = vpop.f32.mrb[21].mxu1 }
 0x6bc   :  { %7127 = vmatmul.mubr.msk.bf16.vlgmr.msra.gmra.mrb[24].mxu0 %vm424_vm7, %v898_v33 }
 0x6bd   :  { %7769 = vmatpush3.bf16.xpose.msk.msra.mxu0 %vm8654_vm8, %v7767_v35  ;;  %7142 = vmatprep.mubr.msk.f32.mxu0 %vm8364_vm0, %v8363_v2 }
 0x6be   :  { %7140 = vmatprep.subr.mxu0 %v8363_v2 }
 0x6c5   :  { %7141 = vmatpush3.xpose.msk.msra.mxu0 %vm424_vm7, %v1026_v36 }
 0x6c8   :  { %7143 = vmatmul.mubr.msk.f32.vlgmr.msra.gmra.mrb[22].mxu0 %vm424_vm7, %v1016_v37 }
 0x6c9   :  { %7145 = vmatprep.mubr.msk.f32.mxu0 %vm8364_vm0, %v8363_v2 }
 0x6cc   :  { %7146 = vmatmul.mubr.msk.f32.gmra.mrb[28].mxu0 %vm424_vm7, %v1018_v38 }
 0x6cd   :  { %7148 = vmatprep.mubr.msk.f32.mxu0 %vm8364_vm0, %v8363_v2 }
 0x6d0   :  { %7149 = vmatmul.mubr.msk.f32.gmra.mrb[30].mxu0 %vm424_vm7, %v1020_v39 }
 0x783   :  { %v7134_v40 = vpop.f32.mrb[24].mxu1 }
 0x784   :  { %v1001_v41 = vpop.f32.mrb[25].mxu1 }
 0x785   :  { %v7135_v42 = vpop.f32.mrb[26].mxu1 }
 0x786   :  { %v1004_v43 = vpop.f32.mrb[27].mxu1 }
 0x78f   :  { %v7128_v44 = vpop.f32.mrb[24].mxu0 }
 0x790   :  { %v8788_v45 = vadd.f32 %v7134_v40, %v7128_v44  ;;  %v944_v46 = vpop.f32.mrb[25].mxu0 }
 0x791   :  { %v8790_v47 = vadd.f32 %v1001_v41, %v944_v46  ;;  %v7129_v48 = vpop.f32.mrb[26].mxu0 }
 0x792   :  { %v947_v49 = vpop.f32.mrb[27].mxu0 }
 0x793   :  { %v8792_v50 = vadd.f32 %v1004_v43, %v947_v49 }
 0x79b   :  { %v1105_v51 = vpop.f32.mrb[22].mxu0 }
 0x79c   :  { %v1119_v52 = vmul.f32 0.35355338, %v1105_v51  ;;  %v7144_v53 = vpop.f32.mrb[23].mxu0 }
 0x79e   :  { %v1122_v54 = vsel %vm520_vm9, %v1119_v52, -inf }
 0x79f   :  { %1123 = vmax.xlane.f32.xlu0 %v1122_v54  ;;  %v1110_v55 = vpop.f32.mrb[28].mxu0 }
 0x7a0   :  { %v1120_v56 = vmul.f32 0.35355338, %v1110_v55  ;;  %v7147_v57 = vpop.f32.mrb[29].mxu0 }
 0x7a2   :  { %v1125_v58 = vsel %vm520_vm9, %v1120_v56, -inf }
 0x7a3   :  { %1126 = vmax.xlane.f32.xlu1 %v1125_v58  ;;  %v1115_v59 = vpop.f32.mrb[30].mxu0 }
 0x7a4   :  { %v1121_v60 = vmul.f32 0.35355338, %v1115_v59  ;;  %v7150_v61 = vpop.f32.mrb[31].mxu0 }
 0x7a6   :  { %v1128_v62 = vsel %vm527_vm10, %v1121_v60, -inf }
 0x7a7   :  { %1129 = vmax.xlane.f32.xlu0 %v1128_v62 }
 0x7b4   :  { %1159 = vrot.lane.b32.xlu1 %v8629_v9, %s10077_s27 }
 0x7b8   :  { %7950 = vrot.lane.b32.xlu1 %v8625_v8, %s10075_s1 }
 0x7bc   :  { %1327 = vrot.lane.b32.xlu1 %v8629_v9, %s10075_s1 }
 0x82c   :  { %v1124_v63 = vpop.xlane.xlu0 %1123 }
 0x82d   :  { %v1131_v5 = vsub.f32 %v1119_v52, %v1124_v63  ;;  %v234_v52 = vld [vmem:[%s10054_s10 + $0x10] sm:$0xff] }
 0x82e   :  { %v8840_v53 = vpack.c.bf16 %v234_v52, %v234_v52 }
 0x82f   :  { %v1134_v12 = vmul.f32 1.442695, %v1131_v5 }
 0x830   :  { %v1127_v14 = vpop.xlane.xlu1 %1126  ;;  %7890 = vmatprep.subr.msk.bf16.mxu0 %vm906_vm12, %v8840_v53  ;;  %v8846_v54 = vsel %vm906_vm12, %v8840_v53, 0 }
 0x831   :  { %8115 = vpow2.f32 %v1134_v12  ;;  %v1132_v16 = vsub.f32 %v1120_v56, %v1127_v14  ;;  %7167 = vmatpush3.bf16.msra.mxu0 %v8846_v54 }
 0x832   :  { %7777 = vmatprep.subr.bf16.mxu0 %v8365_v3 }
 0x833   :  { %v1136_v17 = vmul.f32 1.442695, %v1132_v16 }
 0x834   :  { %v1130_v18 = vpop.xlane.xlu0 %1129  ;;  %v1160_v28 = vpop.permute.xlu1 %1159 }
 0x835   :  { %8117 = vpow2.f32 %v1136_v17  ;;  %v1133_v20 = vsub.f32 %v1121_v60, %v1130_v18 }
 0x837   :  { %v1138_v21 = vmul.f32 1.442695, %v1133_v20 }
 0x838   :  { %v7951_v29 = vpop.permute.xlu1 %7950 }
 0x839   :  { %8119 = vpow2.f32 %v1138_v21  ;;  %v7953_v40 = vunpack.i.h.bf16 %v7951_v29  ;;  %v7952_v41 = vunpack.i.l.bf16 %v7951_v29 }
 0x83b   :  { %v8116_v22 = vpop.eup %8115  ;;  %v7774_v44 = vpack.c.bf16 %v7953_v40, %v7952_v41 }
 0x83c   :  { %v1140_v23 = vsel %vm520_vm9, %v8116_v22, 0.0  ;;  %v1328_v32 = vpop.permute.xlu1 %1327 }
 0x83d   :  { %1141 = vadd.xlane.f32.xlu0 %v1140_v23 }
 0x83f   :  { %v8118_v24 = vpop.eup %8117 }
 0x840   :  { %v1143_v25 = vsel %vm520_vm9, %v8118_v24, 0.0 }
 0x841   :  { %1144 = vadd.xlane.f32.xlu0 %v1143_v25 }
 0x843   :  { %v8120_v26 = vpop.eup %8119 }
 0x844   :  { %v1146_v27 = vsel %vm527_vm10, %v8120_v26, 0.0 }
 0x845   :  { %1147 = vadd.xlane.f32.xlu1 %v1146_v27 }
 0x856   :  { %1319 = vrot.lane.b32.xlu1 %v8621_v6, %s10073_s29 }
 0x857   :  { %7945 = vrot.lane.b32.xlu0 %v8625_v8, %s10077_s27 }
 0x85b   :  { %1317 = vrot.lane.b32.xlu0 %v8619_v4, %s10073_s29 }
 0x85f   :  { %1321 = vrot.lane.b32.xlu0 %v8629_v9, %s10073_s29 }
 0x8ca   :  { %v1142_v31 = vpop.xlane.xlu0 %1141 }
 0x8cb   :  { %8121 = vrcp.f32 %v1142_v31 }
 0x8ce   :  { %v1145_v33 = vpop.xlane.xlu0 %1144 }
 0x8cf   :  { %8123 = vrcp.f32 %v1145_v33 }
 0x8d2   :  { %v1148_v34 = vpop.xlane.xlu1 %1147  ;;  %v7946_v35 = vpop.permute.xlu0 %7945 }
 0x8d3   :  { %v7948_v36 = vunpack.i.h.bf16 %v7946_v35  ;;  %v7947_v6 = vunpack.i.l.bf16 %v7946_v35  ;;  %8125 = vrcp.f32 %v1148_v34 }
 0x8d5   :  { %v7771_v37 = vpack.c.bf16 %v7948_v36, %v7947_v6  ;;  %v8122_v38 = vpop.eup %8121 }
 0x8d6   :  { %v1150_v4 = vmul.f32 %v8122_v38, %v8116_v22  ;;  %v1318_v48 = vpop.permute.xlu0 %1317  ;;  %v1320_v49 = vpop.permute.xlu1 %1319 }
 0x8d7   :  { %7772 = vmatpush3.bf16.msra.mxu1 %v7771_v37 }
 0x8d8   :  { %7155 = vmatprep.subr.mxu1 %v8363_v2 }
 0x8d9   :  { %v8124_v39 = vpop.eup %8123 }
 0x8da   :  { %v1152_v42 = vmul.f32 %v8124_v39, %v8118_v24  ;;  %v1322_v51 = vpop.permute.xlu0 %1321 }
 0x8db   :  { %7156 = vmatpush3.msk.msra.mxu1 %vm572_vm11, %v1160_v28 }
 0x8dc   :  { %7158 = vmatmul.mubr.msk.f32.vlgmr.msra.gmra.mrb[22].mxu1 %vm520_vm9, %v1150_v4  ;;  %7773 = vmatprep.subr.bf16.mxu1 %v8365_v3 }
 0x8dd   :  { %7160 = vmatprep.mubr.msk.f32.mxu1 %vm8364_vm0, %v8363_v2  ;;  %v8126_v43 = vpop.eup %8125 }
 0x8de   :  { %v1154_v46 = vmul.f32 %v8126_v43, %v8120_v26 }
 0x8e0   :  { %7161 = vmatmul.mubr.msk.f32.gmra.mrb[28].mxu1 %vm520_vm9, %v1152_v42  ;;  %v8864_v42 = vrot.slane %v8686_v30, 1 }
 0x8e1   :  { %7163 = vmatprep.mubr.msk.f32.mxu1 %vm8364_vm0, %v8363_v2 }
 0x8e2   :  { %7776 = vmatpush3.bf16.xpose.msk.msra.mxu1 %vm8654_vm8, %v7774_v44  ;;  %v8870_v43 = vsel %vm1636_vm6, %v1638_v13, %v8864_v42 }
 0x8e3   :  { %7176 = vmatprep.subr.mxu1 %v8363_v2  ;;  %v8874_v44 = vpack.i.bf16 %v8870_v43, %v8642_v15 }
 0x8e4   :  { %7164 = vmatmul.mubr.msk.f32.gmra.mrb[30].mxu1 %vm520_vm9, %v1154_v46 }
 0x8e5   :  { %7178 = vmatprep.mubr.msk.f32.mxu1 %vm8364_vm0, %v8363_v2 }
 0x8ea   :  { %7177 = vmatpush3.xpose.msk.msra.mxu1 %vm424_vm7, %v1328_v32 }
 0x8ed   :  { %7179 = vmatmul.mubr.msk.f32.vlgmr.msra.gmra.mrb[32].mxu1 %vm424_vm7, %v1318_v48 }
 0x8ee   :  { %7181 = vmatprep.mubr.msk.f32.mxu1 %vm8364_vm0, %v8363_v2 }
 0x8f1   :  { %7182 = vmatmul.mubr.msk.f32.gmra.mrb[34].mxu1 %vm424_vm7, %v1320_v49 }
 0x8f2   :  { %7184 = vmatprep.mubr.msk.f32.mxu1 %vm8364_vm0, %v8363_v2 }
 0x8f5   :  { %7185 = vmatmul.mubr.msk.f32.gmra.mrb[36].mxu1 %vm424_vm7, %v1322_v51 }
 0x9af   :  { %v1240_v55 = vpop.f32.mrb[22].mxu1 }
 0x9b0   :  { %v7159_v56 = vpop.f32.mrb[23].mxu1 }
 0x9b3   :  { %v1245_v57 = vpop.f32.mrb[28].mxu1 }
 0x9b4   :  { %v1254_v58 = vpack.c.bf16 %v1245_v57, %v1240_v55  ;;  %v7162_v59 = vpop.f32.mrb[29].mxu1 }
 0x9b6   :  { %7168 = vmatprep.mubr.msk.bf16.mxu0 %vm424_vm7, %v1254_v58 }
 0x9b7   :  { %v1250_v60 = vpop.f32.mrb[30].mxu1 }
 0x9b8   :  { %v1255_v61 = vpack.c.bf16 %v1250_v60, %v1250_v60  ;;  %v7165_v62 = vpop.f32.mrb[31].mxu1 }
 0x9ba   :  { %7169 = vmatmul.mubr.msk.bf16.vlgmr.msra.gmra.mrb[32].mxu0 %vm424_vm7, %v1255_v61 }
 0x9bb   :  { %7193 = vmatprep.mubr.msk.f32.mxu0 %vm8364_vm0, %v8363_v2 }
 0x9c0   :  { %v1407_v63 = vpop.f32.mrb[32].mxu1 }
 0x9c1   :  { %v1421_v5 = vmul.f32 0.35355338, %v1407_v63  ;;  %v7180_v12 = vpop.f32.mrb[33].mxu1 }
 0x9c3   :  { %v1424_v14 = vsel %vm520_vm9, %v1421_v5, -inf }
 0x9c4   :  { %1425 = vmax.xlane.f32.xlu1 %v1424_v14  ;;  %v1412_v16 = vpop.f32.mrb[34].mxu1 }
 0x9c5   :  { %v1422_v17 = vmul.f32 0.35355338, %v1412_v16  ;;  %v7183_v18 = vpop.f32.mrb[35].mxu1 }
 0x9c7   :  { %v1427_v20 = vsel %vm520_vm9, %v1422_v17, -inf }
 0x9c8   :  { %1428 = vmax.xlane.f32.xlu0 %v1427_v20  ;;  %v1417_v21 = vpop.f32.mrb[36].mxu1 }
 0x9c9   :  { %v1423_v22 = vmul.f32 0.35355338, %v1417_v21  ;;  %v7186_v23 = vpop.f32.mrb[37].mxu1 }
 0x9cb   :  { %v1430_v24 = vsel %vm527_vm10, %v1423_v22, -inf }
 0x9cc   :  { %1431 = vmax.xlane.f32.xlu0 %v1430_v24 }
 0x9d5   :  { %7955 = vrot.lane.b32.xlu1 %v8625_v8, %s10071_s25 }
 0xa51   :  { %v1426_v25 = vpop.xlane.xlu1 %1425 }
 0xa52   :  { %v1433_v26 = vsub.f32 %v1421_v5, %v1426_v25 }
 0xa54   :  { %v1436_v27 = vmul.f32 1.442695, %v1433_v26 }
 0xa55   :  { %v7956_v28 = vpop.permute.xlu1 %7955  ;;  %v1429_v29 = vpop.xlane.xlu0 %1428 }
 0xa56   :  { %8127 = vpow2.f32 %v1436_v27  ;;  %v7958_v31 = vunpack.i.h.bf16 %v7956_v28  ;;  %v7957_v32 = vunpack.i.l.bf16 %v7956_v28  ;;  %v1434_v33 = vsub.f32 %v1422_v17, %v1429_v29 }
 0xa58   :  { %v7778_v34 = vpack.c.bf16 %v7958_v31, %v7957_v32  ;;  %v1438_v35 = vmul.f32 1.442695, %v1434_v33 }
 0xa59   :  { %v1432_v36 = vpop.xlane.xlu0 %1431 }
 0xa5a   :  { %8129 = vpow2.f32 %v1438_v35  ;;  %v1435_v6 = vsub.f32 %v1423_v22, %v1432_v36  ;;  %7779 = vmatpush3.bf16.msra.mxu0 %v7778_v34 }
 0xa5b   :  { %7191 = vmatprep.subr.mxu0 %v8363_v2 }
 0xa5c   :  { %v1440_v37 = vmul.f32 1.442695, %v1435_v6 }
 0xa5e   :  { %8131 = vpow2.f32 %v1440_v37 }
 0xa60   :  { %v8128_v8 = vpop.eup %8127 }
 0xa61   :  { %v1442_v38 = vsel %vm520_vm9, %v8128_v8, 0.0 }
 0xa62   :  { %1443 = vadd.xlane.f32.xlu0 %v1442_v38 }
 0xa64   :  { %v8130_v4 = vpop.eup %8129 }
 0xa65   :  { %v1445_v39 = vsel %vm520_vm9, %v8130_v4, 0.0 }
 0xa66   :  { %1446 = vadd.xlane.f32.xlu1 %v1445_v39 }
 0xa68   :  { %v8132_v40 = vpop.eup %8131 }
 0xa69   :  { %v1448_v41 = vsel %vm527_vm10, %v8132_v40, 0.0 }
 0xa6a   :  { %1449 = vadd.xlane.f32.xlu0 %v1448_v41 }
 0xa77   :  { %7960 = vrot.lane.b32.xlu1 %v8874_v44, %s8366_s30 }
 0xa7b   :  { %1646 = vrot.lane.b32.xlu1 %v8864_v42, %s8366_s30 }
 0xa7f   :  { %7965 = vrot.lane.b32.xlu1 %v8874_v44, %s8368_s2 }
 0xa80   :  { %1461 = vrot.lane.b32.xlu0 %v8629_v9, %s10071_s25 }
 0xa83   :  { %1877 = vrot.lane.b32.xlu1 %v8642_v15, %s8367_s3 }
 0xa84   :  { %1887 = vrot.lane.b32.xlu0 %v8864_v42, %s8368_s2 }
 0xa87   :  { %1881 = vrot.lane.b32.xlu1 %v8864_v42, %s8367_s3 }
 0xa88   :  { %1879 = vrot.lane.b32.xlu0 %v8870_v43, %s8367_s3 }
 0xa8d   :  { %v7170_v11 = vpop.f32.mrb[32].mxu0 }
 0xa8e   :  { %v8893_v13 = vadd.f32 %v7170_v11, %v8788_v45  ;;  %v1300_v30 = vpop.f32.mrb[33].mxu0 }
 0xa8f   :  { %v8896_v46 = vadd.f32 %v1300_v30, %v8790_v47  ;;  %v7171_v9 = vpop.f32.mrb[34].mxu0 }
 0xa90   :  { %v1303_v48 = vpop.f32.mrb[35].mxu0 }
 0xa91   :  { %v8899_v49 = vadd.f32 %v1303_v48, %v8792_v50 }
 0xaef   :  { %v1444_v51 = vpop.xlane.xlu0 %1443 }
 0xaf0   :  { %8133 = vrcp.f32 %v1444_v51 }
 0xaf3   :  { %v1447_v52 = vpop.xlane.xlu1 %1446 }
 0xaf4   :  { %8135 = vrcp.f32 %v1447_v52 }
 0xaf7   :  { %v1450_v55 = vpop.xlane.xlu0 %1449  ;;  %v7961_v57 = vpop.permute.xlu1 %7960 }
 0xaf8   :  { %8137 = vrcp.f32 %v1450_v55  ;;  %v7963_v59 = vunpack.i.h.bf16 %v7961_v57  ;;  %v7962_v47 = vunpack.i.l.bf16 %v7961_v57 }
 0xafa   :  { %v8134_v56 = vpop.eup %8133  ;;  %v7781_v62 = vpack.c.bf16 %v7963_v59, %v7962_v47 }
 0xafb   :  { %v1462_v58 = vpop.permute.xlu0 %1461  ;;  %v1452_v45 = vmul.f32 %v8134_v56, %v8128_v8  ;;  %v1647_v61 = vpop.permute.xlu1 %1646 }
 0xafc   :  { %7192 = vmatpush3.msk.msra.mxu0 %vm572_vm11, %v1462_v58 }
 0xafd   :  { %7194 = vmatmul.mubr.msk.f32.vlgmr.msra.gmra.mrb[36].mxu0 %vm520_vm9, %v1452_v45  ;;  %7780 = vmatprep.subr.bf16.mxu0 %v8365_v3 }
 0xafe   :  { %v8136_v50 = vpop.eup %8135  ;;  %7196 = vmatprep.mubr.msk.f32.mxu0 %vm8364_vm0, %v8363_v2 }
 0xaff   :  { %v1454_v60 = vmul.f32 %v8136_v50, %v8130_v4  ;;  %v7966_v12 = vpop.permute.xlu1 %7965  ;;  %v1888_v18 = vpop.permute.xlu0 %1887 }
 0xb00   :  { %v7968_v14 = vunpack.i.h.bf16 %v7966_v12  ;;  %v7967_v16 = vunpack.i.l.bf16 %v7966_v12 }
 0xb01   :  { %7197 = vmatmul.mubr.msk.f32.gmra.mrb[38].mxu0 %vm520_vm9, %v1454_v60 }
 0xb02   :  { %v8138_v63 = vpop.eup %8137  ;;  %7199 = vmatprep.mubr.msk.f32.mxu0 %vm8364_vm0, %v8363_v2  ;;  %v7788_v17 = vpack.c.bf16 %v7968_v14, %v7967_v16 }
 0xb03   :  { %7783 = vmatpush3.bf16.xpose.msk.msra.mxu0 %vm8654_vm8, %v7781_v62  ;;  %v1456_v5 = vmul.f32 %v8138_v63, %v8132_v40  ;;  %v1878_v20 = vpop.permute.xlu1 %1877  ;;  %v1880_v21 = vpop.permute.xlu0 %1879 }
 0xb04   :  { %7212 = vmatprep.subr.mxu0 %v8363_v2 }
 0xb05   :  { %7200 = vmatmul.mubr.msk.f32.gmra.mrb[40].mxu0 %vm520_vm9, %v1456_v5 }
 0xb06   :  { %7214 = vmatprep.mubr.msk.f32.mxu0 %vm8364_vm0, %v8363_v2 }
 0xb07   :  { %v1882_v22 = vpop.permute.xlu1 %1881 }
 0xb0b   :  { %7213 = vmatpush3.xpose.msk.msra.mxu0 %vm424_vm7, %v1647_v61 }
 0xb0c   :  { %7787 = vmatprep.subr.bf16.mxu0 %v8365_v3 }
 0xb0e   :  { %7215 = vmatmul.mubr.msk.f32.vlgmr.msra.gmra.mrb[42].mxu0 %vm424_vm7, %v8642_v15 }
 0xb0f   :  { %7790 = vmatpush3.bf16.xpose.msk.msra.mxu0 %vm8654_vm8, %v7788_v17  ;;  %7217 = vmatprep.mubr.msk.f32.mxu0 %vm8364_vm0, %v8363_v2 }
 0xb10   :  { %7242 = vmatprep.subr.mxu0 %v8363_v2 }
 0xb12   :  { %7218 = vmatmul.mubr.msk.f32.gmra.mrb[44].mxu0 %vm424_vm7, %v8870_v43 }
 0xb13   :  { %7220 = vmatprep.mubr.msk.f32.mxu0 %vm8364_vm0, %v8363_v2 }
 0xb16   :  { %7221 = vmatmul.mubr.msk.f32.gmra.mrb[46].mxu0 %vm424_vm7, %v8864_v42 }
 0xb17   :  { %7243 = vmatpush3.xpose.msk.msra.mxu0 %vm424_vm7, %v1888_v18  ;;  %7244 = vmatprep.mubr.msk.f32.mxu0 %vm8364_vm0, %v8363_v2 }
 0xb18   :  { %7892 = vmatprep.subr.msk.bf16.mxu0 %vm906_vm12, %v8759_v7  ;;  %v235_v7 = vld [vmem:[%s10054_s10 + $0x18] sm:$0xff] }
 0xb19   :  { %v8948_v23 = vpack.c.bf16 %v235_v7, %v235_v7 }
 0xb1a   :  { %7245 = vmatmul.mubr.msk.f32.vlgmr.msra.gmra.mrb[48].mxu0 %vm424_vm7, %v1878_v20 }
 0xb1b   :  { %7247 = vmatprep.mubr.msk.f32.mxu0 %vm8364_vm0, %v8363_v2  ;;  %7269 = vmatpush3.bf16.msra.mxu0 %v8765_v10 }
 0xb1c   :  { %7893 = vmatprep.subr.msk.bf16.mxu0 %vm906_vm12, %v8746_v0  ;;  %7891 = vmatprep.subr.msk.bf16.mxu1 %vm906_vm12, %v8948_v23  ;;  %v8954_v0 = vsel %vm906_vm12, %v8948_v23, 0 }
 0xb1d   :  { %7203 = vmatpush3.bf16.msra.mxu1 %v8954_v0 }
 0xb1e   :  { %7248 = vmatmul.mubr.msk.f32.gmra.mrb[50].mxu0 %vm424_vm7, %v1880_v21  ;;  %7784 = vmatprep.subr.bf16.mxu1 %v8365_v3 }
 0xb1f   :  { %7250 = vmatprep.mubr.msk.f32.mxu0 %vm8364_vm0, %v8363_v2 }
 0xb22   :  { %7251 = vmatmul.mubr.msk.f32.gmra.mrb[52].mxu0 %vm424_vm7, %v1882_v22 }
 0xbd0   :  { %v1542_v10 = vpop.f32.mrb[36].mxu0 }
 0xbd1   :  { %v7195_v24 = vpop.f32.mrb[37].mxu0 }
 0xbd4   :  { %v1547_v25 = vpop.f32.mrb[38].mxu0 }
 0xbd5   :  { %v1556_v26 = vpack.c.bf16 %v1547_v25, %v1542_v10  ;;  %v7198_v27 = vpop.f32.mrb[39].mxu0 }
 0xbd7   :  { %7204 = vmatprep.mubr.msk.bf16.mxu1 %vm424_vm7, %v1556_v26 }
 0xbd8   :  { %v1552_v28 = vpop.f32.mrb[40].mxu0 }
 0xbd9   :  { %v1557_v29 = vpack.c.bf16 %v1552_v28, %v1552_v28  ;;  %v7201_v31 = vpop.f32.mrb[41].mxu0 }
 0xbdb   :  { %7205 = vmatmul.mubr.msk.bf16.vlgmr.msra.gmra.mrb[40].mxu1 %vm424_vm7, %v1557_v29 }
 0xbdc   :  { %7229 = vmatprep.mubr.msk.f32.mxu1 %vm8364_vm0, %v8363_v2 }
 0xbe1   :  { %v1726_v32 = vpop.f32.mrb[42].mxu0 }
 0xbe2   :  { %v1740_v33 = vmul.f32 0.35355338, %v1726_v32  ;;  %v7216_v34 = vpop.f32.mrb[43].mxu0 }
 0xbe4   :  { %v1743_v35 = vsel %vm520_vm9, %v1740_v33, -inf }
 0xbe5   :  { %1744 = vmax.xlane.f32.xlu0 %v1743_v35  ;;  %v1731_v36 = vpop.f32.mrb[44].mxu0 }
 0xbe6   :  { %v1741_v6 = vmul.f32 0.35355338, %v1731_v36  ;;  %v7219_v37 = vpop.f32.mrb[45].mxu0  ;;  %v8995_v36 = vld [vmem:[%s10055_s11] ss:$0 sm:$0xff] }
 0xbe8   :  { %v1746_v8 = vsel %vm520_vm9, %v1741_v6, -inf }
 0xbe9   :  { %1747 = vmax.xlane.f32.xlu1 %v1746_v8  ;;  %v1736_v38 = vpop.f32.mrb[46].mxu0 }
 0xbea   :  { %v1742_v4 = vmul.f32 0.35355338, %v1736_v38  ;;  %v7222_v39 = vpop.f32.mrb[47].mxu0  ;;  %v8998_v38 = vld [vmem:[#allocation2 + $0x10] sm:$0xff] }
 0xbec   :  { %v1749_v40 = vsel %vm527_vm10, %v1742_v4, -inf }
 0xbed   :  { %1750 = vmax.xlane.f32.xlu0 %v1749_v40  ;;  %v1967_v41 = vpop.f32.mrb[48].mxu0 }
 0xbee   :  { %v1981_v11 = vmul.f32 0.35355338, %v1967_v41  ;;  %v7246_v30 = vpop.f32.mrb[49].mxu0  ;;  %v8354_v41 = vld [vmem:[#allocation2] sm:$0xff] }
 0xbf0   :  { %v1984_v9 = vsel %vm520_vm9, %v1981_v11, -inf }
 0xbf1   :  { %1985 = vmax.xlane.f32.xlu0 %v1984_v9  ;;  %v1972_v48 = vpop.f32.mrb[50].mxu0 }
 0xbf2   :  { %v1982_v51 = vmul.f32 0.35355338, %v1972_v48  ;;  %v7249_v52 = vpop.f32.mrb[51].mxu0  ;;  %v8355_v48 = vld [vmem:[#allocation2 + $0x8] sm:$0xff] }
 0xbf4   :  { %v1987_v55 = vsel %vm520_vm9, %v1982_v51, -inf }
 0xbf5   :  { %1988 = vmax.xlane.f32.xlu0 %v1987_v55  ;;  %v1977_v56 = vpop.f32.mrb[52].mxu0 }
 0xbf6   :  { %v1983_v57 = vmul.f32 0.35355338, %v1977_v56  ;;  %v7252_v58 = vpop.f32.mrb[53].mxu0 }
 0xbf8   :  { %v1990_v45 = vsel %vm527_vm10, %v1983_v57, -inf }
 0xbf9   :  { %1991 = vmax.xlane.f32.xlu1 %v1990_v45 }
 0xc0a   :  { %7970 = vrot.lane.b32.xlu1 %v8874_v44, %s8369_s23 }
 0xc72   :  { %v1745_v59 = vpop.xlane.xlu0 %1744 }
 0xc73   :  { %v1752_v47 = vsub.f32 %v1740_v33, %v1745_v59 }
 0xc75   :  { %v1755_v50 = vmul.f32 1.442695, %v1752_v47 }
 0xc76   :  { %v1748_v60 = vpop.xlane.xlu1 %1747 }
 0xc77   :  { %8139 = vpow2.f32 %v1755_v50  ;;  %v1753_v61 = vsub.f32 %v1741_v6, %v1748_v60 }
 0xc79   :  { %v1757_v62 = vmul.f32 1.442695, %v1753_v61 }
 0xc7a   :  { %v1751_v63 = vpop.xlane.xlu0 %1750 }
 0xc7b   :  { %8141 = vpow2.f32 %v1757_v62  ;;  %v1754_v5 = vsub.f32 %v1742_v4, %v1751_v63 }
 0xc7d   :  { %v1759_v12 = vmul.f32 1.442695, %v1754_v5 }
 0xc7e   :  { %v1986_v26 = vpop.xlane.xlu0 %1985 }
 0xc7f   :  { %8143 = vpow2.f32 %v1759_v12  ;;  %v1993_v29 = vsub.f32 %v1981_v11, %v1986_v26 }
 0xc81   :  { %v8970_v14 = vpop.eup %8139  ;;  %v1996_v8 = vmul.f32 1.442695, %v1993_v29 }
 0xc82   :  { %v1761_v16 = vsel %vm520_vm9, %v8970_v14, 0.0  ;;  %v1989_v27 = vpop.xlane.xlu0 %1988 }
 0xc83   :  { %1762 = vadd.xlane.f32.xlu0 %v1761_v16  ;;  %v1994_v28 = vsub.f32 %v1982_v51, %v1989_v27 }
 0xc85   :  { %v8974_v17 = vpop.eup %8141  ;;  %v1998_v31 = vmul.f32 1.442695, %v1994_v28 }
 0xc86   :  { %v1992_v18 = vpop.xlane.xlu1 %1991  ;;  %v1764_v20 = vsel %vm520_vm9, %v8974_v17, 0.0 }
 0xc87   :  { %1765 = vadd.xlane.f32.xlu1 %v1764_v20  ;;  %v1995_v32 = vsub.f32 %v1983_v57, %v1992_v18  ;;  %8145 = vpow2.f32 %v1998_v31 }
 0xc88   :  { %8147 = vpow2.f32 %v1996_v8 }
 0xc89   :  { %v8978_v21 = vpop.eup %8143  ;;  %v2000_v40 = vmul.f32 1.442695, %v1995_v32 }
 0xc8a   :  { %v7971_v22 = vpop.permute.xlu1 %7970  ;;  %v1767_v7 = vsel %vm527_vm10, %v8978_v21, 0.0 }
 0xc8b   :  { %v7973_v10 = vunpack.i.h.bf16 %v7971_v22  ;;  %v7972_v24 = vunpack.i.l.bf16 %v7971_v22  ;;  %1768 = vadd.xlane.f32.xlu0 %v1767_v7  ;;  %8149 = vpow2.f32 %v2000_v40 }
 0xc8d   :  { %v7785_v25 = vpack.c.bf16 %v7973_v10, %v7972_v24 }
 0xc8f   :  { %7786 = vmatpush3.bf16.msra.mxu1 %v7785_v25 }
 0xc90   :  { %7227 = vmatprep.subr.mxu1 %v8363_v2 }
 0xc91   :  { %v8146_v52 = vpop.eup %8145 }
 0xc92   :  { %v8148_v55 = vpop.eup %8147 }
 0xc93   :  { %v2002_v57 = vsel %vm520_vm9, %v8148_v55, 0.0 }
 0xc95   :  { %v8150_v56 = vpop.eup %8149 }
 0xc96   :  { %v2008_v58 = vsel %vm527_vm10, %v8150_v56, 0.0 }
 0xc98   :  { %7975 = vrot.lane.b32.xlu1 %v8874_v44, %s8370_s5 }
 0xc9c   :  { %2021 = vrot.lane.b32.xlu1 %v8864_v42, %s8370_s5 }
 0xca0   :  { %7980 = vrot.lane.b32.xlu1 %v8874_v44, %s8371_s24 }
 0xca1   :  { %1780 = vrot.lane.b32.xlu0 %v8864_v42, %s8369_s23 }
 0xcae   :  { %v7206_v33 = vpop.f32.mrb[40].mxu1 }
 0xcaf   :  { %v1618_v34 = vadd.f32 %v7206_v33, %v8893_v13  ;;  %v1602_v35 = vpop.f32.mrb[41].mxu1 }
 0xcb0   :  { %v1616_v6 = vadd.f32 %v1602_v35, %v8896_v46  ;;  %v7207_v37 = vpop.f32.mrb[42].mxu1 }
 0xcb1   :  { %v1621_v4 = vadd.f32 %v8998_v38, %v1618_v34  ;;  %v1605_v39 = vpop.f32.mrb[43].mxu1 }
 0xcb2   :  { %v1619_v11 = vadd.f32 %v8354_v41, %v1616_v6  ;;  %v1617_v13 = vadd.f32 %v1605_v39, %v8899_v49  ;;  %v2005_v49 = vsel %vm520_vm9, %v8146_v52, 0.0 }
 0xcb3   :  { %v1630_v30 = vadd.f32 %v8995_v36, %v1621_v4 }
 0xcb4   :  { %v1628_v9 = vadd.f32 %v8995_v36, %v1619_v11  ;;  %v1620_v51 = vadd.f32 %v8355_v48, %v1617_v13 }
 0xcb5   :  { %1633 = vst.msk [vmem:[#allocation2 + $0x10] sm:$0x1] %vm213_vm2, %v1630_v30 }
 0xcb6   :  { %1631 = vst.msk [vmem:[#allocation2] sm:$0xff] %vm217_vm4, %v1628_v9  ;;  %v1629_v46 = vadd.f32 %v8995_v36, %v1620_v51 }
 0xcb8   :  { %1632 = vst.msk [vmem:[#allocation2 + $0x8] sm:$0xff] %vm217_vm4, %v1629_v46 }
 0xcc0   :  { %2006 = vadd.xlane.f32.xlu0 %v2005_v49 }
 0xcc4   :  { %2003 = vadd.xlane.f32.xlu1 %v2002_v57  ;;  %2009 = vadd.xlane.f32.xlu0 %v2008_v58 }
 0xcd5   :  { %2236 = vrot.lane.b32.xlu1 %v8864_v42, %s8371_s24 }
 0xcd9   :  { %2228 = vrot.lane.b32.xlu1 %v8870_v43, %s8372_s6 }
 0xcda   :  { %2226 = vrot.lane.b32.xlu0 %v8642_v15, %s8372_s6 }
 0xcde   :  { %2230 = vrot.lane.b32.xlu0 %v8864_v42, %s8372_s6 }
 0xd10   :  { %v1763_v45 = vpop.xlane.xlu0 %1762 }
 0xd11   :  { %8151 = vrcp.f32 %v1763_v45 }
 0xd14   :  { %v1766_v59 = vpop.xlane.xlu1 %1765 }
 0xd15   :  { %8153 = vrcp.f32 %v1766_v59 }
 0xd18   :  { %v7976_v47 = vpop.permute.xlu1 %7975  ;;  %v1769_v50 = vpop.xlane.xlu0 %1768 }
 0xd19   :  { %v7978_v60 = vunpack.i.h.bf16 %v7976_v47  ;;  %v7977_v61 = vunpack.i.l.bf16 %v7976_v47  ;;  %8155 = vrcp.f32 %v1769_v50 }
 0xd1b   :  { %v8152_v62 = vpop.eup %8151  ;;  %v7792_v12 = vpack.c.bf16 %v7978_v60, %v7977_v61 }
 0xd1c   :  { %v1781_v63 = vpop.permute.xlu0 %1780  ;;  %v1771_v5 = vmul.f32 %v8152_v62, %v8970_v14  ;;  %v2022_v20 = vpop.permute.xlu1 %2021 }
 0xd1d   :  { %7228 = vmatpush3.msk.msra.mxu1 %vm572_vm11, %v1781_v63 }
 0xd1e   :  { %7230 = vmatmul.mubr.msk.f32.vlgmr.msra.gmra.mrb[38].mxu1 %vm520_vm9, %v1771_v5  ;;  %7791 = vmatprep.subr.bf16.mxu1 %v8365_v3 }
 0xd1f   :  { %v8154_v16 = vpop.eup %8153  ;;  %7793 = vmatpush3.bf16.msra.mxu1 %v7792_v12  ;;  %7232 = vmatprep.mubr.msk.f32.mxu1 %vm8364_vm0, %v8363_v2 }
 0xd20   :  { %v1773_v18 = vmul.f32 %v8154_v16, %v8974_v17  ;;  %7257 = vmatprep.subr.mxu1 %v8363_v2  ;;  %v7981_v17 = vpop.permute.xlu1 %7980 }
 0xd21   :  { %v7983_v25 = vunpack.i.h.bf16 %v7981_v17  ;;  %v7982_v26 = vunpack.i.l.bf16 %v7981_v17 }
 0xd22   :  { %7233 = vmatmul.mubr.msk.f32.gmra.mrb[44].mxu1 %vm520_vm9, %v1773_v18 }
 0xd23   :  { %v8156_v14 = vpop.eup %8155  ;;  %7258 = vmatpush3.msk.msra.mxu1 %vm572_vm11, %v2022_v20  ;;  %7235 = vmatprep.mubr.msk.f32.mxu1 %vm8364_vm0, %v8363_v2 }
 0xd24   :  { %v1775_v22 = vmul.f32 %v8156_v14, %v8978_v21  ;;  %7794 = vmatprep.subr.bf16.mxu1 %v8365_v3  ;;  %v7795_v21 = vpack.c.bf16 %v7983_v25, %v7982_v26 }
 0xd26   :  { %7236 = vmatmul.mubr.msk.f32.gmra.mrb[46].mxu1 %vm520_vm9, %v1775_v22 }
 0xd27   :  { %7259 = vmatprep.mubr.msk.f32.mxu1 %vm8364_vm0, %v8363_v2 }
 0xd4d   :  { %v2007_v7 = vpop.xlane.xlu0 %2006 }
 0xd51   :  { %v2004_v10 = vpop.xlane.xlu1 %2003  ;;  %v2010_v24 = vpop.xlane.xlu0 %2009 }
 0xd52   :  { %8157 = vrcp.f32 %v2004_v10 }
 0xd53   :  { %8159 = vrcp.f32 %v2007_v7 }
 0xd54   :  { %8161 = vrcp.f32 %v2010_v24 }
 0xd55   :  { %v2237_v34 = vpop.permute.xlu1 %2236  ;;  %v2227_v35 = vpop.permute.xlu0 %2226 }
 0xd59   :  { %v2229_v6 = vpop.permute.xlu1 %2228  ;;  %v2231_v37 = vpop.permute.xlu0 %2230 }
 0xd5c   :  { %v8158_v27 = vpop.eup %8157 }
 0xd5d   :  { %v2012_v28 = vmul.f32 %v8158_v27, %v8148_v55  ;;  %v8160_v29 = vpop.eup %8159 }
 0xd5e   :  { %v2014_v31 = vmul.f32 %v8160_v29, %v8146_v52  ;;  %v8162_v32 = vpop.eup %8161 }
 0xd5f   :  { %7260 = vmatmul.mubr.msk.f32.vlgmr.msra.gmra.mrb[48].mxu1 %vm520_vm9, %v2012_v28  ;;  %v2016_v33 = vmul.f32 %v8162_v32, %v8150_v56 }
 0xd60   :  { %7797 = vmatpush3.bf16.xpose.msk.msra.mxu1 %vm8654_vm8, %v7795_v21  ;;  %7262 = vmatprep.mubr.msk.f32.mxu1 %vm8364_vm0, %v8363_v2 }
 0xd61   :  { %7284 = vmatprep.subr.mxu1 %v8363_v2 }
 0xd63   :  { %7263 = vmatmul.mubr.msk.f32.gmra.mrb[50].mxu1 %vm520_vm9, %v2014_v31 }
 0xd64   :  { %7265 = vmatprep.mubr.msk.f32.mxu1 %vm8364_vm0, %v8363_v2 }
 0xd67   :  { %7266 = vmatmul.mubr.msk.f32.gmra.mrb[52].mxu1 %vm520_vm9, %v2016_v33 }
 0xd68   :  { %7285 = vmatpush3.xpose.msk.msra.mxu1 %vm424_vm7, %v2237_v34  ;;  %7286 = vmatprep.mubr.msk.f32.mxu1 %vm8364_vm0, %v8363_v2 }
 0xd69   :  { %7798 = vmatprep.subr.bf16.mxu1 %v8365_v3 }
 0xd6b   :  { %7287 = vmatmul.mubr.msk.f32.vlgmr.msra.gmra.mrb[54].mxu1 %vm424_vm7, %v2227_v35 }
 0xd6c   :  { %7289 = vmatprep.mubr.msk.f32.mxu1 %vm8364_vm0, %v8363_v2 }
 0xd6f   :  { %7290 = vmatmul.mubr.msk.f32.gmra.mrb[56].mxu1 %vm424_vm7, %v2229_v6 }
 0xd70   :  { %7292 = vmatprep.mubr.msk.f32.mxu1 %vm8364_vm0, %v8363_v2 }
 0xd73   :  { %7293 = vmatmul.mubr.msk.f32.gmra.mrb[58].mxu1 %vm424_vm7, %v2231_v37 }
 0xd74   :  { %7301 = vmatprep.mubr.msk.f32.mxu1 %vm8364_vm0, %v8363_v2 }
 0xdf1   :  { %v1861_v8 = vpop.f32.mrb[38].mxu1 }
 0xdf2   :  { %v7231_v4 = vpop.f32.mrb[39].mxu1 }
 0xdf5   :  { %v1866_v39 = vpop.f32.mrb[44].mxu1 }
 0xdf6   :  { %v1875_v40 = vpack.c.bf16 %v1866_v39, %v1861_v8  ;;  %v7234_v41 = vpop.f32.mrb[45].mxu1 }
 0xdf9   :  { %v1871_v11 = vpop.f32.mrb[46].mxu1 }
 0xdfa   :  { %v7237_v13 = vpop.f32.mrb[47].mxu1  ;;  %v1876_v62 = vpack.c.bf16 %v1871_v11, %v1871_v11 }
 0xe32   :  { %v2102_v30 = vpop.f32.mrb[48].mxu1 }
 0xe33   :  { %v7261_v9 = vpop.f32.mrb[49].mxu1 }
 0xe36   :  { %v2107_v48 = vpop.f32.mrb[50].mxu1 }
 0xe37   :  { %v2116_v51 = vpack.c.bf16 %v2107_v48, %v2102_v30  ;;  %v7264_v46 = vpop.f32.mrb[51].mxu1 }
 0xe39   :  { %7270 = vmatprep.mubr.msk.bf16.mxu0 %vm424_vm7, %v2116_v51 }
 0xe3a   :  { %v2112_v52 = vpop.f32.mrb[52].mxu1 }
 0xe3b   :  { %v2117_v55 = vpack.c.bf16 %v2112_v52, %v2112_v52  ;;  %v7267_v49 = vpop.f32.mrb[53].mxu1 }
 0xe3d   :  { %7271 = vmatmul.mubr.msk.bf16.vlgmr.msra.gmra.mrb[56].mxu0 %vm424_vm7, %v2117_v55 }
 0xe3e   :  { %7276 = vmatprep.mubr.msk.bf16.mxu0 %vm424_vm7, %v1875_v40  ;;  %v2316_v56 = vpop.f32.mrb[54].mxu1  ;;  %7275 = vmatpush3.bf16.msra.mxu0 %v8752_v1 }
 0xe3f   :  { %v2330_v57 = vmul.f32 0.35355338, %v2316_v56  ;;  %v7288_v58 = vpop.f32.mrb[55].mxu1  ;;  %7894 = vmatprep.subr.msk.bf16.mxu0 %vm906_vm12, %v8840_v53 }
 0xe41   :  { %v2333_v45 = vsel %vm520_vm9, %v2330_v57, -inf }
 0xe42   :  { %2334 = vmax.xlane.f32.xlu1 %v2333_v45  ;;  %v2321_v59 = vpop.f32.mrb[56].mxu1 }
 0xe43   :  { %v2331_v47 = vmul.f32 0.35355338, %v2321_v59  ;;  %v7291_v50 = vpop.f32.mrb[57].mxu1 }
 0xe45   :  { %v2336_v60 = vsel %vm520_vm9, %v2331_v47, -inf }
 0xe46   :  { %2337 = vmax.xlane.f32.xlu0 %v2336_v60  ;;  %v2326_v61 = vpop.f32.mrb[58].mxu1 }
 0xe47   :  { %v2332_v63 = vmul.f32 0.35355338, %v2326_v61  ;;  %v7294_v5 = vpop.f32.mrb[59].mxu1 }
 0xe49   :  { %7277 = vmatmul.mubr.msk.bf16.vlgmr.msra.gmra.mrb[56].mxu0 %vm424_vm7, %v1876_v62  ;;  %v2339_v1 = vsel %vm527_vm10, %v2332_v63, -inf }
 0xe4a   :  { %2340 = vmax.xlane.f32.xlu0 %v2339_v1  ;;  %7311 = vmatpush3.bf16.msra.mxu0 %v8846_v54 }
 0xe4b   :  { %7805 = vmatprep.subr.bf16.mxu0 %v8365_v3 }
 0xe53   :  { %7985 = vrot.lane.b32.xlu1 %v8874_v44, %s10077_s27 }
 0xecf   :  { %v2335_v53 = vpop.xlane.xlu1 %2334 }
 0xed0   :  { %v2342_v12 = vsub.f32 %v2330_v57, %v2335_v53 }
 0xed2   :  { %v2345_v16 = vmul.f32 1.442695, %v2342_v12 }
 0xed3   :  { %v7986_v18 = vpop.permute.xlu1 %7985  ;;  %v2338_v20 = vpop.xlane.xlu0 %2337 }
 0xed4   :  { %8163 = vpow2.f32 %v2345_v16  ;;  %v7988_v14 = vunpack.i.h.bf16 %v7986_v18  ;;  %v7987_v22 = vunpack.i.l.bf16 %v7986_v18  ;;  %v2343_v17 = vsub.f32 %v2331_v47, %v2338_v20 }
 0xed6   :  { %v7799_v7 = vpack.c.bf16 %v7988_v14, %v7987_v22  ;;  %v2347_v10 = vmul.f32 1.442695, %v2343_v17 }
 0xed7   :  { %v2341_v24 = vpop.xlane.xlu0 %2340 }
 0xed8   :  { %8165 = vpow2.f32 %v2347_v10  ;;  %v2344_v25 = vsub.f32 %v2332_v63, %v2341_v24  ;;  %7800 = vmatpush3.bf16.msra.mxu1 %v7799_v7 }
 0xed9   :  { %7299 = vmatprep.subr.mxu1 %v8363_v2 }
 0xeda   :  { %v2349_v54 = vmul.f32 1.442695, %v2344_v25 }
 0xedc   :  { %8167 = vpow2.f32 %v2349_v54 }
 0xede   :  { %v8164_v26 = vpop.eup %8163 }
 0xedf   :  { %v2351_v27 = vsel %vm520_vm9, %v8164_v26, 0.0 }
 0xee0   :  { %2352 = vadd.xlane.f32.xlu0 %v2351_v27 }
 0xee2   :  { %v8166_v28 = vpop.eup %8165 }
 0xee3   :  { %v2354_v29 = vsel %vm520_vm9, %v8166_v28, 0.0 }
 0xee4   :  { %2355 = vadd.xlane.f32.xlu1 %v2354_v29 }
 0xee6   :  { %v8168_v21 = vpop.eup %8167 }
 0xee7   :  { %v2357_v31 = vsel %vm527_vm10, %v8168_v21, 0.0 }
 0xee8   :  { %2358 = vadd.xlane.f32.xlu0 %v2357_v31 }
 0xef5   :  { %7990 = vrot.lane.b32.xlu1 %v8874_v44, %s10075_s1 }
 0xef9   :  { %2534 = vrot.lane.b32.xlu1 %v8864_v42, %s10075_s1  ;;  %s10098_s1 = smov 40  }
 0xefd   :  { %2524 = vrot.lane.b32.xlu1 %v8642_v15, %s10073_s29 }
 0xefe   :  { %2370 = vrot.lane.b32.xlu0 %v8864_v42, %s10077_s27 }
 0xf01   :  { %2528 = vrot.lane.b32.xlu1 %v8864_v42, %s10073_s29 }
 0xf02   :  { %2526 = vrot.lane.b32.xlu0 %v8870_v43, %s10073_s29 }
 0xf6d   :  { %v2353_v32 = vpop.xlane.xlu0 %2352 }
 0xf6e   :  { %8169 = vrcp.f32 %v2353_v32  ;;  %v9132_v32 = vld [vmem:[#allocation2] sm:$0xff] }
 0xf71   :  { %v2356_v33 = vpop.xlane.xlu1 %2355 }
 0xf72   :  { %8171 = vrcp.f32 %v2356_v33  ;;  %v2850_v33 = vsel %vm217_vm4, %v9132_v32, 0.0 }
 0xf75   :  { %v2359_v34 = vpop.xlane.xlu0 %2358  ;;  %v7991_v6 = vpop.permute.xlu1 %7990 }
 0xf76   :  { %8173 = vrcp.f32 %v2359_v34  ;;  %v7993_v15 = vunpack.i.h.bf16 %v7991_v6  ;;  %v7992_v4 = vunpack.i.l.bf16 %v7991_v6 }
 0xf78   :  { %v8170_v35 = vpop.eup %8169  ;;  %v7802_v40 = vpack.c.bf16 %v7993_v15, %v7992_v4 }
 0xf79   :  { %v2361_v37 = vmul.f32 %v8170_v35, %v8164_v26  ;;  %v2371_v8 = vpop.permute.xlu0 %2370  ;;  %v2535_v13 = vpop.permute.xlu1 %2534 }
 0xf7a   :  { %7300 = vmatpush3.msk.msra.mxu1 %vm572_vm11, %v2371_v8 }
 0xf7b   :  { %7302 = vmatmul.mubr.msk.f32.vlgmr.msra.gmra.mrb[60].mxu1 %vm520_vm9, %v2361_v37  ;;  %7801 = vmatprep.subr.bf16.mxu1 %v8365_v3 }
 0xf7c   :  { %v8172_v39 = vpop.eup %8171  ;;  %7304 = vmatprep.mubr.msk.f32.mxu1 %vm8364_vm0, %v8363_v2 }
 0xf7d   :  { %v2363_v43 = vmul.f32 %v8172_v39, %v8166_v28  ;;  %v2525_v30 = vpop.permute.xlu1 %2524  ;;  %v2527_v9 = vpop.permute.xlu0 %2526 }
 0xf7f   :  { %7305 = vmatmul.mubr.msk.f32.gmra.mrb[62].mxu1 %vm520_vm9, %v2363_v43 }
 0xf80   :  { %v8174_v41 = vpop.eup %8173  ;;  %7307 = vmatprep.mubr.msk.f32.mxu1 %vm8364_vm0, %v8363_v2 }
 0xf81   :  { %7804 = vmatpush3.bf16.xpose.msk.msra.mxu1 %vm8654_vm8, %v7802_v40  ;;  %v2365_v11 = vmul.f32 %v8174_v41, %v8168_v21  ;;  %v2529_v48 = vpop.permute.xlu1 %2528  ;;  %v9128_v21 = vld [vmem:[#allocation2 + $0x8] sm:$0xff] }
 0xf82   :  { %7320 = vmatprep.subr.mxu1 %v8363_v2  ;;  %v2853_v31 = vsel %vm217_vm4, %v9128_v21, 0.0 }
 0xf83   :  { %7308 = vmatmul.mubr.msk.f32.gmra.mrb[64].mxu1 %vm520_vm9, %v2365_v11 }
 0xf84   :  { %7322 = vmatprep.mubr.msk.f32.mxu1 %vm8364_vm0, %v8363_v2 }
 0xf89   :  { %7321 = vmatpush3.xpose.msk.msra.mxu1 %vm424_vm7, %v2535_v13 }
 0xf8a   :  { %7352 = vmatprep.subr.bf16.mxu1 %v8363_v2 }
 0xf8c   :  { %7323 = vmatmul.mubr.msk.f32.vlgmr.msra.gmra.mrb[66].mxu1 %vm424_vm7, %v2525_v30 }
 0xf8d   :  { %7325 = vmatprep.mubr.msk.f32.mxu1 %vm8364_vm0, %v8363_v2 }
 0xf90   :  { %7326 = vmatmul.mubr.msk.f32.gmra.mrb[68].mxu1 %vm424_vm7, %v2527_v9 }
 0xf91   :  { %7328 = vmatprep.mubr.msk.f32.mxu1 %vm8364_vm0, %v8363_v2 }
 0xf94   :  { %7329 = vmatmul.mubr.msk.f32.gmra.mrb[70].mxu1 %vm424_vm7, %v2529_v48 }
 0xf95   :  { %7356 = vmatprep.mubr.msk.bf16.mxu1 %vm8364_vm0, %v8363_v2 }
0x104e   :  { %v2451_v51 = vpop.f32.mrb[60].mxu1 }
0x104f   :  { %v7303_v46 = vpop.f32.mrb[61].mxu1 }
0x1052   :  { %v2456_v52 = vpop.f32.mrb[62].mxu1 }
0x1053   :  { %v2465_v55 = vpack.c.bf16 %v2456_v52, %v2451_v51  ;;  %v7306_v49 = vpop.f32.mrb[63].mxu1 }
0x1055   :  { %7312 = vmatprep.mubr.msk.bf16.mxu0 %vm424_vm7, %v2465_v55 }
0x1056   :  { %v2461_v56 = vpop.f32.mrb[64].mxu1 }
0x1057   :  { %v2466_v57 = vpack.c.bf16 %v2461_v56, %v2461_v56  ;;  %v7309_v58 = vpop.f32.mrb[65].mxu1 }
0x1059   :  { %7313 = vmatmul.mubr.msk.bf16.vlgmr.msra.gmra.mrb[56].mxu0 %vm424_vm7, %v2466_v57 }
0x105a   :  { %7337 = vmatprep.mubr.msk.f32.mxu0 %vm8364_vm0, %v8363_v2 }
0x105f   :  { %v2614_v45 = vpop.f32.mrb[66].mxu1 }
0x1060   :  { %v2628_v59 = vmul.f32 0.35355338, %v2614_v45  ;;  %v7324_v47 = vpop.f32.mrb[67].mxu1 }
0x1062   :  { %v2631_v50 = vsel %vm520_vm9, %v2628_v59, -inf }
0x1063   :  { %2632 = vmax.xlane.f32.xlu0 %v2631_v50  ;;  %v2619_v60 = vpop.f32.mrb[68].mxu1 }
0x1064   :  { %v2629_v61 = vmul.f32 0.35355338, %v2619_v60  ;;  %v7327_v62 = vpop.f32.mrb[69].mxu1 }
0x1065   :  { %v8356_v62 = vld [vmem:[#allocation2 + $0x18] sm:$0xff] }
0x1066   :  { %v2634_v63 = vsel %vm520_vm9, %v2629_v61, -inf }
0x1067   :  { %2635 = vmax.xlane.f32.xlu1 %v2634_v63  ;;  %v2624_v5 = vpop.f32.mrb[70].mxu1 }
0x1068   :  { %v2630_v1 = vmul.f32 0.35355338, %v2624_v5  ;;  %v7330_v53 = vpop.f32.mrb[71].mxu1  ;;  %v8357_v5 = vld [vmem:[#allocation2 + $0x20] sm:$0x3] }
0x106a   :  { %v2637_v12 = vsel %vm527_vm10, %v2630_v1, -inf }
0x106b   :  { %2638 = vmax.xlane.f32.xlu0 %v2637_v12 }
0x10f0   :  { %v2633_v16 = vpop.xlane.xlu0 %2632 }
0x10f1   :  { %v2640_v18 = vsub.f32 %v2628_v59, %v2633_v16 }
0x10f3   :  { %v2643_v20 = vmul.f32 1.442695, %v2640_v18 }
0x10f4   :  { %v2636_v14 = vpop.xlane.xlu1 %2635 }
0x10f5   :  { %8175 = vpow2.f32 %v2643_v20  ;;  %v2641_v22 = vsub.f32 %v2629_v61, %v2636_v14 }
0x10f7   :  { %v2645_v17 = vmul.f32 1.442695, %v2641_v22 }
0x10f8   :  { %v2639_v7 = vpop.xlane.xlu0 %2638 }
0x10f9   :  { %8177 = vpow2.f32 %v2645_v17  ;;  %v2642_v10 = vsub.f32 %v2630_v1, %v2639_v7 }
0x10fb   :  { %v2647_v24 = vmul.f32 1.442695, %v2642_v10 }
0x10fd   :  { %8179 = vpow2.f32 %v2647_v24 }
0x10ff   :  { %v8176_v25 = vpop.eup %8175 }
0x1100   :  { %v2649_v54 = vsel %vm520_vm9, %v8176_v25, 0.0 }
0x1101   :  { %2650 = vadd.xlane.f32.xlu0 %v2649_v54 }
0x1103   :  { %v8178_v26 = vpop.eup %8177 }
0x1104   :  { %v2652_v27 = vsel %vm520_vm9, %v8178_v26, 0.0 }
0x1105   :  { %2653 = vadd.xlane.f32.xlu0 %v2652_v27  ;;  %v238_v27 = vld [vmem:[%s10056_s14 + $0x8] sm:$0xff] }
0x1107   :  { %v8180_v28 = vpop.eup %8179 }
0x1108   :  { %v2655_v29 = vsel %vm527_vm10, %v8180_v28, 0.0 }
0x1109   :  { %2656 = vadd.xlane.f32.xlu1 %v2655_v29  ;;  %v239_v29 = vld [vmem:[%s10056_s14 + $0x10] sm:$0xff] }
0x111a   :  { %2668 = vrot.lane.b32.xlu1 %v8864_v42, %s10071_s25 }
0x111b   :  { %7995 = vrot.lane.b32.xlu0 %v8874_v44, %s10071_s25 }
0x113a   :  { %2854 = vadd.xlane.f32.xlu0 %v2853_v31  ;;  %v240_v31 = vld [vmem:[%s10056_s14 + $0x18] sm:$0xff] }
0x113e   :  { %2851 = vadd.xlane.f32.xlu1 %v2850_v33  ;;  %v242_v33 = vpack.c.bf16 %v240_v31, %v239_v29  ;;  %v9243_v31 = vld [vmem:[%s10060_s15] ss:$0 sm:$0xff] }
0x118e   :  { %v2651_v34 = vpop.xlane.xlu0 %2650 }
0x118f   :  { %8181 = vrcp.f32 %v2651_v34 }
0x1192   :  { %v2654_v35 = vpop.xlane.xlu0 %2653 }
0x1193   :  { %8183 = vrcp.f32 %v2654_v35 }
0x1196   :  { %v2657_v42 = vpop.xlane.xlu1 %2656  ;;  %v7996_v6 = vpop.permute.xlu0 %7995 }
0x1197   :  { %v7998_v37 = vunpack.i.h.bf16 %v7996_v6  ;;  %v7997_v44 = vunpack.i.l.bf16 %v7996_v6  ;;  %8185 = vrcp.f32 %v2657_v42 }
0x1199   :  { %v7806_v8 = vpack.c.bf16 %v7998_v37, %v7997_v44  ;;  %v8182_v15 = vpop.eup %8181 }
0x119a   :  { %v2669_v4 = vpop.permute.xlu1 %2668  ;;  %v2659_v39 = vmul.f32 %v8182_v15, %v8176_v25 }
0x119b   :  { %7807 = vmatpush3.bf16.msra.mxu0 %v7806_v8 }
0x119c   :  { %7335 = vmatprep.subr.mxu0 %v8363_v2 }
0x119d   :  { %v8184_v43 = vpop.eup %8183 }
0x119e   :  { %v2661_v40 = vmul.f32 %v8184_v43, %v8178_v26  ;;  %v237_v26 = vld [vmem:[%s10056_s14] sm:$0xff] }
0x119f   :  { %7336 = vmatpush3.msk.msra.mxu0 %vm572_vm11, %v2669_v4 }
0x11a0   :  { %7338 = vmatmul.mubr.msk.f32.vlgmr.msra.gmra.mrb[54].mxu0 %vm520_vm9, %v2659_v39  ;;  %7895 = vmatprep.subr.msk.bf16.mxu0 %vm906_vm12, %v8948_v23 }
0x11a1   :  { %7340 = vmatprep.mubr.msk.f32.mxu0 %vm8364_vm0, %v8363_v2  ;;  %7347 = vmatpush3.bf16.msra.mxu0 %v8954_v0  ;;  %v8186_v41 = vpop.eup %8185 }
0x11a2   :  { %7368 = vmatprep.subr.bf16.mxu0 %v8363_v2  ;;  %v2663_v11 = vmul.f32 %v8186_v41, %v8180_v28  ;;  %v241_v28 = vpack.c.bf16 %v238_v27, %v237_v26 }
0x11a4   :  { %7341 = vmatmul.mubr.msk.f32.gmra.mrb[60].mxu0 %vm520_vm9, %v2661_v40  ;;  %7353 = vmatpush3.bf16.msra.mxu1 %v241_v28 }
0x11a5   :  { %7343 = vmatprep.mubr.msk.f32.mxu0 %vm8364_vm0, %v8363_v2  ;;  %7354 = vmatprep.subr.bf16.mxu1 %v8363_v2 }
0x11a8   :  { %7344 = vmatmul.mubr.msk.f32.gmra.mrb[62].mxu0 %vm520_vm9, %v2663_v11  ;;  %7355 = vmatpush3.bf16.msra.mxu1 %v242_v33 }
0x11a9   :  { %7384 = vmatprep.subr.bf16.mxu1 %v8363_v2 }
0x11c7   :  { %v2855_v53 = vpop.xlane.xlu0 %2854 }
0x11c8   :  { %v2866_v18 = vmul.f32 0.03125, %v2855_v53 }
0x11ca   :  { %v2871_v14 = vsub.f32 %v9128_v21, %v2866_v18 }
0x11cb   :  { %v2852_v47 = vpop.xlane.xlu1 %2851 }
0x11cc   :  { %v2865_v12 = vmul.f32 0.03125, %v2852_v47  ;;  %v2876_v24 = vmul.f32 %v2871_v14, %v2871_v14 }
0x11ce   :  { %v2870_v20 = vsub.f32 %v9132_v32, %v2865_v12  ;;  %v2883_v54 = vsel %vm217_vm4, %v2876_v24, 0.0 }
0x11d0   :  { %v2875_v7 = vmul.f32 %v2870_v20, %v2870_v20 }
0x11d2   :  { %v2880_v25 = vsel %vm217_vm4, %v2875_v7, 0.0 }
0x1273   :  { %v2749_v13 = vpop.f32.mrb[54].mxu0 }
0x1274   :  { %v7339_v30 = vpop.f32.mrb[55].mxu0 }
0x1277   :  { %v2754_v23 = vpop.f32.mrb[60].mxu0 }
0x1278   :  { %v2763_v9 = vpack.c.bf16 %v2754_v23, %v2749_v13  ;;  %v7342_v48 = vpop.f32.mrb[61].mxu0 }
0x127a   :  { %7348 = vmatprep.mubr.msk.bf16.mxu0 %vm424_vm7, %v2763_v9 }
0x127b   :  { %v2759_v0 = vpop.f32.mrb[62].mxu0 }
0x127c   :  { %v2764_v51 = vpack.c.bf16 %v2759_v0, %v2759_v0  ;;  %v7345_v46 = vpop.f32.mrb[63].mxu0  ;;  %v9199_v0 = vld [vmem:[%s10057_s12] ss:$0 sm:$0xff] }
0x127e   :  { %7349 = vmatmul.mubr.msk.bf16.vlgmr.msra.gmra.mrb[56].mxu0 %vm424_vm7, %v2764_v51 }
0x127f   :  { %7372 = vmatprep.mubr.msk.bf16.mxu0 %vm8364_vm0, %v8363_v2 }
0x1351   :  { %v7350_v52 = vpop.f32.mrb[56].mxu0 }
0x1352   :  { %v2805_v55 = vpop.f32.mrb[57].mxu0  ;;  %v2828_v58 = vrot.slane %v7350_v52, 7 }
0x1353   :  { %v2825_v49 = vrot.slane %v2805_v55, 7  ;;  %v7351_v56 = vpop.f32.mrb[58].mxu0 }
0x1354   :  { %v2808_v57 = vpop.f32.mrb[59].mxu0 }
0x1355   :  { %v2833_v45 = vadd.f32 %v8998_v38, %v2825_v49  ;;  %v2826_v59 = vrot.slane %v2808_v57, 7 }
0x1357   :  { %v2836_v50 = vadd.f32 %v8995_v36, %v2833_v45  ;;  %v2827_v60 = vsel %vm572_vm11, %v2825_v49, %v2826_v59  ;;  %v2829_v61 = vsel %vm572_vm11, %v2826_v59, %v2828_v58  ;;  %v9205_v49 = vld [vmem:[%s10058_s13] ss:$0 sm:$0xff] }
0x1358   :  { %v2834_v63 = vadd.f32 %v8356_v62, %v2827_v60  ;;  %v2835_v1 = vadd.f32 %v8357_v5, %v2829_v61 }
0x1359   :  { %2840 = vst.msk [vmem:[#allocation2 + $0x10] sm:$0xfe] %vm2839_vm13, %v2836_v50 }
0x135a   :  { %v2837_v16 = vadd.f32 %v8995_v36, %v2834_v63  ;;  %v2838_v38 = vadd.f32 %v8995_v36, %v2835_v1 }
0x135c   :  { %2841 = vst.msk [vmem:[#allocation2 + $0x18] sm:$0xff] %vm217_vm4, %v2837_v16  ;;  %v244_v16 = vld [vmem:[%s10059_s16] sm:$0xff] }
0x135d   :  { %2842 = vst.msk [vmem:[#allocation2 + $0x20] sm:$0x3] %vm270_vm5, %v2838_v38  ;;  %v245_v38 = vld [vmem:[%s10059_s16 + $0x8] sm:$0xff] }
0x135e   :  { %v248_v18 = vpack.c.bf16 %v245_v38, %v244_v16 }
0x1360   :  { %v9164_v22 = vld [vmem:[#allocation2 + $0x10] sm:$0xff]  ;;  %7369 = vmatpush3.bf16.msra.mxu0 %v248_v18 }
0x1361   :  { %v2856_v17 = vsel %vm217_vm4, %v9164_v22, 0.0  ;;  %7370 = vmatprep.subr.bf16.mxu0 %v8363_v2 }
0x1362   :  { %2857 = vadd.xlane.f32.xlu0 %v2856_v17  ;;  %v247_v17 = vld [vmem:[%s10059_s16 + $0x18] sm:$0xff] }
0x1363   :  { %v9168_v10 = vld [vmem:[#allocation2 + $0x18] sm:$0xff] }
0x1364   :  { %v2859_v36 = vsel %vm217_vm4, %v9168_v10, 0.0  ;;  %v9191_v13 = vld [vmem:[#allocation2 + $0x20] sm:$0x3] }
0x1365   :  { %2860 = vadd.xlane.f32.xlu1 %v2859_v36  ;;  %v2862_v9 = vsel %vm270_vm5, %v9191_v13, 0.0 }
0x1366   :  { %2881 = vadd.xlane.f32.xlu0 %v2880_v25 }
0x1369   :  { %2884 = vadd.xlane.f32.xlu1 %v2883_v54 }
0x13ef   :  { %v2858_v34 = vpop.xlane.xlu0 %2857 }
0x13f0   :  { %v2867_v35 = vmul.f32 0.03125, %v2858_v34 }
0x13f2   :  { %v2872_v42 = vsub.f32 %v9164_v22, %v2867_v35  ;;  %v2861_v6 = vpop.xlane.xlu1 %2860 }
0x13f3   :  { %v2868_v37 = vmul.f32 0.03125, %v2861_v6  ;;  %v2882_v44 = vpop.xlane.xlu0 %2881 }
0x13f4   :  { %v2895_v8 = vmul.f32 0.03125, %v2882_v44  ;;  %v2877_v15 = vmul.f32 %v2872_v42, %v2872_v42 }
0x13f5   :  { %v2873_v4 = vsub.f32 %v9168_v10, %v2868_v37 }
0x13f6   :  { %v2900_v39 = vadd.f32 1e-05, %v2895_v8  ;;  %v2885_v43 = vpop.xlane.xlu1 %2884  ;;  %v2886_v40 = vsel %vm217_vm4, %v2877_v15, 0.0 }
0x13f7   :  { %v2896_v41 = vmul.f32 0.03125, %v2885_v43  ;;  %2887 = vadd.xlane.f32.xlu0 %v2886_v40  ;;  %v2878_v11 = vmul.f32 %v2873_v4, %v2873_v4 }
0x13f8   :  { %8187 = vrsqrt.f32 %v2900_v39 }
0x13f9   :  { %v2901_v30 = vadd.f32 1e-05, %v2896_v41  ;;  %v2889_v23 = vsel %vm217_vm4, %v2878_v11, 0.0 }
0x13fa   :  { %2890 = vadd.xlane.f32.xlu1 %v2889_v23 }
0x13fb   :  { %8189 = vrsqrt.f32 %v2901_v30  ;;  %2863 = vadd.xlane.f32.xlu0 %v2862_v9 }
0x1402   :  { %v8188_v48 = vpop.eup %8187 }
0x1403   :  { %v2910_v51 = vmul.f32 %v8188_v48, %v2870_v20 }
0x1405   :  { %v8190_v46 = vpop.eup %8189  ;;  %v2921_v52 = vmul.f32 %v9199_v0, %v2910_v51 }
0x1406   :  { %v2911_v55 = vmul.f32 %v8190_v46, %v2871_v14  ;;  %v246_v14 = vld [vmem:[%s10059_s16 + $0x10] sm:$0xff] }
0x1407   :  { %v2932_v57 = vadd.f32 %v9205_v49, %v2921_v52  ;;  %v249_v36 = vpack.c.bf16 %v247_v17, %v246_v14 }
0x1408   :  { %v2922_v56 = vmul.f32 %v9199_v0, %v2911_v55 }
0x1409   :  { %7371 = vmatpush3.bf16.msra.mxu0 %v249_v36 }
0x140a   :  { %v2933_v58 = vadd.f32 %v9205_v49, %v2922_v56  ;;  %7808 = vmatprep.subr.bf16.mxu0 %v8365_v3 }
0x140c   :  { %v2937_v45 = vpack.c.bf16 %v2933_v58, %v2932_v57 }
0x140e   :  { %7357 = vmatmul.mubr.msk.bf16.vlgmr.msra.gmra.mrb[72].mxu1 %vm217_vm4, %v2937_v45 }
0x140f   :  { %7360 = vmatprep.mubr.msk.bf16.mxu1 %vm8364_vm0, %v8363_v2 }
0x1484   :  { %v2888_v59 = vpop.xlane.xlu0 %2887 }
0x1485   :  { %v2897_v47 = vmul.f32 0.03125, %v2888_v59 }
0x1487   :  { %v2902_v50 = vadd.f32 1e-05, %v2897_v47  ;;  %v2891_v60 = vpop.xlane.xlu1 %2890 }
0x1488   :  { %v2898_v61 = vmul.f32 0.03125, %v2891_v60  ;;  %v2864_v62 = vpop.xlane.xlu0 %2863 }
0x1489   :  { %8191 = vrsqrt.f32 %v2902_v50  ;;  %v2869_v63 = vmul.f32 0.03125, %v2864_v62 }
0x148a   :  { %v2903_v5 = vadd.f32 1e-05, %v2898_v61 }
0x148b   :  { %v9214_v1 = vsub.f32 %v9191_v13, %v2869_v63 }
0x148c   :  { %8193 = vrsqrt.f32 %v2903_v5 }
0x148d   :  { %v2879_v53 = vmul.f32 %v9214_v1, %v9214_v1 }
0x148f   :  { %v2892_v12 = vsel %vm270_vm5, %v2879_v53, 0.0 }
0x1490   :  { %2893 = vadd.xlane.f32.xlu1 %v2892_v12 }
0x1493   :  { %v8192_v20 = vpop.eup %8191 }
0x1494   :  { %v2912_v7 = vmul.f32 %v8192_v20, %v2872_v42 }
0x1496   :  { %v8194_v24 = vpop.eup %8193  ;;  %v2923_v54 = vmul.f32 %v9199_v0, %v2912_v7 }
0x1497   :  { %v2913_v25 = vmul.f32 %v8194_v24, %v2873_v4 }
0x1498   :  { %v2934_v27 = vadd.f32 %v9205_v49, %v2923_v54 }
0x1499   :  { %v2924_v26 = vmul.f32 %v9199_v0, %v2913_v25 }
0x149b   :  { %v2935_v28 = vadd.f32 %v9205_v49, %v2924_v26 }
0x149d   :  { %v2938_v29 = vpack.c.bf16 %v2935_v28, %v2934_v27 }
0x149f   :  { %7361 = vmatmul.mubr.msk.bf16.gmra.mrb[76].mxu1 %vm217_vm4, %v2938_v29 }
0x14a0   :  { %7364 = vmatprep.mubr.msk.bf16.mxu1 %vm8364_vm0, %v8363_v2 }
0x14e1   :  { %v2989_v33 = vpop.f32.mrb[72].mxu1 }
0x14e2   :  { %v2990_v34 = vadd.f32 %v9243_v31, %v2989_v33  ;;  %v7358_v35 = vpop.f32.mrb[73].mxu1 }
0x14e3   :  { %v2992_v42 = vpop.f32.mrb[74].mxu1 }
0x14e4   :  { %v3016_v6 = vmul.f32 0.70710677, %v2990_v34  ;;  %v2993_v37 = vadd.f32 %v9243_v31, %v2992_v42  ;;  %v7359_v44 = vpop.f32.mrb[75].mxu1  ;;  %v3011_v29 = vmul.f32 0.5, %v2990_v34 }
0x14e6   :  { %v3021_v8 = vand.u32 2147483647, %v3016_v6  ;;  %v3017_v15 = vmul.f32 0.70710677, %v2993_v37  ;;  %vm3121_vm14 = vcmp.lt.f32.partialorder %v3016_v6, 0.0  ;;  %v3012_v33 = vmul.f32 0.5, %v2993_v37 }
0x14e8   :  { %v3026_v4 = vmul.f32 0.3275911, %v3021_v8  ;;  %v3022_v39 = vand.u32 2147483647, %v3017_v15  ;;  %v3091_v11 = vsub.f32 0.0, %v3021_v8  ;;  %vm3122_vm15 = vcmp.lt.f32.partialorder %v3017_v15, 0.0 }
0x14ea   :  { %v3031_v43 = vadd.f32 1.0, %v3026_v4  ;;  %v3027_v40 = vmul.f32 0.3275911, %v3022_v39  ;;  %v3092_v30 = vsub.f32 0.0, %v3022_v39  ;;  %v3096_v9 = vmul.f32 %v3091_v11, %v3021_v8 }
0x14ec   :  { %8195 = vrcp.f32 %v3031_v43  ;;  %v3032_v41 = vadd.f32 1.0, %v3027_v40  ;;  %v3097_v52 = vmul.f32 %v3092_v30, %v3022_v39  ;;  %v3101_v55 = vmul.f32 1.442695, %v3096_v9 }
0x14ee   :  { %8197 = vrcp.f32 %v3032_v41  ;;  %v3103_v59 = vmul.f32 1.442695, %v3097_v52 }
0x14ef   :  { %8199 = vpow2.f32 %v3101_v55 }
0x14f0   :  { %8201 = vpow2.f32 %v3103_v59 }
0x14f6   :  { %v8196_v23 = vpop.eup %8195 }
0x14f7   :  { %v3046_v48 = vmul.f32 1.0614054, %v8196_v23 }
0x14f8   :  { %v8198_v51 = vpop.eup %8197 }
0x14f9   :  { %v3051_v46 = vadd.f32 -1.4531521, %v3046_v48  ;;  %v3047_v56 = vmul.f32 1.0614054, %v8198_v51  ;;  %v8200_v38 = vpop.eup %8199 }
0x14fa   :  { %v8202_v17 = vpop.eup %8201 }
0x14fb   :  { %v3056_v57 = vmul.f32 %v8196_v23, %v3051_v46  ;;  %v3052_v58 = vadd.f32 -1.4531521, %v3047_v56 }
0x14fd   :  { %v3061_v45 = vadd.f32 1.4214138, %v3056_v57  ;;  %v3057_v47 = vmul.f32 %v8198_v51, %v3052_v58 }
0x14ff   :  { %v3066_v50 = vmul.f32 %v8196_v23, %v3061_v45  ;;  %v3062_v60 = vadd.f32 1.4214138, %v3057_v47 }
0x1501   :  { %v3071_v61 = vadd.f32 -0.28449672, %v3066_v50  ;;  %v3067_v62 = vmul.f32 %v8198_v51, %v3062_v60 }
0x1503   :  { %v3076_v63 = vmul.f32 %v8196_v23, %v3071_v61  ;;  %v3072_v5 = vadd.f32 -0.28449672, %v3067_v62 }
0x1505   :  { %v3081_v53 = vadd.f32 0.2548296, %v3076_v63  ;;  %v3077_v12 = vmul.f32 %v8198_v51, %v3072_v5 }
0x1507   :  { %v3086_v16 = vmul.f32 %v8196_v23, %v3081_v53  ;;  %v3082_v18 = vadd.f32 0.2548296, %v3077_v12 }
0x1509   :  { %v3111_v20 = vmul.f32 %v8200_v38, %v3086_v16  ;;  %v3087_v14 = vmul.f32 %v8198_v51, %v3082_v18 }
0x150b   :  { %v3116_v7 = vsub.f32 1.0, %v3111_v20  ;;  %v3112_v36 = vmul.f32 %v8202_v17, %v3087_v14 }
0x150d   :  { %v3126_v24 = vsub.f32 0.0, %v3116_v7  ;;  %v3117_v25 = vsub.f32 1.0, %v3112_v36 }
0x150f   :  { %v3131_v54 = vsel %vm3121_vm14, %v3126_v24, %v3116_v7  ;;  %v3127_v26 = vsub.f32 0.0, %v3117_v25 }
0x1510   :  { %v3136_v27 = vadd.f32 1.0, %v3131_v54 }
0x1511   :  { %v3132_v28 = vsel %vm3122_vm15, %v3127_v26, %v3117_v25 }
0x1512   :  { %v3137_v35 = vadd.f32 1.0, %v3132_v28  ;;  %v3141_v42 = vmul.f32 %v3136_v27, %v3011_v29 }
0x1514   :  { %v3142_v44 = vmul.f32 %v3137_v35, %v3012_v33 }
0x1516   :  { %v3146_v8 = vpack.c.bf16 %v3142_v44, %v3141_v42 }
0x1518   :  { %7373 = vmatmul.mubr.msk.bf16.vlgmr.msra.gmra.mrb[64].mxu0 %vm217_vm4, %v3146_v8 }
0x1519   :  { %7376 = vmatprep.mubr.msk.bf16.mxu0 %vm8364_vm0, %v8363_v2 }
0x151d   :  { %v2894_v4 = vpop.xlane.xlu1 %2893 }
0x151e   :  { %v2899_v39 = vmul.f32 0.03125, %v2894_v4 }
0x1520   :  { %v2904_v6 = vadd.f32 1e-05, %v2899_v39 }
0x1522   :  { %8203 = vrsqrt.f32 %v2904_v6 }
0x152c   :  { %v8204_v43 = vpop.eup %8203 }
0x152d   :  { %v2914_v40 = vmul.f32 %v8204_v43, %v9214_v1 }
0x152f   :  { %v2925_v15 = vmul.f32 %v9199_v0, %v2914_v40 }
0x1531   :  { %v2936_v34 = vadd.f32 %v9205_v49, %v2925_v15 }
0x1533   :  { %v2939_v37 = vpack.c.bf16 %v2936_v34, %v2936_v34 }
0x1535   :  { %7365 = vmatmul.mubr.msk.bf16.gmra.mrb[80].mxu1 %vm217_vm4, %v2939_v37 }
0x1536   :  { %7388 = vmatprep.mubr.msk.bf16.mxu1 %vm8364_vm0, %v8363_v2 }
0x1572   :  { %v2997_v41 = vpop.f32.mrb[76].mxu1 }
0x1573   :  { %v2998_v11 = vadd.f32 %v9243_v31, %v2997_v41  ;;  %v7362_v30 = vpop.f32.mrb[77].mxu1 }
0x1574   :  { %v3000_v23 = vpop.f32.mrb[78].mxu1 }
0x1575   :  { %v3018_v9 = vmul.f32 0.70710677, %v2998_v11  ;;  %v3001_v48 = vadd.f32 %v9243_v31, %v3000_v23  ;;  %v7363_v51 = vpop.f32.mrb[79].mxu1  ;;  %v3013_v40 = vmul.f32 0.5, %v2998_v11  ;;  %v9264_v23 = vld [vmem:[%s10061_s17] ss:$0 sm:$0xff] }
0x1577   :  { %v3023_v1 = vand.u32 2147483647, %v3018_v9  ;;  %v3019_v46 = vmul.f32 0.70710677, %v3001_v48  ;;  %vm3123_vm1 = vcmp.lt.f32.partialorder %v3018_v9, 0.0  ;;  %v3014_v15 = vmul.f32 0.5, %v3001_v48 }
0x1579   :  { %v3028_v0 = vmul.f32 0.3275911, %v3023_v1  ;;  %v3024_v52 = vand.u32 2147483647, %v3019_v46  ;;  %v3093_v57 = vsub.f32 0.0, %v3023_v1  ;;  %vm3124_vm3 = vcmp.lt.f32.partialorder %v3019_v46, 0.0 }
0x157b   :  { %v3033_v49 = vadd.f32 1.0, %v3028_v0  ;;  %v3029_v55 = vmul.f32 0.3275911, %v3024_v52  ;;  %v3094_v58 = vsub.f32 0.0, %v3024_v52  ;;  %v3098_v59 = vmul.f32 %v3093_v57, %v3023_v1 }
0x157d   :  { %8205 = vrcp.f32 %v3033_v49  ;;  %v3034_v56 = vadd.f32 1.0, %v3029_v55  ;;  %v3099_v61 = vmul.f32 %v3094_v58, %v3024_v52  ;;  %v3105_v62 = vmul.f32 1.442695, %v3098_v59 }
0x157f   :  { %8207 = vrcp.f32 %v3034_v56  ;;  %v3107_v16 = vmul.f32 1.442695, %v3099_v61 }
0x1580   :  { %8209 = vpow2.f32 %v3105_v62 }
0x1581   :  { %8211 = vpow2.f32 %v3107_v16 }
0x1587   :  { %v8206_v45 = vpop.eup %8205 }
0x1588   :  { %v3048_v47 = vmul.f32 1.0614054, %v8206_v45 }
0x1589   :  { %v8208_v50 = vpop.eup %8207 }
0x158a   :  { %v3053_v60 = vadd.f32 -1.4531521, %v3048_v47  ;;  %v3049_v63 = vmul.f32 1.0614054, %v8208_v50  ;;  %v8210_v26 = vpop.eup %8209 }
0x158b   :  { %v8212_v33 = vpop.eup %8211 }
0x158c   :  { %v3058_v5 = vmul.f32 %v8206_v45, %v3053_v60  ;;  %v3054_v53 = vadd.f32 -1.4531521, %v3049_v63 }
0x158e   :  { %v3063_v12 = vadd.f32 1.4214138, %v3058_v5  ;;  %v3059_v38 = vmul.f32 %v8208_v50, %v3054_v53 }
0x1590   :  { %v3068_v18 = vmul.f32 %v8206_v45, %v3063_v12  ;;  %v3064_v20 = vadd.f32 1.4214138, %v3059_v38 }
0x1592   :  { %v3073_v14 = vadd.f32 -0.28449672, %v3068_v18  ;;  %v3069_v17 = vmul.f32 %v8208_v50, %v3064_v20 }
0x1594   :  { %v3078_v7 = vmul.f32 %v8206_v45, %v3073_v14  ;;  %v3074_v36 = vadd.f32 -0.28449672, %v3069_v17 }
0x1596   :  { %v3083_v24 = vadd.f32 0.2548296, %v3078_v7  ;;  %v3079_v25 = vmul.f32 %v8208_v50, %v3074_v36 }
0x1598   :  { %v3088_v54 = vmul.f32 %v8206_v45, %v3083_v24  ;;  %v3084_v27 = vadd.f32 0.2548296, %v3079_v25 }
0x159a   :  { %v3113_v28 = vmul.f32 %v8210_v26, %v3088_v54  ;;  %v3089_v29 = vmul.f32 %v8208_v50, %v3084_v27 }
0x159c   :  { %v3118_v35 = vsub.f32 1.0, %v3113_v28  ;;  %v3114_v42 = vmul.f32 %v8212_v33, %v3089_v29 }
0x159e   :  { %v3128_v44 = vsub.f32 0.0, %v3118_v35  ;;  %v3119_v8 = vsub.f32 1.0, %v3114_v42 }
0x15a0   :  { %v3133_v4 = vsel %vm3123_vm1, %v3128_v44, %v3118_v35  ;;  %v3129_v39 = vsub.f32 0.0, %v3119_v8 }
0x15a1   :  { %v3138_v6 = vadd.f32 1.0, %v3133_v4 }
0x15a2   :  { %v3134_v43 = vsel %vm3124_vm3, %v3129_v39, %v3119_v8 }
0x15a3   :  { %v3139_v34 = vadd.f32 1.0, %v3134_v43  ;;  %v3143_v37 = vmul.f32 %v3138_v6, %v3013_v40 }
0x15a5   :  { %v3144_v41 = vmul.f32 %v3139_v34, %v3014_v15 }
0x15a7   :  { %v3147_v30 = vpack.c.bf16 %v3144_v41, %v3143_v37 }
0x15a9   :  { %7377 = vmatmul.mubr.msk.bf16.gmra.mrb[68].mxu0 %vm217_vm4, %v3147_v30 }
0x15aa   :  { %7380 = vmatprep.mubr.msk.bf16.mxu0 %vm8364_vm0, %v8363_v2 }
0x15eb   :  { %v3198_v9 = vpop.f32.mrb[64].mxu0 }
0x15ec   :  { %v3199_v51 = vadd.f32 %v9264_v23, %v3198_v9  ;;  %v7374_v1 = vpop.f32.mrb[65].mxu0 }
0x15ed   :  { %v3201_v11 = vpop.f32.mrb[66].mxu0 }
0x15ee   :  { %v3220_v48 = vadd.f32 %v3199_v51, %v9132_v32  ;;  %v3202_v46 = vadd.f32 %v9264_v23, %v3201_v11  ;;  %v7375_v0 = vpop.f32.mrb[67].mxu0 }
0x15ef   :  { %v6597_v0 = vld [vmem:[%s10051_s9 + $0x20] sm:$0xff] }
0x15f0   :  { %3225 = vst.msk [vmem:[#allocation2] sm:$0xff] %vm217_vm4, %v3220_v48  ;;  %v3221_v52 = vadd.f32 %v3202_v46, %v9128_v21 }
0x15f2   :  { %3226 = vst.msk [vmem:[#allocation2 + $0x8] sm:$0xff] %vm217_vm4, %v3221_v52  ;;  %v6598_v52 = vld [vmem:[%s10051_s9 + $0x28] sm:$0xff] }
0x15f7   :  { %v3262_v49 = vld [vmem:[#allocation2] sm:$0xff] }
0x15f8   :  { %v3271_v55 = vsel %vm217_vm4, %v3262_v49, 0.0 }
0x15f9   :  { %3272 = vadd.xlane.f32.xlu0 %v3271_v55  ;;  %v3263_v56 = vld [vmem:[#allocation2 + $0x8] sm:$0xff]  ;;  %v6599_v55 = vld [vmem:[%s10051_s9 + $0x30] sm:$0xff] }
0x15fa   :  { %v3274_v57 = vsel %vm217_vm4, %v3263_v56, 0.0 }
0x15fb   :  { %3275 = vadd.xlane.f32.xlu1 %v3274_v57 }
0x1608   :  { %v3005_v58 = vpop.f32.mrb[80].mxu1 }
0x1609   :  { %v3006_v32 = vadd.f32 %v9243_v31, %v3005_v58  ;;  %v7366_v45 = vpop.f32.mrb[81].mxu1 }
0x160a   :  { %v3008_v59 = vpop.f32.mrb[82].mxu1 }
0x160b   :  { %v3020_v47 = vmul.f32 0.70710677, %v3006_v32  ;;  %v7367_v50 = vpop.f32.mrb[83].mxu1  ;;  %v3015_v27 = vmul.f32 0.5, %v3006_v32 }
0x160d   :  { %v3025_v60 = vand.u32 2147483647, %v3020_v47  ;;  %vm3125_vm14 = vcmp.lt.f32.partialorder %v3020_v47, 0.0 }
0x160f   :  { %v3030_v61 = vmul.f32 0.3275911, %v3025_v60  ;;  %v3095_v62 = vsub.f32 0.0, %v3025_v60 }
0x1611   :  { %v3035_v21 = vadd.f32 1.0, %v3030_v61  ;;  %v3100_v5 = vmul.f32 %v3095_v62, %v3025_v60 }
0x1613   :  { %8213 = vrcp.f32 %v3035_v21  ;;  %v3109_v16 = vmul.f32 1.442695, %v3100_v5 }
0x1615   :  { %8215 = vpow2.f32 %v3109_v16 }
0x161d   :  { %v8214_v63 = vpop.eup %8213 }
0x161e   :  { %v3050_v53 = vmul.f32 1.0614054, %v8214_v63 }
0x161f   :  { %v8216_v36 = vpop.eup %8215 }
0x1620   :  { %v3055_v12 = vadd.f32 -1.4531521, %v3050_v53 }
0x1622   :  { %v3060_v38 = vmul.f32 %v8214_v63, %v3055_v12 }
0x1624   :  { %v3065_v18 = vadd.f32 1.4214138, %v3060_v38 }
0x1626   :  { %v3070_v20 = vmul.f32 %v8214_v63, %v3065_v18 }
0x1628   :  { %v3075_v14 = vadd.f32 -0.28449672, %v3070_v20 }
0x162a   :  { %v3080_v31 = vmul.f32 %v8214_v63, %v3075_v14 }
0x162c   :  { %v3085_v17 = vadd.f32 0.2548296, %v3080_v31 }
0x162e   :  { %v3090_v7 = vmul.f32 %v8214_v63, %v3085_v17 }
0x1630   :  { %v3115_v24 = vmul.f32 %v8216_v36, %v3090_v7 }
0x1632   :  { %v3120_v25 = vsub.f32 1.0, %v3115_v24  ;;  %v6618_v24 = vld [vmem:[%s10052_s7 + $0x1] ss:$0 sm:$0xff] }
0x1634   :  { %v3130_v54 = vsub.f32 0.0, %v3120_v25 }
0x1636   :  { %v3135_v26 = vsel %vm3125_vm14, %v3130_v54, %v3120_v25 }
0x1637   :  { %v3140_v28 = vadd.f32 1.0, %v3135_v26 }
0x1639   :  { %v3145_v29 = vmul.f32 %v3140_v28, %v3015_v27  ;;  %v6619_v28 = vld [vmem:[%s10053_s8 + $0x1] ss:$0 sm:$0xff] }
0x163b   :  { %v3148_v33 = vpack.c.bf16 %v3145_v29, %v3145_v29 }
0x163d   :  { %7381 = vmatmul.mubr.msk.bf16.gmra.mrb[72].mxu0 %vm217_vm4, %v3148_v33 }
0x163e   :  { %7406 = vmatprep.mubr.msk.f32.mxu0 %vm8364_vm0, %v8363_v2 }
0x167c   :  { %v3206_v35 = vpop.f32.mrb[68].mxu0 }
0x167d   :  { %v3207_v42 = vadd.f32 %v9264_v23, %v3206_v35  ;;  %v7378_v44 = vpop.f32.mrb[69].mxu0 }
0x167e   :  { %v3209_v8 = vpop.f32.mrb[70].mxu0 }
0x167f   :  { %v3222_v4 = vadd.f32 %v3207_v42, %v9164_v22  ;;  %v3210_v39 = vadd.f32 %v9264_v23, %v3209_v8  ;;  %v7379_v6 = vpop.f32.mrb[71].mxu0 }
0x1681   :  { %3227 = vst.msk [vmem:[#allocation2 + $0x10] sm:$0xff] %vm217_vm4, %v3222_v4  ;;  %v3223_v43 = vadd.f32 %v3210_v39, %v9168_v10 }
0x1683   :  { %3228 = vst.msk [vmem:[#allocation2 + $0x18] sm:$0xff] %vm217_vm4, %v3223_v43 }
0x1686   :  { %v3273_v40 = vpop.xlane.xlu0 %3272 }
0x1687   :  { %v3286_v15 = vmul.f32 0.03125, %v3273_v40 }
0x1688   :  { %v3276_v34 = vpop.xlane.xlu1 %3275  ;;  %v3264_v37 = vld [vmem:[#allocation2 + $0x10] sm:$0xff] }
0x1689   :  { %v3291_v41 = vsub.f32 %v3262_v49, %v3286_v15  ;;  %v3287_v30 = vmul.f32 0.03125, %v3276_v34  ;;  %v3277_v9 = vsel %vm217_vm4, %v3264_v37, 0.0  ;;  %v3235_v49 = vpack.c.bf16 %v6598_v52, %v6597_v0 }
0x168a   :  { %3278 = vadd.xlane.f32.xlu0 %v3277_v9  ;;  %v3265_v51 = vld [vmem:[#allocation2 + $0x18] sm:$0xff] }
0x168b   :  { %v3292_v22 = vsub.f32 %v3263_v56, %v3287_v30  ;;  %v3280_v1 = vsel %vm217_vm4, %v3265_v51, 0.0  ;;  %v3296_v11 = vmul.f32 %v3291_v41, %v3291_v41  ;;  %7385 = vmatpush3.bf16.msra.mxu1 %v3235_v49  ;;  %v6600_v56 = vld [vmem:[%s10051_s9 + $0x38] sm:$0xff] }
0x168c   :  { %3281 = vadd.xlane.f32.xlu1 %v3280_v1  ;;  %7386 = vmatprep.subr.bf16.mxu1 %v8363_v2  ;;  %v3236_v57 = vpack.c.bf16 %v6600_v56, %v6599_v55 }
0x168d   :  { %v3301_v48 = vsel %vm217_vm4, %v3296_v11, 0.0  ;;  %v3297_v10 = vmul.f32 %v3292_v22, %v3292_v22 }
0x168e   :  { %3302 = vadd.xlane.f32.xlu0 %v3301_v48 }
0x168f   :  { %v3304_v46 = vsel %vm217_vm4, %v3297_v10, 0.0  ;;  %7387 = vmatpush3.bf16.msra.mxu1 %v3236_v57 }
0x1690   :  { %3305 = vadd.xlane.f32.xlu1 %v3304_v46  ;;  %7815 = vmatprep.subr.bf16.mxu1 %v8365_v3 }
0x1710   :  { %v3214_v58 = vpop.f32.mrb[72].mxu0 }
0x1711   :  { %v3215_v32 = vadd.f32 %v9264_v23, %v3214_v58  ;;  %v7382_v45 = vpop.f32.mrb[73].mxu0 }
0x1712   :  { %v3217_v59 = vpop.f32.mrb[74].mxu0 }
0x1713   :  { %v3224_v47 = vadd.f32 %v3215_v32, %v9191_v13  ;;  %v7383_v50 = vpop.f32.mrb[75].mxu0 }
0x1715   :  { %3229 = vst.msk [vmem:[#allocation2 + $0x20] sm:$0x3] %vm270_vm5, %v3224_v47 }
0x1717   :  { %v3279_v60 = vpop.xlane.xlu0 %3278 }
0x1718   :  { %v3288_v61 = vmul.f32 0.03125, %v3279_v60 }
0x1719   :  { %v3282_v21 = vpop.xlane.xlu1 %3281 }
0x171a   :  { %v3293_v62 = vsub.f32 %v3264_v37, %v3288_v61  ;;  %v3289_v63 = vmul.f32 0.03125, %v3282_v21 }
0x171b   :  { %v3303_v5 = vpop.xlane.xlu0 %3302 }
0x171c   :  { %v3294_v53 = vsub.f32 %v3265_v51, %v3289_v63  ;;  %v3316_v12 = vmul.f32 0.03125, %v3303_v5  ;;  %v3298_v16 = vmul.f32 %v3293_v62, %v3293_v62  ;;  %v3266_v13 = vld [vmem:[#allocation2 + $0x20] sm:$0x3] }
0x171d   :  { %v3306_v38 = vpop.xlane.xlu1 %3305  ;;  %v3283_v7 = vsel %vm270_vm5, %v3266_v13, 0.0 }
0x171e   :  { %v3321_v18 = vadd.f32 1e-05, %v3316_v12  ;;  %v3317_v20 = vmul.f32 0.03125, %v3306_v38  ;;  %v3307_v23 = vsel %vm217_vm4, %v3298_v16, 0.0  ;;  %v3299_v14 = vmul.f32 %v3294_v53, %v3294_v53 }
0x171f   :  { %3308 = vadd.xlane.f32.xlu0 %v3307_v23 }
0x1720   :  { %8217 = vrsqrt.f32 %v3321_v18  ;;  %v3322_v31 = vadd.f32 1e-05, %v3317_v20  ;;  %v3310_v17 = vsel %vm217_vm4, %v3299_v14, 0.0 }
0x1721   :  { %3311 = vadd.xlane.f32.xlu1 %v3310_v17 }
0x1722   :  { %8219 = vrsqrt.f32 %v3322_v31 }
0x1723   :  { %3284 = vadd.xlane.f32.xlu0 %v3283_v7 }
0x172a   :  { %v8218_v36 = vpop.eup %8217 }
0x172b   :  { %v3331_v25 = vmul.f32 %v8218_v36, %v3291_v41 }
0x172c   :  { %v8220_v54 = vpop.eup %8219 }
0x172d   :  { %v3342_v26 = vmul.f32 %v6618_v24, %v3331_v25  ;;  %v3332_v27 = vmul.f32 %v8220_v54, %v3292_v22 }
0x172f   :  { %v3343_v29 = vmul.f32 %v6618_v24, %v3332_v27  ;;  %v3353_v33 = vadd.f32 %v6619_v28, %v3342_v26 }
0x1731   :  { %v3354_v35 = vadd.f32 %v6619_v28, %v3343_v29 }
0x1733   :  { %v3358_v42 = vpack.c.bf16 %v3354_v35, %v3353_v33 }
0x1735   :  { %7389 = vmatmul.mubr.msk.bf16.vlgmr.msra.gmra.mrb[84].mxu1 %vm217_vm4, %v3358_v42 }
0x1736   :  { %7392 = vmatprep.mubr.msk.bf16.mxu1 %vm8364_vm0, %v8363_v2 }
0x17ac   :  { %v3309_v44 = vpop.xlane.xlu0 %3308 }
0x17ad   :  { %v3318_v8 = vmul.f32 0.03125, %v3309_v44 }
0x17ae   :  { %v3312_v4 = vpop.xlane.xlu1 %3311 }
0x17af   :  { %v3323_v39 = vadd.f32 1e-05, %v3318_v8  ;;  %v3319_v6 = vmul.f32 0.03125, %v3312_v4 }
0x17b0   :  { %v3285_v43 = vpop.xlane.xlu0 %3284 }
0x17b1   :  { %8221 = vrsqrt.f32 %v3323_v39  ;;  %v3324_v40 = vadd.f32 1e-05, %v3319_v6  ;;  %v3290_v15 = vmul.f32 0.03125, %v3285_v43 }
0x17b3   :  { %8223 = vrsqrt.f32 %v3324_v40  ;;  %v3295_v34 = vsub.f32 %v3266_v13, %v3290_v15 }
0x17b5   :  { %v3300_v37 = vmul.f32 %v3295_v34, %v3295_v34 }
0x17b7   :  { %v3313_v41 = vsel %vm270_vm5, %v3300_v37, 0.0 }
0x17b8   :  { %3314 = vadd.xlane.f32.xlu1 %v3313_v41 }
0x17bb   :  { %v8222_v30 = vpop.eup %8221 }
0x17bc   :  { %v3333_v9 = vmul.f32 %v8222_v30, %v3293_v62 }
0x17bd   :  { %v8224_v51 = vpop.eup %8223 }
0x17be   :  { %v3334_v22 = vmul.f32 %v8224_v51, %v3294_v53  ;;  %v3344_v1 = vmul.f32 %v6618_v24, %v3333_v9 }
0x17c0   :  { %v3345_v11 = vmul.f32 %v6618_v24, %v3334_v22  ;;  %v3355_v48 = vadd.f32 %v6619_v28, %v3344_v1 }
0x17c2   :  { %v3356_v10 = vadd.f32 %v6619_v28, %v3345_v11 }
0x17c4   :  { %v3359_v46 = vpack.c.bf16 %v3356_v10, %v3355_v48 }
0x17c6   :  { %7393 = vmatmul.mubr.msk.bf16.gmra.mrb[88].mxu1 %vm217_vm4, %v3359_v46 }
0x17c7   :  { %7396 = vmatprep.mubr.msk.bf16.mxu1 %vm8364_vm0, %v8363_v2 }
0x1808   :  { %v9321_v0 = vpop.f32.mrb[84].mxu1 }
0x1809   :  { %v7390_v52 = vpop.f32.mrb[85].mxu1 }
0x180a   :  { %v9323_v49 = vpop.f32.mrb[86].mxu1 }
0x180b   :  { %v7391_v55 = vpop.f32.mrb[87].mxu1  ;;  %v9327_v56 = vpack.i.bf16 %v9323_v49, %v9321_v0 }
0x180d   :  { %8000 = vrot.lane.b32.xlu0 %v9327_v56, %s8366_s30 }
0x1811   :  { %3665 = vrot.lane.b32.xlu0 %v9321_v0, %s8367_s3 }
0x1845   :  { %v3315_v57 = vpop.xlane.xlu1 %3314 }
0x1846   :  { %v3320_v58 = vmul.f32 0.03125, %v3315_v57 }
0x1848   :  { %v3325_v32 = vadd.f32 1e-05, %v3320_v58 }
0x184a   :  { %8225 = vrsqrt.f32 %v3325_v32 }
0x1854   :  { %v8226_v45 = vpop.eup %8225 }
0x1855   :  { %v3335_v59 = vmul.f32 %v8226_v45, %v3295_v34 }
0x1857   :  { %v3346_v47 = vmul.f32 %v6618_v24, %v3335_v59 }
0x1859   :  { %v3357_v50 = vadd.f32 %v6619_v28, %v3346_v47 }
0x185b   :  { %v3360_v60 = vpack.c.bf16 %v3357_v50, %v3357_v50 }
0x185d   :  { %7397 = vmatmul.mubr.msk.bf16.gmra.mrb[92].mxu1 %vm217_vm4, %v3360_v60 }
0x185e   :  { %7436 = vmatprep.mubr.msk.f32.mxu1 %vm8364_vm0, %v8363_v2 }
0x187f   :  { %v8001_v61 = vpop.permute.xlu0 %8000 }
0x1880   :  { %v8003_v21 = vunpack.i.h.bf16 %v8001_v61  ;;  %v8002_v62 = vunpack.i.l.bf16 %v8001_v61 }
0x1882   :  { %v7809_v63 = vpack.c.bf16 %v8003_v21, %v8002_v62 }
0x1883   :  { %v3666_v36 = vpop.permute.xlu0 %3665 }
0x1884   :  { %7811 = vmatpush3.bf16.xpose.msk.msra.mxu0 %vm8654_vm8, %v7809_v63 }
0x1885   :  { %7404 = vmatprep.subr.mxu0 %v8363_v2 }
0x1899   :  { %v9339_v5 = vpop.f32.mrb[88].mxu1 }
0x189a   :  { %3669 = vrot.lane.b32.xlu0 %v9339_v5, %s8367_s3  ;;  %3433 = vrot.lane.b32.xlu1 %v9339_v5, %s8366_s30  ;;  %v7394_v53 = vpop.f32.mrb[89].mxu1  ;;  %v4642_v16 = vrot.slane %v9339_v5, 1 }
0x189b   :  { %v9345_v12 = vpop.f32.mrb[90].mxu1 }
0x189c   :  { %v4643_v38 = vrot.slane %v9345_v12, 1  ;;  %v7395_v18 = vpop.f32.mrb[91].mxu1 }
0x189e   :  { %v9352_v20 = vsel %vm1636_vm6, %v4642_v16, %v4643_v38  ;;  %8005 = vrot.lane.b32.xlu1 %v9327_v56, %s8368_s2 }
0x18a2   :  { %3675 = vrot.lane.b32.xlu1 %v9339_v5, %s8368_s2 }
0x18a6   :  { %3667 = vrot.lane.b32.xlu1 %v9323_v49, %s8367_s3 }
0x190c   :  { %v3434_v23 = vpop.permute.xlu1 %3433  ;;  %v3670_v25 = vpop.permute.xlu0 %3669 }
0x190d   :  { %7405 = vmatpush3.xpose.msk.msra.mxu0 %vm424_vm7, %v3434_v23 }
0x190e   :  { %7812 = vmatprep.subr.bf16.mxu0 %v8365_v3 }
0x1910   :  { %7407 = vmatmul.mubr.msk.f32.vlgmr.msra.gmra.mrb[76].mxu0 %vm424_vm7, %v9321_v0  ;;  %v8006_v14 = vpop.permute.xlu1 %8005 }
0x1911   :  { %v8008_v13 = vunpack.i.h.bf16 %v8006_v14  ;;  %v8007_v31 = vunpack.i.l.bf16 %v8006_v14  ;;  %7409 = vmatprep.mubr.msk.f32.mxu0 %vm8364_vm0, %v8363_v2 }
0x1913   :  { %v7816_v17 = vpack.c.bf16 %v8008_v13, %v8007_v31 }
0x1914   :  { %7410 = vmatmul.mubr.msk.f32.gmra.mrb[78].mxu0 %vm424_vm7, %v9323_v49  ;;  %v3676_v7 = vpop.permute.xlu1 %3675 }
0x1915   :  { %7818 = vmatpush3.bf16.xpose.msk.msra.mxu1 %vm8654_vm8, %v7816_v17  ;;  %7412 = vmatprep.mubr.msk.f32.mxu0 %vm8364_vm0, %v8363_v2 }
0x1916   :  { %7434 = vmatprep.subr.mxu1 %v8363_v2 }
0x1918   :  { %7413 = vmatmul.mubr.msk.f32.gmra.mrb[80].mxu0 %vm424_vm7, %v9339_v5  ;;  %v3668_v24 = vpop.permute.xlu1 %3667 }
0x1919   :  { %7421 = vmatprep.mubr.msk.f32.mxu0 %vm8364_vm0, %v8363_v2 }
0x191d   :  { %7435 = vmatpush3.xpose.msk.msra.mxu1 %vm424_vm7, %v3676_v7 }
0x1920   :  { %7437 = vmatmul.mubr.msk.f32.vlgmr.msra.gmra.mrb[96].mxu1 %vm424_vm7, %v3666_v36 }
0x1921   :  { %7439 = vmatprep.mubr.msk.f32.mxu1 %vm8364_vm0, %v8363_v2 }
0x1924   :  { %7440 = vmatmul.mubr.msk.f32.gmra.mrb[98].mxu1 %vm424_vm7, %v3668_v24 }
0x1925   :  { %7442 = vmatprep.mubr.msk.f32.mxu1 %vm8364_vm0, %v8363_v2 }
0x1928   :  { %7443 = vmatmul.mubr.msk.f32.gmra.mrb[100].mxu1 %vm424_vm7, %v3670_v25 }
0x1930   :  { %v9385_v54 = vpop.f32.mrb[92].mxu1 }
0x1931   :  { %v7398_v26 = vpop.f32.mrb[93].mxu1 }
0x1932   :  { %v3423_v27 = vpop.f32.mrb[94].mxu1 }
0x1933   :  { %v7399_v28 = vpop.f32.mrb[95].mxu1 }
0x19e3   :  { %v3513_v29 = vpop.f32.mrb[76].mxu0 }
0x19e4   :  { %v3527_v33 = vmul.f32 0.35355338, %v3513_v29  ;;  %v7408_v35 = vpop.f32.mrb[77].mxu0 }
0x19e6   :  { %v3530_v42 = vsel %vm520_vm9, %v3527_v33, -inf }
0x19e7   :  { %3531 = vmax.xlane.f32.xlu1 %v3530_v42  ;;  %v3518_v44 = vpop.f32.mrb[78].mxu0 }
0x19e8   :  { %v3528_v8 = vmul.f32 0.35355338, %v3518_v44  ;;  %v7411_v4 = vpop.f32.mrb[79].mxu0 }
0x19ea   :  { %v3533_v39 = vsel %vm520_vm9, %v3528_v8, -inf }
0x19eb   :  { %3534 = vmax.xlane.f32.xlu0 %v3533_v39  ;;  %v3523_v6 = vpop.f32.mrb[80].mxu0 }
0x19ec   :  { %v3529_v43 = vmul.f32 0.35355338, %v3523_v6  ;;  %v7414_v40 = vpop.f32.mrb[81].mxu0 }
0x19ee   :  { %v3536_v15 = vsel %vm527_vm10, %v3529_v43, -inf }
0x19ef   :  { %3537 = vmax.xlane.f32.xlu0 %v3536_v15 }
0x19f3   :  { %v3755_v34 = vpop.f32.mrb[96].mxu1 }
0x19f4   :  { %v3769_v37 = vmul.f32 0.35355338, %v3755_v34  ;;  %v7438_v41 = vpop.f32.mrb[97].mxu1 }
0x19f6   :  { %v3772_v30 = vsel %vm520_vm9, %v3769_v37, -inf }
0x19f7   :  { %3773 = vmax.xlane.f32.xlu0 %v3772_v30  ;;  %v3760_v9 = vpop.f32.mrb[98].mxu1 }
0x19f8   :  { %v3770_v51 = vmul.f32 0.35355338, %v3760_v9  ;;  %v7441_v22 = vpop.f32.mrb[99].mxu1 }
0x19fa   :  { %v3775_v1 = vsel %vm520_vm9, %v3770_v51, -inf }
0x19fb   :  { %3776 = vmax.xlane.f32.xlu1 %v3775_v1  ;;  %v3765_v11 = vpop.f32.mrb[100].mxu1 }
0x19fc   :  { %v3771_v48 = vmul.f32 0.35355338, %v3765_v11  ;;  %v7444_v10 = vpop.f32.mrb[101].mxu1 }
0x19fe   :  { %v3778_v46 = vsel %vm527_vm10, %v3771_v48, -inf }
0x19ff   :  { %3779 = vmax.xlane.f32.xlu0 %v3778_v46 }
0x1a74   :  { %v3532_v52 = vpop.xlane.xlu1 %3531 }
0x1a75   :  { %v3539_v55 = vsub.f32 %v3527_v33, %v3532_v52 }
0x1a77   :  { %v3542_v57 = vmul.f32 1.442695, %v3539_v55 }
0x1a78   :  { %v3535_v58 = vpop.xlane.xlu0 %3534 }
0x1a79   :  { %8227 = vpow2.f32 %v3542_v57  ;;  %v3540_v59 = vsub.f32 %v3528_v8, %v3535_v58 }
0x1a7b   :  { %v3544_v61 = vmul.f32 1.442695, %v3540_v59 }
0x1a7c   :  { %v3538_v32 = vpop.xlane.xlu0 %3537 }
0x1a7d   :  { %v3541_v14 = vsub.f32 %v3529_v43, %v3538_v32 }
0x1a7f   :  { %v3546_v17 = vmul.f32 1.442695, %v3541_v14 }
0x1a83   :  { %v8228_v45 = vpop.eup %8227 }
0x1a84   :  { %v3774_v47 = vpop.xlane.xlu0 %3773  ;;  %v3548_v50 = vsel %vm520_vm9, %v8228_v45, 0.0 }
0x1a85   :  { %v3781_v60 = vsub.f32 %v3769_v37, %v3774_v47  ;;  %3549 = vadd.xlane.f32.xlu1 %v3548_v50  ;;  %v6602_v50 = vld [vmem:[%s10054_s10 + $0x28] sm:$0xff] }
0x1a87   :  { %v3784_v21 = vmul.f32 1.442695, %v3781_v60  ;;  %v9458_v60 = vpack.c.bf16 %v6602_v50, %v6602_v50 }
0x1a88   :  { %v3777_v18 = vpop.xlane.xlu1 %3776 }
0x1a89   :  { %8229 = vpow2.f32 %v3784_v21  ;;  %v3782_v23 = vsub.f32 %v3770_v51, %v3777_v18  ;;  %7896 = vmatprep.subr.msk.bf16.mxu1 %vm906_vm12, %v9458_v60 }
0x1a8a   :  { %8231 = vpow2.f32 %v3544_v61  ;;  %v9464_v61 = vsel %vm906_vm12, %v9458_v60, 0 }
0x1a8b   :  { %v3786_v13 = vmul.f32 1.442695, %v3782_v23  ;;  %7461 = vmatpush3.bf16.msra.mxu1 %v9464_v61 }
0x1a8c   :  { %v3780_v31 = vpop.xlane.xlu0 %3779  ;;  %7822 = vmatprep.subr.bf16.mxu1 %v8365_v3 }
0x1a8d   :  { %8233 = vpow2.f32 %v3786_v13  ;;  %v3783_v7 = vsub.f32 %v3771_v48, %v3780_v31 }
0x1a8e   :  { %8235 = vpow2.f32 %v3546_v17 }
0x1a8f   :  { %v3788_v36 = vmul.f32 1.442695, %v3783_v7 }
0x1a91   :  { %8237 = vpow2.f32 %v3788_v36 }
0x1a93   :  { %v9394_v62 = vpop.eup %8229 }
0x1a94   :  { %v3790_v63 = vsel %vm520_vm9, %v9394_v62, 0.0  ;;  %v8232_v53 = vpop.eup %8231 }
0x1a95   :  { %3791 = vadd.xlane.f32.xlu0 %v3790_v63  ;;  %v3551_v16 = vsel %vm520_vm9, %v8232_v53, 0.0 }
0x1a96   :  { %3567 = vrot.lane.b32.xlu1 %v9339_v5, %s8369_s23 }
0x1a97   :  { %v8234_v24 = vpop.eup %8233 }
0x1a98   :  { %v3793_v25 = vsel %vm520_vm9, %v8234_v24, 0.0  ;;  %v8236_v26 = vpop.eup %8235 }
0x1a99   :  { %3552 = vadd.xlane.f32.xlu0 %v3551_v16  ;;  %v3554_v27 = vsel %vm527_vm10, %v8236_v26, 0.0 }
0x1a9b   :  { %v8238_v28 = vpop.eup %8237 }
0x1a9c   :  { %v3796_v29 = vsel %vm527_vm10, %v8238_v28, 0.0 }
0x1aaf   :  { %8010 = vrot.lane.b32.xlu0 %v9327_v56, %s8369_s23 }
0x1ab3   :  { %3809 = vrot.lane.b32.xlu0 %v9339_v5, %s8370_s5 }
0x1ab7   :  { %4031 = vrot.lane.b32.xlu0 %v9339_v5, %s8371_s24 }
0x1aba   :  { %3794 = vadd.xlane.f32.xlu1 %v3793_v25 }
0x1abb   :  { %4023 = vrot.lane.b32.xlu0 %v9323_v49, %s8372_s6 }
0x1abe   :  { %3555 = vadd.xlane.f32.xlu1 %v3554_v27 }
0x1ac2   :  { %3797 = vadd.xlane.f32.xlu1 %v3796_v29 }
0x1ad3   :  { %8015 = vrot.lane.b32.xlu1 %v9327_v56, %s8370_s5 }
0x1ad7   :  { %8020 = vrot.lane.b32.xlu1 %v9327_v56, %s8371_s24 }
0x1adb   :  { %4021 = vrot.lane.b32.xlu1 %v9321_v0, %s8372_s6 }
0x1adf   :  { %4025 = vrot.lane.b32.xlu1 %v9339_v5, %s8372_s6 }
0x1b12   :  { %v3550_v33 = vpop.xlane.xlu1 %3549 }
0x1b13   :  { %8239 = vrcp.f32 %v3550_v33 }
0x1b16   :  { %v3568_v40 = vpop.permute.xlu1 %3567 }
0x1b1d   :  { %v8240_v6 = vpop.eup %8239 }
0x1b1e   :  { %v3558_v43 = vmul.f32 %v8240_v6, %v8228_v45  ;;  %v6601_v45 = vld [vmem:[%s10054_s10 + $0x20] sm:$0xff] }
0x1b1f   :  { %v9445_v59 = vpack.c.bf16 %v6601_v45, %v6601_v45 }
0x1b21   :  { %v9451_v47 = vsel %vm906_vm12, %v9445_v59, 0 }
0x1b22   :  { %v3792_v35 = vpop.xlane.xlu0 %3791 }
0x1b26   :  { %v3553_v42 = vpop.xlane.xlu0 %3552 }
0x1b27   :  { %8241 = vrcp.f32 %v3553_v42 }
0x1b2a   :  { %v8011_v44 = vpop.permute.xlu0 %8010 }
0x1b2b   :  { %v8013_v8 = vunpack.i.h.bf16 %v8011_v44  ;;  %v8012_v4 = vunpack.i.l.bf16 %v8011_v44 }
0x1b2d   :  { %v7813_v39 = vpack.c.bf16 %v8013_v8, %v8012_v4 }
0x1b2e   :  { %v3810_v52 = vpop.permute.xlu0 %3809 }
0x1b2f   :  { %7814 = vmatpush3.bf16.msra.mxu0 %v7813_v39 }
0x1b30   :  { %7419 = vmatprep.subr.mxu0 %v8363_v2 }
0x1b31   :  { %v8242_v15 = vpop.eup %8241 }
0x1b32   :  { %v3560_v34 = vmul.f32 %v8242_v15, %v8232_v53 }
0x1b33   :  { %7420 = vmatpush3.msk.msra.mxu0 %vm572_vm11, %v3568_v40 }
0x1b34   :  { %7422 = vmatmul.mubr.msk.f32.vlgmr.msra.gmra.mrb[82].mxu0 %vm520_vm9, %v3558_v43  ;;  %7819 = vmatprep.subr.bf16.mxu0 %v8365_v3 }
0x1b35   :  { %7424 = vmatprep.mubr.msk.f32.mxu0 %vm8364_vm0, %v8363_v2 }
0x1b38   :  { %7425 = vmatmul.mubr.msk.f32.gmra.mrb[84].mxu0 %vm520_vm9, %v3560_v34 }
0x1b39   :  { %7427 = vmatprep.mubr.msk.f32.mxu0 %vm8364_vm0, %v8363_v2 }
0x1b47   :  { %v3795_v37 = vpop.xlane.xlu1 %3794 }
0x1b4b   :  { %v3556_v41 = vpop.xlane.xlu1 %3555 }
0x1b4c   :  { %8243 = vrcp.f32 %v3556_v41 }
0x1b4d   :  { %8245 = vrcp.f32 %v3792_v35  ;;  %v4032_v35 = vpop.permute.xlu0 %4031 }
0x1b4e   :  { %8247 = vrcp.f32 %v3795_v37 }
0x1b4f   :  { %v3798_v30 = vpop.xlane.xlu1 %3797 }
0x1b50   :  { %8249 = vrcp.f32 %v3798_v30 }
0x1b51   :  { %v4024_v44 = vpop.permute.xlu0 %4023 }
0x1b53   :  { %v8016_v9 = vpop.permute.xlu1 %8015 }
0x1b54   :  { %v8018_v51 = vunpack.i.h.bf16 %v8016_v9  ;;  %v8017_v22 = vunpack.i.l.bf16 %v8016_v9 }
0x1b56   :  { %v8244_v1 = vpop.eup %8243  ;;  %v7820_v11 = vpack.c.bf16 %v8018_v51, %v8017_v22 }
0x1b57   :  { %v3562_v48 = vmul.f32 %v8244_v1, %v8236_v26  ;;  %v8246_v10 = vpop.eup %8245  ;;  %v8021_v17 = vpop.permute.xlu1 %8020 }
0x1b58   :  { %7821 = vmatpush3.bf16.msra.mxu0 %v7820_v11  ;;  %v3800_v46 = vmul.f32 %v8246_v10, %v9394_v62  ;;  %v8248_v55 = vpop.eup %8247  ;;  %v8023_v25 = vunpack.i.h.bf16 %v8021_v17  ;;  %v8022_v26 = vunpack.i.l.bf16 %v8021_v17 }
0x1b59   :  { %7428 = vmatmul.mubr.msk.f32.gmra.mrb[86].mxu0 %vm520_vm9, %v3562_v48  ;;  %7449 = vmatprep.subr.mxu0 %v8363_v2  ;;  %v3802_v57 = vmul.f32 %v8248_v55, %v8234_v24 }
0x1b5a   :  { %7451 = vmatprep.mubr.msk.f32.mxu0 %vm8364_vm0, %v8363_v2  ;;  %v8250_v58 = vpop.eup %8249  ;;  %v7823_v33 = vpack.c.bf16 %v8023_v25, %v8022_v26 }
0x1b5b   :  { %v3804_v32 = vmul.f32 %v8250_v58, %v8238_v28  ;;  %v4022_v42 = vpop.permute.xlu1 %4021 }
0x1b5c   :  { %7450 = vmatpush3.msk.msra.mxu0 %vm572_vm11, %v3810_v52 }
0x1b5d   :  { %7452 = vmatmul.mubr.msk.f32.vlgmr.msra.gmra.mrb[88].mxu0 %vm520_vm9, %v3800_v46  ;;  %7897 = vmatprep.subr.msk.bf16.mxu0 %vm906_vm12, %v9445_v59 }
0x1b5e   :  { %7454 = vmatprep.mubr.msk.f32.mxu0 %vm8364_vm0, %v8363_v2  ;;  %7467 = vmatpush3.bf16.msra.mxu0 %v9451_v47 }
0x1b5f   :  { %7826 = vmatprep.subr.bf16.mxu0 %v8365_v3  ;;  %v4026_v8 = vpop.permute.xlu1 %4025 }
0x1b61   :  { %7455 = vmatmul.mubr.msk.f32.gmra.mrb[90].mxu0 %vm520_vm9, %v3802_v57 }
0x1b62   :  { %7457 = vmatprep.mubr.msk.f32.mxu0 %vm8364_vm0, %v8363_v2 }
0x1b65   :  { %7458 = vmatmul.mubr.msk.f32.gmra.mrb[92].mxu0 %vm520_vm9, %v3804_v32 }
0x1c07   :  { %v3648_v21 = vpop.f32.mrb[82].mxu0 }
0x1c08   :  { %v7423_v62 = vpop.f32.mrb[83].mxu0 }
0x1c0b   :  { %v3653_v63 = vpop.f32.mrb[84].mxu0 }
0x1c0c   :  { %v3662_v53 = vpack.c.bf16 %v3653_v63, %v3648_v21  ;;  %v7426_v16 = vpop.f32.mrb[85].mxu0 }
0x1c0e   :  { %7468 = vmatprep.mubr.msk.bf16.mxu0 %vm424_vm7, %v3662_v53 }
0x1c2c   :  { %v3658_v18 = vpop.f32.mrb[86].mxu0 }
0x1c2d   :  { %v3663_v23 = vpack.c.bf16 %v3658_v18, %v3658_v18  ;;  %v7429_v14 = vpop.f32.mrb[87].mxu0 }
0x1c2f   :  { %7469 = vmatmul.mubr.msk.bf16.vlgmr.msra.gmra.mrb[96].mxu0 %vm424_vm7, %v3663_v23 }
0x1c30   :  { %v3890_v13 = vpop.f32.mrb[88].mxu0  ;;  %7493 = vmatprep.mubr.msk.f32.mxu0 %vm8364_vm0, %v8363_v2 }
0x1c31   :  { %v7453_v31 = vpop.f32.mrb[89].mxu0 }
0x1c34   :  { %v3895_v7 = vpop.f32.mrb[90].mxu0 }
0x1c35   :  { %v3904_v36 = vpack.c.bf16 %v3895_v7, %v3890_v13  ;;  %v7456_v24 = vpop.f32.mrb[91].mxu0 }
0x1c37   :  { %7462 = vmatprep.mubr.msk.bf16.mxu1 %vm424_vm7, %v3904_v36 }
0x1c38   :  { %v3900_v27 = vpop.f32.mrb[92].mxu0 }
0x1c39   :  { %v3905_v28 = vpack.c.bf16 %v3900_v27, %v3900_v27  ;;  %v7459_v29 = vpop.f32.mrb[93].mxu0 }
0x1c3b   :  { %7463 = vmatmul.mubr.msk.bf16.vlgmr.msra.gmra.mrb[104].mxu1 %vm424_vm7, %v3905_v28 }
0x1c3c   :  { %7825 = vmatpush3.bf16.xpose.msk.msra.mxu1 %vm8654_vm8, %v7823_v33  ;;  %7478 = vmatprep.mubr.msk.f32.mxu1 %vm8364_vm0, %v8363_v2 }
0x1c3d   :  { %7476 = vmatprep.subr.mxu1 %v8363_v2 }
0x1c44   :  { %7477 = vmatpush3.xpose.msk.msra.mxu1 %vm424_vm7, %v4032_v35 }
0x1c47   :  { %7479 = vmatmul.mubr.msk.f32.vlgmr.msra.gmra.mrb[102].mxu1 %vm424_vm7, %v4022_v42 }
0x1c48   :  { %7481 = vmatprep.mubr.msk.f32.mxu1 %vm8364_vm0, %v8363_v2 }
0x1c4b   :  { %7482 = vmatmul.mubr.msk.f32.gmra.mrb[108].mxu1 %vm424_vm7, %v4024_v44 }
0x1c4c   :  { %7484 = vmatprep.mubr.msk.f32.mxu1 %vm8364_vm0, %v8363_v2 }
0x1c4f   :  { %7485 = vmatmul.mubr.msk.f32.gmra.mrb[110].mxu1 %vm424_vm7, %v4026_v8 }
0x1d02   :  { %v7470_v4 = vpop.f32.mrb[96].mxu0 }
0x1d03   :  { %v4007_v39 = vpop.f32.mrb[97].mxu0 }
0x1d04   :  { %v7471_v6 = vpop.f32.mrb[98].mxu0 }
0x1d05   :  { %v4010_v43 = vpop.f32.mrb[99].mxu0 }
0x1d0e   :  { %v7464_v40 = vpop.f32.mrb[104].mxu1 }
0x1d0f   :  { %v9487_v15 = vadd.f32 %v7470_v4, %v7464_v40  ;;  %v3950_v34 = vpop.f32.mrb[105].mxu1 }
0x1d10   :  { %v9489_v37 = vadd.f32 %v4007_v39, %v3950_v34  ;;  %v7465_v41 = vpop.f32.mrb[106].mxu1 }
0x1d11   :  { %v3953_v30 = vpop.f32.mrb[107].mxu1 }
0x1d12   :  { %v9491_v9 = vadd.f32 %v4010_v43, %v3953_v30 }
0x1d1a   :  { %v4111_v51 = vpop.f32.mrb[102].mxu1 }
0x1d1b   :  { %v4125_v22 = vmul.f32 0.35355338, %v4111_v51  ;;  %v7480_v1 = vpop.f32.mrb[103].mxu1 }
0x1d1d   :  { %v4128_v11 = vsel %vm520_vm9, %v4125_v22, -inf }
0x1d1e   :  { %4129 = vmax.xlane.f32.xlu0 %v4128_v11  ;;  %v4116_v48 = vpop.f32.mrb[108].mxu1 }
0x1d1f   :  { %v4126_v10 = vmul.f32 0.35355338, %v4116_v48  ;;  %v7483_v46 = vpop.f32.mrb[109].mxu1 }
0x1d21   :  { %v4131_v52 = vsel %vm520_vm9, %v4126_v10, -inf }
0x1d22   :  { %4132 = vmax.xlane.f32.xlu1 %v4131_v52  ;;  %v4121_v55 = vpop.f32.mrb[110].mxu1 }
0x1d23   :  { %v4127_v57 = vmul.f32 0.35355338, %v4121_v55  ;;  %v7486_v58 = vpop.f32.mrb[111].mxu1 }
0x1d25   :  { %v4134_v32 = vsel %vm527_vm10, %v4127_v57, -inf }
0x1d26   :  { %4135 = vmax.xlane.f32.xlu0 %v4134_v32 }
0x1d33   :  { %4165 = vrot.lane.b32.xlu1 %v9339_v5, %s10095_s0 }
0x1d37   :  { %8030 = vrot.lane.b32.xlu1 %v9327_v56, %s10096_s28 }
0x1d3b   :  { %4333 = vrot.lane.b32.xlu1 %v9339_v5, %s10096_s28 }
0x1dab   :  { %v4130_v45 = vpop.xlane.xlu0 %4129 }
0x1dac   :  { %v4137_v50 = vsub.f32 %v4125_v22, %v4130_v45  ;;  %v6603_v22 = vld [vmem:[%s10054_s10 + $0x30] sm:$0xff] }
0x1dad   :  { %v9539_v1 = vpack.c.bf16 %v6603_v22, %v6603_v22 }
0x1dae   :  { %v4140_v21 = vmul.f32 1.442695, %v4137_v50 }
0x1daf   :  { %v4133_v62 = vpop.xlane.xlu1 %4132  ;;  %7898 = vmatprep.subr.msk.bf16.mxu1 %vm906_vm12, %v9539_v1  ;;  %v9545_v11 = vsel %vm906_vm12, %v9539_v1, 0 }
0x1db0   :  { %8251 = vpow2.f32 %v4140_v21  ;;  %v4138_v63 = vsub.f32 %v4126_v10, %v4133_v62  ;;  %7503 = vmatpush3.bf16.msra.mxu1 %v9545_v11 }
0x1db1   :  { %7833 = vmatprep.subr.bf16.mxu1 %v8365_v3 }
0x1db2   :  { %v4142_v53 = vmul.f32 1.442695, %v4138_v63 }
0x1db3   :  { %v4136_v16 = vpop.xlane.xlu0 %4135  ;;  %v4166_v24 = vpop.permute.xlu1 %4165 }
0x1db4   :  { %8253 = vpow2.f32 %v4142_v53  ;;  %v4139_v18 = vsub.f32 %v4127_v57, %v4136_v16 }
0x1db6   :  { %v4144_v23 = vmul.f32 1.442695, %v4139_v18 }
0x1db7   :  { %v8031_v25 = vpop.permute.xlu1 %8030 }
0x1db8   :  { %8255 = vpow2.f32 %v4144_v23  ;;  %v8033_v4 = vunpack.i.h.bf16 %v8031_v25  ;;  %v8032_v39 = vunpack.i.l.bf16 %v8031_v25 }
0x1dba   :  { %v8252_v14 = vpop.eup %8251  ;;  %v7830_v40 = vpack.c.bf16 %v8033_v4, %v8032_v39 }
0x1dbb   :  { %v4146_v13 = vsel %vm520_vm9, %v8252_v14, 0.0  ;;  %v4334_v27 = vpop.permute.xlu1 %4333 }
0x1dbc   :  { %4147 = vadd.xlane.f32.xlu0 %v4146_v13 }
0x1dbe   :  { %v8254_v31 = vpop.eup %8253 }
0x1dbf   :  { %v4149_v17 = vsel %vm520_vm9, %v8254_v31, 0.0 }
0x1dc0   :  { %4150 = vadd.xlane.f32.xlu0 %v4149_v17 }
0x1dc2   :  { %v8256_v7 = vpop.eup %8255 }
0x1dc3   :  { %v4152_v36 = vsel %vm527_vm10, %v8256_v7, 0.0 }
0x1dc4   :  { %4153 = vadd.xlane.f32.xlu1 %v4152_v36 }
0x1dd5   :  { %4325 = vrot.lane.b32.xlu1 %v9323_v49, %s10097_s4 }
0x1dd6   :  { %8025 = vrot.lane.b32.xlu0 %v9327_v56, %s10095_s0 }
0x1dda   :  { %4323 = vrot.lane.b32.xlu0 %v9321_v0, %s10097_s4 }
0x1dde   :  { %4327 = vrot.lane.b32.xlu0 %v9339_v5, %s10097_s4 }
0x1e49   :  { %v4148_v26 = vpop.xlane.xlu0 %4147 }
0x1e4a   :  { %8257 = vrcp.f32 %v4148_v26 }
0x1e4d   :  { %v4151_v28 = vpop.xlane.xlu0 %4150 }
0x1e4e   :  { %8259 = vrcp.f32 %v4151_v28 }
0x1e51   :  { %v4154_v29 = vpop.xlane.xlu1 %4153  ;;  %v8026_v33 = vpop.permute.xlu0 %8025 }
0x1e52   :  { %v8028_v35 = vunpack.i.h.bf16 %v8026_v33  ;;  %v8027_v49 = vunpack.i.l.bf16 %v8026_v33  ;;  %8261 = vrcp.f32 %v4154_v29 }
0x1e54   :  { %v7827_v42 = vpack.c.bf16 %v8028_v35, %v8027_v49  ;;  %v8258_v44 = vpop.eup %8257 }
0x1e55   :  { %v4156_v0 = vmul.f32 %v8258_v44, %v8252_v14  ;;  %v4324_v41 = vpop.permute.xlu0 %4323  ;;  %v4326_v30 = vpop.permute.xlu1 %4325 }
0x1e56   :  { %7828 = vmatpush3.bf16.msra.mxu0 %v7827_v42 }
0x1e57   :  { %7491 = vmatprep.subr.mxu0 %v8363_v2 }
0x1e58   :  { %v8260_v8 = vpop.eup %8259 }
0x1e59   :  { %v4158_v6 = vmul.f32 %v8260_v8, %v8254_v31  ;;  %v4328_v51 = vpop.permute.xlu0 %4327 }
0x1e5a   :  { %7492 = vmatpush3.msk.msra.mxu0 %vm572_vm11, %v4166_v24 }
0x1e5b   :  { %7494 = vmatmul.mubr.msk.f32.vlgmr.msra.gmra.mrb[94].mxu0 %vm520_vm9, %v4156_v0  ;;  %7829 = vmatprep.subr.bf16.mxu0 %v8365_v3 }
0x1e5c   :  { %7496 = vmatprep.mubr.msk.f32.mxu0 %vm8364_vm0, %v8363_v2  ;;  %v8262_v43 = vpop.eup %8261 }
0x1e5d   :  { %v4160_v34 = vmul.f32 %v8262_v43, %v8256_v7 }
0x1e5f   :  { %7497 = vmatmul.mubr.msk.f32.gmra.mrb[100].mxu0 %vm520_vm9, %v4158_v6  ;;  %v9563_v6 = vrot.slane %v9385_v54, 1 }
0x1e60   :  { %7499 = vmatprep.mubr.msk.f32.mxu0 %vm8364_vm0, %v8363_v2 }
0x1e61   :  { %7832 = vmatpush3.bf16.xpose.msk.msra.mxu0 %vm8654_vm8, %v7830_v40  ;;  %v9569_v43 = vsel %vm1636_vm6, %v4643_v38, %v9563_v6 }
0x1e62   :  { %7512 = vmatprep.subr.mxu0 %v8363_v2  ;;  %v9573_v40 = vpack.i.bf16 %v9569_v43, %v9352_v20 }
0x1e63   :  { %7500 = vmatmul.mubr.msk.f32.gmra.mrb[102].mxu0 %vm520_vm9, %v4160_v34 }
0x1e64   :  { %7514 = vmatprep.mubr.msk.f32.mxu0 %vm8364_vm0, %v8363_v2 }
0x1e69   :  { %7513 = vmatpush3.xpose.msk.msra.mxu0 %vm424_vm7, %v4334_v27 }
0x1e6c   :  { %7515 = vmatmul.mubr.msk.f32.vlgmr.msra.gmra.mrb[104].mxu0 %vm424_vm7, %v4324_v41 }
0x1e6d   :  { %7517 = vmatprep.mubr.msk.f32.mxu0 %vm8364_vm0, %v8363_v2 }
0x1e70   :  { %7518 = vmatmul.mubr.msk.f32.gmra.mrb[106].mxu0 %vm424_vm7, %v4326_v30 }
0x1e71   :  { %7520 = vmatprep.mubr.msk.f32.mxu0 %vm8364_vm0, %v8363_v2 }
0x1e74   :  { %7521 = vmatmul.mubr.msk.f32.gmra.mrb[108].mxu0 %vm424_vm7, %v4328_v51 }
0x1f2e   :  { %v4246_v48 = vpop.f32.mrb[94].mxu0 }
0x1f2f   :  { %v7495_v10 = vpop.f32.mrb[95].mxu0 }
0x1f32   :  { %v4251_v46 = vpop.f32.mrb[100].mxu0 }
0x1f33   :  { %v4260_v52 = vpack.c.bf16 %v4251_v46, %v4246_v48  ;;  %v7498_v55 = vpop.f32.mrb[101].mxu0 }
0x1f35   :  { %7504 = vmatprep.mubr.msk.bf16.mxu1 %vm424_vm7, %v4260_v52 }
0x1f36   :  { %v4256_v57 = vpop.f32.mrb[102].mxu0 }
0x1f37   :  { %v4261_v58 = vpack.c.bf16 %v4256_v57, %v4256_v57  ;;  %v7501_v32 = vpop.f32.mrb[103].mxu0 }
0x1f39   :  { %7505 = vmatmul.mubr.msk.bf16.vlgmr.msra.gmra.mrb[112].mxu1 %vm424_vm7, %v4261_v58 }
0x1f3a   :  { %7529 = vmatprep.mubr.msk.f32.mxu1 %vm8364_vm0, %v8363_v2 }
0x1f3f   :  { %v4413_v45 = vpop.f32.mrb[104].mxu0 }
0x1f40   :  { %v4427_v50 = vmul.f32 0.35355338, %v4413_v45  ;;  %v7516_v21 = vpop.f32.mrb[105].mxu0 }
0x1f42   :  { %v4430_v62 = vsel %vm520_vm9, %v4427_v50, -inf }
0x1f43   :  { %4431 = vmax.xlane.f32.xlu1 %v4430_v62  ;;  %v4418_v63 = vpop.f32.mrb[106].mxu0 }
0x1f44   :  { %v4428_v53 = vmul.f32 0.35355338, %v4418_v63  ;;  %v7519_v16 = vpop.f32.mrb[107].mxu0 }
0x1f46   :  { %v4433_v18 = vsel %vm520_vm9, %v4428_v53, -inf }
0x1f47   :  { %4434 = vmax.xlane.f32.xlu0 %v4433_v18  ;;  %v4423_v23 = vpop.f32.mrb[108].mxu0 }
0x1f48   :  { %v4429_v14 = vmul.f32 0.35355338, %v4423_v23  ;;  %v7522_v13 = vpop.f32.mrb[109].mxu0 }
0x1f4a   :  { %v4436_v31 = vsel %vm527_vm10, %v4429_v14, -inf }
0x1f4b   :  { %4437 = vmax.xlane.f32.xlu0 %v4436_v31 }
0x1f54   :  { %8035 = vrot.lane.b32.xlu1 %v9327_v56, %s10098_s1 }
0x1fd0   :  { %v4432_v17 = vpop.xlane.xlu1 %4431 }
0x1fd1   :  { %v4439_v7 = vsub.f32 %v4427_v50, %v4432_v17 }
0x1fd3   :  { %v4442_v36 = vmul.f32 1.442695, %v4439_v7 }
0x1fd4   :  { %v8036_v24 = vpop.permute.xlu1 %8035  ;;  %v4435_v25 = vpop.xlane.xlu0 %4434 }
0x1fd5   :  { %8263 = vpow2.f32 %v4442_v36  ;;  %v8038_v26 = vunpack.i.h.bf16 %v8036_v24  ;;  %v8037_v27 = vunpack.i.l.bf16 %v8036_v24  ;;  %v4440_v28 = vsub.f32 %v4428_v53, %v4435_v25 }
0x1fd7   :  { %v7834_v29 = vpack.c.bf16 %v8038_v26, %v8037_v27  ;;  %v4444_v33 = vmul.f32 1.442695, %v4440_v28 }
0x1fd8   :  { %v4438_v35 = vpop.xlane.xlu0 %4437 }
0x1fd9   :  { %8265 = vpow2.f32 %v4444_v33  ;;  %v4441_v49 = vsub.f32 %v4429_v14, %v4438_v35  ;;  %7835 = vmatpush3.bf16.msra.mxu1 %v7834_v29 }
0x1fda   :  { %7527 = vmatprep.subr.mxu1 %v8363_v2 }
0x1fdb   :  { %v4446_v42 = vmul.f32 1.442695, %v4441_v49 }
0x1fdd   :  { %8267 = vpow2.f32 %v4446_v42 }
0x1fdf   :  { %v8264_v56 = vpop.eup %8263 }
0x1fe0   :  { %v4448_v44 = vsel %vm520_vm9, %v8264_v56, 0.0 }
0x1fe1   :  { %4449 = vadd.xlane.f32.xlu0 %v4448_v44 }
0x1fe3   :  { %v8266_v0 = vpop.eup %8265 }
0x1fe4   :  { %v4451_v8 = vsel %vm520_vm9, %v8266_v0, 0.0 }
0x1fe5   :  { %4452 = vadd.xlane.f32.xlu1 %v4451_v8 }
0x1fe7   :  { %v8268_v4 = vpop.eup %8267 }
0x1fe8   :  { %v4454_v39 = vsel %vm527_vm10, %v8268_v4, 0.0 }
0x1fe9   :  { %4455 = vadd.xlane.f32.xlu0 %v4454_v39 }
0x1ff6   :  { %8040 = vrot.lane.b32.xlu1 %v9573_v40, %s8366_s30 }
0x1ffa   :  { %4651 = vrot.lane.b32.xlu1 %v9563_v6, %s8366_s30 }
0x1ffe   :  { %8045 = vrot.lane.b32.xlu1 %v9573_v40, %s8368_s2 }
0x1fff   :  { %4467 = vrot.lane.b32.xlu0 %v9339_v5, %s10098_s1 }
0x2002   :  { %4882 = vrot.lane.b32.xlu1 %v9352_v20, %s8367_s3 }
0x2003   :  { %4892 = vrot.lane.b32.xlu0 %v9563_v6, %s8368_s2 }
0x2006   :  { %4886 = vrot.lane.b32.xlu1 %v9563_v6, %s8367_s3 }
0x2007   :  { %4884 = vrot.lane.b32.xlu0 %v9569_v43, %s8367_s3 }
0x200c   :  { %v7506_v12 = vpop.f32.mrb[112].mxu1 }
0x200d   :  { %v9592_v38 = vadd.f32 %v7506_v12, %v9487_v15  ;;  %v4306_v54 = vpop.f32.mrb[113].mxu1 }
0x200e   :  { %v9595_v34 = vadd.f32 %v4306_v54, %v9489_v37  ;;  %v7507_v5 = vpop.f32.mrb[114].mxu1 }
0x200f   :  { %v4309_v41 = vpop.f32.mrb[115].mxu1 }
0x2010   :  { %v9598_v30 = vadd.f32 %v4309_v41, %v9491_v9 }
0x206e   :  { %v4450_v51 = vpop.xlane.xlu0 %4449 }
0x206f   :  { %8269 = vrcp.f32 %v4450_v51 }
0x2072   :  { %v4453_v22 = vpop.xlane.xlu1 %4452 }
0x2073   :  { %8271 = vrcp.f32 %v4453_v22 }
0x2076   :  { %v4456_v48 = vpop.xlane.xlu0 %4455  ;;  %v8041_v46 = vpop.permute.xlu1 %8040 }
0x2077   :  { %8273 = vrcp.f32 %v4456_v48  ;;  %v8043_v55 = vunpack.i.h.bf16 %v8041_v46  ;;  %v8042_v37 = vunpack.i.l.bf16 %v8041_v46 }
0x2079   :  { %v8270_v10 = vpop.eup %8269  ;;  %v7837_v32 = vpack.c.bf16 %v8043_v55, %v8042_v37 }
0x207a   :  { %v4458_v52 = vmul.f32 %v8270_v10, %v8264_v56  ;;  %v4468_v15 = vpop.permute.xlu0 %4467  ;;  %v4652_v58 = vpop.permute.xlu1 %4651 }
0x207b   :  { %7528 = vmatpush3.msk.msra.mxu1 %vm572_vm11, %v4468_v15 }
0x207c   :  { %7530 = vmatmul.mubr.msk.f32.vlgmr.msra.gmra.mrb[116].mxu1 %vm520_vm9, %v4458_v52  ;;  %7836 = vmatprep.subr.bf16.mxu1 %v8365_v3 }
0x207d   :  { %v8272_v9 = vpop.eup %8271  ;;  %7532 = vmatprep.mubr.msk.f32.mxu1 %vm8364_vm0, %v8363_v2 }
0x207e   :  { %v4460_v57 = vmul.f32 %v8272_v9, %v8266_v0  ;;  %v8046_v21 = vpop.permute.xlu1 %8045  ;;  %v4893_v16 = vpop.permute.xlu0 %4892 }
0x207f   :  { %v8048_v62 = vunpack.i.h.bf16 %v8046_v21  ;;  %v8047_v63 = vunpack.i.l.bf16 %v8046_v21 }
0x2080   :  { %7533 = vmatmul.mubr.msk.f32.gmra.mrb[118].mxu1 %vm520_vm9, %v4460_v57 }
0x2081   :  { %v8274_v45 = vpop.eup %8273  ;;  %7535 = vmatprep.mubr.msk.f32.mxu1 %vm8364_vm0, %v8363_v2  ;;  %v7844_v53 = vpack.c.bf16 %v8048_v62, %v8047_v63 }
0x2082   :  { %7839 = vmatpush3.bf16.xpose.msk.msra.mxu1 %vm8654_vm8, %v7837_v32  ;;  %v4462_v50 = vmul.f32 %v8274_v45, %v8268_v4  ;;  %v4883_v18 = vpop.permute.xlu1 %4882  ;;  %v4885_v23 = vpop.permute.xlu0 %4884 }
0x2083   :  { %7548 = vmatprep.subr.mxu1 %v8363_v2 }
0x2084   :  { %7536 = vmatmul.mubr.msk.f32.gmra.mrb[120].mxu1 %vm520_vm9, %v4462_v50 }
0x2085   :  { %7550 = vmatprep.mubr.msk.f32.mxu1 %vm8364_vm0, %v8363_v2 }
0x2086   :  { %v4887_v14 = vpop.permute.xlu1 %4886 }
0x208a   :  { %7549 = vmatpush3.xpose.msk.msra.mxu1 %vm424_vm7, %v4652_v58 }
0x208b   :  { %7843 = vmatprep.subr.bf16.mxu1 %v8365_v3 }
0x208d   :  { %7551 = vmatmul.mubr.msk.f32.vlgmr.msra.gmra.mrb[122].mxu1 %vm424_vm7, %v9352_v20 }
0x208e   :  { %7846 = vmatpush3.bf16.xpose.msk.msra.mxu1 %vm8654_vm8, %v7844_v53  ;;  %7553 = vmatprep.mubr.msk.f32.mxu1 %vm8364_vm0, %v8363_v2 }
0x208f   :  { %7578 = vmatprep.subr.mxu1 %v8363_v2 }
0x2091   :  { %7554 = vmatmul.mubr.msk.f32.gmra.mrb[124].mxu1 %vm424_vm7, %v9569_v43 }
0x2092   :  { %7556 = vmatprep.mubr.msk.f32.mxu1 %vm8364_vm0, %v8363_v2 }
0x2095   :  { %7557 = vmatmul.mubr.msk.f32.gmra.mrb[126].mxu1 %vm424_vm7, %v9563_v6 }
0x2096   :  { %7579 = vmatpush3.xpose.msk.msra.mxu1 %vm424_vm7, %v4893_v16  ;;  %7580 = vmatprep.mubr.msk.f32.mxu1 %vm8364_vm0, %v8363_v2 }
0x2097   :  { %7900 = vmatprep.subr.msk.bf16.mxu1 %vm906_vm12, %v9458_v60  ;;  %v6604_v60 = vld [vmem:[%s10054_s10 + $0x38] sm:$0xff] }
0x2098   :  { %v9647_v13 = vpack.c.bf16 %v6604_v60, %v6604_v60 }
0x2099   :  { %7581 = vmatmul.mubr.msk.f32.vlgmr.msra.gmra.mrb[128].mxu1 %vm424_vm7, %v4883_v18 }
0x209a   :  { %7583 = vmatprep.mubr.msk.f32.mxu1 %vm8364_vm0, %v8363_v2  ;;  %7605 = vmatpush3.bf16.msra.mxu1 %v9464_v61 }
0x209b   :  { %7901 = vmatprep.subr.msk.bf16.mxu1 %vm906_vm12, %v9445_v59  ;;  %7899 = vmatprep.subr.msk.bf16.mxu0 %vm906_vm12, %v9647_v13  ;;  %v9653_v59 = vsel %vm906_vm12, %v9647_v13, 0 }
0x209c   :  { %7539 = vmatpush3.bf16.msra.mxu0 %v9653_v59 }
0x209d   :  { %7584 = vmatmul.mubr.msk.f32.gmra.mrb[130].mxu1 %vm424_vm7, %v4885_v23  ;;  %7840 = vmatprep.subr.bf16.mxu0 %v8365_v3 }
0x209e   :  { %7586 = vmatprep.mubr.msk.f32.mxu1 %vm8364_vm0, %v8363_v2 }
0x20a1   :  { %7587 = vmatmul.mubr.msk.f32.gmra.mrb[132].mxu1 %vm424_vm7, %v4887_v14 }
0x214f   :  { %v4548_v61 = vpop.f32.mrb[116].mxu1 }
0x2150   :  { %v7531_v31 = vpop.f32.mrb[117].mxu1 }
0x2153   :  { %v4553_v17 = vpop.f32.mrb[118].mxu1 }
0x2154   :  { %v4562_v7 = vpack.c.bf16 %v4553_v17, %v4548_v61  ;;  %v7534_v36 = vpop.f32.mrb[119].mxu1 }
0x2156   :  { %7540 = vmatprep.mubr.msk.bf16.mxu0 %vm424_vm7, %v4562_v7 }
0x2157   :  { %v4558_v24 = vpop.f32.mrb[120].mxu1 }
0x2158   :  { %v4563_v25 = vpack.c.bf16 %v4558_v24, %v4558_v24  ;;  %v7537_v26 = vpop.f32.mrb[121].mxu1 }
0x215a   :  { %7541 = vmatmul.mubr.msk.bf16.vlgmr.msra.gmra.mrb[112].mxu0 %vm424_vm7, %v4563_v25 }
0x215b   :  { %7565 = vmatprep.mubr.msk.f32.mxu0 %vm8364_vm0, %v8363_v2 }
0x2160   :  { %v4731_v27 = vpop.f32.mrb[122].mxu1 }
0x2161   :  { %v4745_v28 = vmul.f32 0.35355338, %v4731_v27  ;;  %v7552_v29 = vpop.f32.mrb[123].mxu1 }
0x2163   :  { %v4748_v33 = vsel %vm520_vm9, %v4745_v28, -inf }
0x2164   :  { %4749 = vmax.xlane.f32.xlu0 %v4748_v33  ;;  %v4736_v35 = vpop.f32.mrb[124].mxu1 }
0x2165   :  { %v4746_v49 = vmul.f32 0.35355338, %v4736_v35  ;;  %v7555_v42 = vpop.f32.mrb[125].mxu1  ;;  %v9694_v35 = vld [vmem:[%s10055_s11 + $0x1] ss:$0 sm:$0xff] }
0x2167   :  { %v4751_v56 = vsel %vm520_vm9, %v4746_v49, -inf }
0x2168   :  { %4752 = vmax.xlane.f32.xlu1 %v4751_v56  ;;  %v4741_v44 = vpop.f32.mrb[126].mxu1 }
0x2169   :  { %v4747_v0 = vmul.f32 0.35355338, %v4741_v44  ;;  %v7558_v8 = vpop.f32.mrb[127].mxu1  ;;  %v9697_v44 = vld [vmem:[#allocation2 + $0x10] sm:$0xff] }
0x216b   :  { %v4754_v4 = vsel %vm527_vm10, %v4747_v0, -inf }
0x216c   :  { %4755 = vmax.xlane.f32.xlu0 %v4754_v4  ;;  %v4972_v39 = vpop.f32.mrb[128].mxu1 }
0x216d   :  { %v4986_v12 = vmul.f32 0.35355338, %v4972_v39  ;;  %v7582_v54 = vpop.f32.mrb[129].mxu1  ;;  %v8359_v39 = vld [vmem:[#allocation2] sm:$0xff] }
0x216f   :  { %v4989_v5 = vsel %vm520_vm9, %v4986_v12, -inf }
0x2170   :  { %4990 = vmax.xlane.f32.xlu0 %v4989_v5  ;;  %v4977_v41 = vpop.f32.mrb[130].mxu1 }
0x2171   :  { %v4987_v51 = vmul.f32 0.35355338, %v4977_v41  ;;  %v7585_v22 = vpop.f32.mrb[131].mxu1  ;;  %v8360_v41 = vld [vmem:[#allocation2 + $0x8] sm:$0xff] }
0x2173   :  { %v4992_v48 = vsel %vm520_vm9, %v4987_v51, -inf }
0x2174   :  { %4993 = vmax.xlane.f32.xlu0 %v4992_v48  ;;  %v4982_v10 = vpop.f32.mrb[132].mxu1 }
0x2175   :  { %v4988_v46 = vmul.f32 0.35355338, %v4982_v10  ;;  %v7588_v52 = vpop.f32.mrb[133].mxu1 }
0x2177   :  { %v4995_v15 = vsel %vm527_vm10, %v4988_v46, -inf }
0x2178   :  { %4996 = vmax.xlane.f32.xlu1 %v4995_v15 }
0x2189   :  { %8050 = vrot.lane.b32.xlu1 %v9573_v40, %s8369_s23 }
0x21f1   :  { %v4750_v55 = vpop.xlane.xlu0 %4749 }
0x21f2   :  { %v4757_v37 = vsub.f32 %v4745_v28, %v4750_v55 }
0x21f4   :  { %v4760_v9 = vmul.f32 1.442695, %v4757_v37 }
0x21f5   :  { %v4753_v57 = vpop.xlane.xlu1 %4752 }
0x21f6   :  { %8275 = vpow2.f32 %v4760_v9  ;;  %v4758_v58 = vsub.f32 %v4746_v49, %v4753_v57 }
0x21f8   :  { %v4762_v32 = vmul.f32 1.442695, %v4758_v58 }
0x21f9   :  { %v4756_v45 = vpop.xlane.xlu0 %4755 }
0x21fa   :  { %8277 = vpow2.f32 %v4762_v32  ;;  %v4759_v50 = vsub.f32 %v4747_v0, %v4756_v45 }
0x21fc   :  { %v4764_v21 = vmul.f32 1.442695, %v4759_v50 }
0x21fd   :  { %v4991_v7 = vpop.xlane.xlu0 %4990 }
0x21fe   :  { %8279 = vpow2.f32 %v4764_v21  ;;  %v4998_v25 = vsub.f32 %v4986_v12, %v4991_v7 }
0x2200   :  { %v9669_v62 = vpop.eup %8275  ;;  %v5001_v56 = vmul.f32 1.442695, %v4998_v25 }
0x2201   :  { %v4766_v63 = vsel %vm520_vm9, %v9669_v62, 0.0  ;;  %v4994_v36 = vpop.xlane.xlu0 %4993 }
0x2202   :  { %4767 = vadd.xlane.f32.xlu0 %v4766_v63  ;;  %v4999_v24 = vsub.f32 %v4987_v51, %v4994_v36 }
0x2204   :  { %v9673_v53 = vpop.eup %8277  ;;  %v5003_v26 = vmul.f32 1.442695, %v4999_v24 }
0x2205   :  { %v4997_v16 = vpop.xlane.xlu1 %4996  ;;  %v4769_v18 = vsel %vm520_vm9, %v9673_v53, 0.0 }
0x2206   :  { %4770 = vadd.xlane.f32.xlu1 %v4769_v18  ;;  %v5000_v27 = vsub.f32 %v4988_v46, %v4997_v16  ;;  %8281 = vpow2.f32 %v5003_v26 }
0x2207   :  { %8283 = vpow2.f32 %v5001_v56 }
0x2208   :  { %v9677_v23 = vpop.eup %8279  ;;  %v5005_v4 = vmul.f32 1.442695, %v5000_v27 }
0x2209   :  { %v8051_v14 = vpop.permute.xlu1 %8050  ;;  %v4772_v60 = vsel %vm527_vm10, %v9677_v23, 0.0 }
0x220a   :  { %v8053_v61 = vunpack.i.h.bf16 %v8051_v14  ;;  %v8052_v31 = vunpack.i.l.bf16 %v8051_v14  ;;  %4773 = vadd.xlane.f32.xlu0 %v4772_v60  ;;  %8285 = vpow2.f32 %v5005_v4 }
0x220c   :  { %v7841_v17 = vpack.c.bf16 %v8053_v61, %v8052_v31 }
0x220e   :  { %7842 = vmatpush3.bf16.msra.mxu0 %v7841_v17 }
0x220f   :  { %7563 = vmatprep.subr.mxu0 %v8363_v2 }
0x2210   :  { %v8282_v22 = vpop.eup %8281 }
0x2211   :  { %v8284_v48 = vpop.eup %8283 }
0x2212   :  { %v5007_v46 = vsel %vm520_vm9, %v8284_v48, 0.0 }
0x2214   :  { %v8286_v10 = vpop.eup %8285 }
0x2215   :  { %v5013_v52 = vsel %vm527_vm10, %v8286_v10, 0.0 }
0x2217   :  { %8055 = vrot.lane.b32.xlu1 %v9573_v40, %s8370_s5 }
0x221b   :  { %5026 = vrot.lane.b32.xlu1 %v9563_v6, %s8370_s5 }
0x221f   :  { %8060 = vrot.lane.b32.xlu1 %v9573_v40, %s8371_s24 }
0x2220   :  { %4785 = vrot.lane.b32.xlu0 %v9563_v6, %s8369_s23 }
0x222d   :  { %v7542_v28 = vpop.f32.mrb[112].mxu0 }
0x222e   :  { %v4624_v29 = vadd.f32 %v7542_v28, %v9592_v38  ;;  %v4608_v33 = vpop.f32.mrb[113].mxu0 }
0x222f   :  { %v4622_v49 = vadd.f32 %v4608_v33, %v9595_v34  ;;  %v7543_v42 = vpop.f32.mrb[114].mxu0 }
0x2230   :  { %v4627_v0 = vadd.f32 %v9697_v44, %v4624_v29  ;;  %v4611_v8 = vpop.f32.mrb[115].mxu0 }
0x2231   :  { %v4625_v12 = vadd.f32 %v8359_v39, %v4622_v49  ;;  %v4623_v38 = vadd.f32 %v4611_v8, %v9598_v30  ;;  %v5010_v30 = vsel %vm520_vm9, %v8282_v22, 0.0 }
0x2232   :  { %v4636_v54 = vadd.f32 %v9694_v35, %v4627_v0 }
0x2233   :  { %v4634_v5 = vadd.f32 %v9694_v35, %v4625_v12  ;;  %v4626_v51 = vadd.f32 %v8360_v41, %v4623_v38 }
0x2234   :  { %4639 = vst.msk [vmem:[#allocation2 + $0x10] sm:$0x1] %vm213_vm2, %v4636_v54 }
0x2235   :  { %4637 = vst.msk [vmem:[#allocation2] sm:$0xff] %vm217_vm4, %v4634_v5  ;;  %v4635_v34 = vadd.f32 %v9694_v35, %v4626_v51 }
0x2237   :  { %4638 = vst.msk [vmem:[#allocation2 + $0x8] sm:$0xff] %vm217_vm4, %v4635_v34 }
0x223f   :  { %5011 = vadd.xlane.f32.xlu0 %v5010_v30 }
0x2243   :  { %5008 = vadd.xlane.f32.xlu1 %v5007_v46  ;;  %5014 = vadd.xlane.f32.xlu0 %v5013_v52 }
0x2254   :  { %5241 = vrot.lane.b32.xlu1 %v9563_v6, %s8371_s24 }
0x2258   :  { %5233 = vrot.lane.b32.xlu1 %v9569_v43, %s8372_s6 }
0x2259   :  { %5231 = vrot.lane.b32.xlu0 %v9352_v20, %s8372_s6 }
0x225d   :  { %5235 = vrot.lane.b32.xlu0 %v9563_v6, %s8372_s6 }
0x228f   :  { %v4768_v15 = vpop.xlane.xlu0 %4767 }
0x2290   :  { %8287 = vrcp.f32 %v4768_v15 }
0x2293   :  { %v4771_v55 = vpop.xlane.xlu1 %4770 }
0x2294   :  { %8289 = vrcp.f32 %v4771_v55 }
0x2297   :  { %v4774_v37 = vpop.xlane.xlu0 %4773  ;;  %v8056_v9 = vpop.permute.xlu1 %8055 }
0x2298   :  { %8291 = vrcp.f32 %v4774_v37  ;;  %v8058_v57 = vunpack.i.h.bf16 %v8056_v9  ;;  %v8057_v58 = vunpack.i.l.bf16 %v8056_v9 }
0x229a   :  { %v8288_v32 = vpop.eup %8287  ;;  %v7848_v21 = vpack.c.bf16 %v8058_v57, %v8057_v58 }
0x229b   :  { %v4776_v45 = vmul.f32 %v8288_v32, %v9669_v62  ;;  %v4786_v50 = vpop.permute.xlu0 %4785  ;;  %v5027_v18 = vpop.permute.xlu1 %5026 }
0x229c   :  { %7564 = vmatpush3.msk.msra.mxu0 %vm572_vm11, %v4786_v50 }
0x229d   :  { %7566 = vmatmul.mubr.msk.f32.vlgmr.msra.gmra.mrb[110].mxu0 %vm520_vm9, %v4776_v45  ;;  %7847 = vmatprep.subr.bf16.mxu0 %v8365_v3 }
0x229e   :  { %v8290_v63 = vpop.eup %8289  ;;  %7849 = vmatpush3.bf16.msra.mxu0 %v7848_v21  ;;  %7568 = vmatprep.mubr.msk.f32.mxu0 %vm8364_vm0, %v8363_v2 }
0x229f   :  { %v4778_v16 = vmul.f32 %v8290_v63, %v9673_v53  ;;  %7593 = vmatprep.subr.mxu0 %v8363_v2  ;;  %v8061_v53 = vpop.permute.xlu1 %8060 }
0x22a0   :  { %v8063_v17 = vunpack.i.h.bf16 %v8061_v53  ;;  %v8062_v7 = vunpack.i.l.bf16 %v8061_v53 }
0x22a1   :  { %7569 = vmatmul.mubr.msk.f32.gmra.mrb[116].mxu0 %vm520_vm9, %v4778_v16 }
0x22a2   :  { %v8292_v62 = vpop.eup %8291  ;;  %7594 = vmatpush3.msk.msra.mxu0 %vm572_vm11, %v5027_v18  ;;  %7571 = vmatprep.mubr.msk.f32.mxu0 %vm8364_vm0, %v8363_v2 }
0x22a3   :  { %v4780_v14 = vmul.f32 %v8292_v62, %v9677_v23  ;;  %7850 = vmatprep.subr.bf16.mxu0 %v8365_v3  ;;  %v7851_v23 = vpack.c.bf16 %v8063_v17, %v8062_v7 }
0x22a5   :  { %7572 = vmatmul.mubr.msk.f32.gmra.mrb[118].mxu0 %vm520_vm9, %v4780_v14 }
0x22a6   :  { %7595 = vmatprep.mubr.msk.f32.mxu0 %vm8364_vm0, %v8363_v2 }
0x22cc   :  { %v5012_v60 = vpop.xlane.xlu0 %5011 }
0x22d0   :  { %v5009_v61 = vpop.xlane.xlu1 %5008  ;;  %v5015_v31 = vpop.xlane.xlu0 %5014 }
0x22d1   :  { %8293 = vrcp.f32 %v5009_v61 }
0x22d2   :  { %8295 = vrcp.f32 %v5012_v60 }
0x22d3   :  { %8297 = vrcp.f32 %v5015_v31 }
0x22d4   :  { %v5242_v29 = vpop.permute.xlu1 %5241  ;;  %v5232_v33 = vpop.permute.xlu0 %5231 }
0x22d8   :  { %v5234_v49 = vpop.permute.xlu1 %5233  ;;  %v5236_v42 = vpop.permute.xlu0 %5235 }
0x22db   :  { %v8294_v36 = vpop.eup %8293 }
0x22dc   :  { %v5017_v24 = vmul.f32 %v8294_v36, %v8284_v48  ;;  %v8296_v25 = vpop.eup %8295 }
0x22dd   :  { %v5019_v26 = vmul.f32 %v8296_v25, %v8282_v22  ;;  %v8298_v27 = vpop.eup %8297 }
0x22de   :  { %7596 = vmatmul.mubr.msk.f32.vlgmr.msra.gmra.mrb[120].mxu0 %vm520_vm9, %v5017_v24  ;;  %v5021_v28 = vmul.f32 %v8298_v27, %v8286_v10 }
0x22df   :  { %7853 = vmatpush3.bf16.xpose.msk.msra.mxu0 %vm8654_vm8, %v7851_v23  ;;  %7598 = vmatprep.mubr.msk.f32.mxu0 %vm8364_vm0, %v8363_v2 }
0x22e0   :  { %7620 = vmatprep.subr.mxu0 %v8363_v2 }
0x22e2   :  { %7599 = vmatmul.mubr.msk.f32.gmra.mrb[122].mxu0 %vm520_vm9, %v5019_v26 }
0x22e3   :  { %7601 = vmatprep.mubr.msk.f32.mxu0 %vm8364_vm0, %v8363_v2 }
0x22e6   :  { %7602 = vmatmul.mubr.msk.f32.gmra.mrb[124].mxu0 %vm520_vm9, %v5021_v28 }
0x22e7   :  { %7621 = vmatpush3.xpose.msk.msra.mxu0 %vm424_vm7, %v5242_v29  ;;  %7622 = vmatprep.mubr.msk.f32.mxu0 %vm8364_vm0, %v8363_v2 }
0x22e8   :  { %7854 = vmatprep.subr.bf16.mxu0 %v8365_v3 }
0x22ea   :  { %7623 = vmatmul.mubr.msk.f32.vlgmr.msra.gmra.mrb[126].mxu0 %vm424_vm7, %v5232_v33 }
0x22eb   :  { %7625 = vmatprep.mubr.msk.f32.mxu0 %vm8364_vm0, %v8363_v2 }
0x22ee   :  { %7626 = vmatmul.mubr.msk.f32.gmra.mrb[128].mxu0 %vm424_vm7, %v5234_v49 }
0x22ef   :  { %7628 = vmatprep.mubr.msk.f32.mxu0 %vm8364_vm0, %v8363_v2 }
0x22f2   :  { %7629 = vmatmul.mubr.msk.f32.gmra.mrb[130].mxu0 %vm424_vm7, %v5236_v42 }
0x22f3   :  { %7637 = vmatprep.mubr.msk.f32.mxu0 %vm8364_vm0, %v8363_v2 }
0x2370   :  { %v4866_v56 = vpop.f32.mrb[110].mxu0 }
0x2371   :  { %v7567_v0 = vpop.f32.mrb[111].mxu0 }
0x2374   :  { %v4871_v8 = vpop.f32.mrb[116].mxu0 }
0x2375   :  { %v4880_v4 = vpack.c.bf16 %v4871_v8, %v4866_v56  ;;  %v7570_v39 = vpop.f32.mrb[117].mxu0 }
0x2378   :  { %v4876_v12 = vpop.f32.mrb[118].mxu0 }
0x2379   :  { %v7573_v38 = vpop.f32.mrb[119].mxu0  ;;  %v4881_v32 = vpack.c.bf16 %v4876_v12, %v4876_v12 }
0x23b1   :  { %v5107_v54 = vpop.f32.mrb[120].mxu0 }
0x23b2   :  { %v7597_v5 = vpop.f32.mrb[121].mxu0 }
0x23b5   :  { %v5112_v41 = vpop.f32.mrb[122].mxu0 }
0x23b6   :  { %v5121_v51 = vpack.c.bf16 %v5112_v41, %v5107_v54  ;;  %v7600_v34 = vpop.f32.mrb[123].mxu0 }
0x23b8   :  { %7606 = vmatprep.mubr.msk.bf16.mxu1 %vm424_vm7, %v5121_v51 }
0x23b9   :  { %v5117_v22 = vpop.f32.mrb[124].mxu0 }
0x23ba   :  { %v5122_v48 = vpack.c.bf16 %v5117_v22, %v5117_v22  ;;  %v7603_v30 = vpop.f32.mrb[125].mxu0 }
0x23bc   :  { %7607 = vmatmul.mubr.msk.bf16.vlgmr.msra.gmra.mrb[136].mxu1 %vm424_vm7, %v5122_v48 }
0x23bd   :  { %7612 = vmatprep.mubr.msk.bf16.mxu1 %vm424_vm7, %v4880_v4  ;;  %v5321_v10 = vpop.f32.mrb[126].mxu0  ;;  %7611 = vmatpush3.bf16.msra.mxu1 %v9451_v47 }
0x23be   :  { %v5335_v46 = vmul.f32 0.35355338, %v5321_v10  ;;  %v7624_v52 = vpop.f32.mrb[127].mxu0  ;;  %7902 = vmatprep.subr.msk.bf16.mxu1 %vm906_vm12, %v9539_v1 }
0x23c0   :  { %v5338_v15 = vsel %vm520_vm9, %v5335_v46, -inf }
0x23c1   :  { %5339 = vmax.xlane.f32.xlu1 %v5338_v15  ;;  %v5326_v55 = vpop.f32.mrb[128].mxu0 }
0x23c2   :  { %v5336_v37 = vmul.f32 0.35355338, %v5326_v55  ;;  %v7627_v9 = vpop.f32.mrb[129].mxu0 }
0x23c4   :  { %v5341_v57 = vsel %vm520_vm9, %v5336_v37, -inf }
0x23c5   :  { %5342 = vmax.xlane.f32.xlu0 %v5341_v57  ;;  %v5331_v58 = vpop.f32.mrb[130].mxu0 }
0x23c6   :  { %v5337_v45 = vmul.f32 0.35355338, %v5331_v58  ;;  %v7630_v50 = vpop.f32.mrb[131].mxu0 }
0x23c8   :  { %7613 = vmatmul.mubr.msk.bf16.vlgmr.msra.gmra.mrb[136].mxu1 %vm424_vm7, %v4881_v32  ;;  %v5344_v47 = vsel %vm527_vm10, %v5337_v45, -inf }
0x23c9   :  { %5345 = vmax.xlane.f32.xlu0 %v5344_v47  ;;  %7647 = vmatpush3.bf16.msra.mxu1 %v9545_v11 }
0x23ca   :  { %7861 = vmatprep.subr.bf16.mxu1 %v8365_v3 }
0x23d2   :  { %8065 = vrot.lane.b32.xlu1 %v9573_v40, %s10095_s0 }
0x244e   :  { %v5340_v1 = vpop.xlane.xlu1 %5339 }
0x244f   :  { %v5347_v21 = vsub.f32 %v5335_v46, %v5340_v1 }
0x2451   :  { %v5350_v63 = vmul.f32 1.442695, %v5347_v21 }
0x2452   :  { %v8066_v16 = vpop.permute.xlu1 %8065  ;;  %v5343_v18 = vpop.xlane.xlu0 %5342 }
0x2453   :  { %8299 = vpow2.f32 %v5350_v63  ;;  %v8068_v62 = vunpack.i.h.bf16 %v8066_v16  ;;  %v8067_v14 = vunpack.i.l.bf16 %v8066_v16  ;;  %v5348_v53 = vsub.f32 %v5336_v37, %v5343_v18 }
0x2455   :  { %v7855_v60 = vpack.c.bf16 %v8068_v62, %v8067_v14  ;;  %v5352_v61 = vmul.f32 1.442695, %v5348_v53 }
0x2456   :  { %v5346_v31 = vpop.xlane.xlu0 %5345 }
0x2457   :  { %8301 = vpow2.f32 %v5352_v61  ;;  %v5349_v17 = vsub.f32 %v5337_v45, %v5346_v31  ;;  %7856 = vmatpush3.bf16.msra.mxu0 %v7855_v60 }
0x2458   :  { %7635 = vmatprep.subr.mxu0 %v8363_v2 }
0x2459   :  { %v5354_v11 = vmul.f32 1.442695, %v5349_v17 }
0x245b   :  { %8303 = vpow2.f32 %v5354_v11 }
0x245d   :  { %v8300_v7 = vpop.eup %8299 }
0x245e   :  { %v5356_v36 = vsel %vm520_vm9, %v8300_v7, 0.0 }
0x245f   :  { %5357 = vadd.xlane.f32.xlu0 %v5356_v36 }
0x2461   :  { %v8302_v24 = vpop.eup %8301 }
0x2462   :  { %v5359_v25 = vsel %vm520_vm9, %v8302_v24, 0.0 }
0x2463   :  { %5360 = vadd.xlane.f32.xlu1 %v5359_v25 }
0x2465   :  { %v8304_v23 = vpop.eup %8303 }
0x2466   :  { %v5362_v26 = vsel %vm527_vm10, %v8304_v23, 0.0 }
0x2467   :  { %5363 = vadd.xlane.f32.xlu0 %v5362_v26 }
0x2474   :  { %8070 = vrot.lane.b32.xlu1 %v9573_v40, %s10096_s28 }
0x2478   :  { %5539 = vrot.lane.b32.xlu1 %v9563_v6, %s10096_s28 }
0x247c   :  { %5529 = vrot.lane.b32.xlu1 %v9352_v20, %s10097_s4 }
0x247d   :  { %5375 = vrot.lane.b32.xlu0 %v9563_v6, %s10095_s0 }
0x2480   :  { %5533 = vrot.lane.b32.xlu1 %v9563_v6, %s10097_s4 }
0x2481   :  { %5531 = vrot.lane.b32.xlu0 %v9569_v43, %s10097_s4 }
0x24ec   :  { %v5358_v27 = vpop.xlane.xlu0 %5357 }
0x24ed   :  { %8305 = vrcp.f32 %v5358_v27 }
0x24f0   :  { %v5361_v28 = vpop.xlane.xlu1 %5360 }
0x24f1   :  { %8307 = vrcp.f32 %v5361_v28 }
0x24f4   :  { %v5364_v29 = vpop.xlane.xlu0 %5363  ;;  %v8071_v49 = vpop.permute.xlu1 %8070 }
0x24f5   :  { %8309 = vrcp.f32 %v5364_v29  ;;  %v8073_v20 = vunpack.i.h.bf16 %v8071_v49  ;;  %v8072_v0 = vunpack.i.l.bf16 %v8071_v49 }
0x24f7   :  { %v8306_v33 = vpop.eup %8305  ;;  %v7858_v4 = vpack.c.bf16 %v8073_v20, %v8072_v0 }
0x24f8   :  { %v5366_v42 = vmul.f32 %v8306_v33, %v8300_v7  ;;  %v5376_v56 = vpop.permute.xlu0 %5375 }
0x24f9   :  { %7636 = vmatpush3.msk.msra.mxu0 %vm572_vm11, %v5376_v56 }
0x24fa   :  { %7638 = vmatmul.mubr.msk.f32.vlgmr.msra.gmra.mrb[132].mxu0 %vm520_vm9, %v5366_v42  ;;  %7857 = vmatprep.subr.bf16.mxu0 %v8365_v3  ;;  %v5540_v3 = vpop.permute.xlu1 %5539 }
0x24fb   :  { %v8308_v8 = vpop.eup %8307  ;;  %7640 = vmatprep.mubr.msk.f32.mxu0 %vm8364_vm0, %v8363_v2 }
0x24fc   :  { %v5368_v43 = vmul.f32 %v8308_v8, %v8302_v24  ;;  %v5532_v19 = vpop.permute.xlu0 %5531  ;;  %v9827_v24 = vld [vmem:[#allocation2 + $0x8] sm:$0xff] }
0x24fd   :  { %v5859_v25 = vsel %vm217_vm4, %v9827_v24, 0.0 }
0x24fe   :  { %7641 = vmatmul.mubr.msk.f32.gmra.mrb[134].mxu0 %vm520_vm9, %v5368_v43  ;;  %v5530_v38 = vpop.permute.xlu1 %5529 }
0x24ff   :  { %v8310_v39 = vpop.eup %8309  ;;  %7643 = vmatprep.mubr.msk.f32.mxu0 %vm8364_vm0, %v8363_v2 }
0x2500   :  { %7860 = vmatpush3.bf16.xpose.msk.msra.mxu0 %vm8654_vm8, %v7858_v4  ;;  %v5370_v12 = vmul.f32 %v8310_v39, %v8304_v23  ;;  %v9831_v23 = vld [vmem:[#allocation2] sm:$0xff] }
0x2501   :  { %7656 = vmatprep.subr.mxu0 %v8363_v2  ;;  %v5856_v26 = vsel %vm217_vm4, %v9831_v23, 0.0 }
0x2502   :  { %7644 = vmatmul.mubr.msk.f32.gmra.mrb[136].mxu0 %vm520_vm9, %v5370_v12  ;;  %v5534_v54 = vpop.permute.xlu1 %5533 }
0x2503   :  { %7658 = vmatprep.mubr.msk.f32.mxu0 %vm8364_vm0, %v8363_v2 }
0x2508   :  { %7657 = vmatpush3.xpose.msk.msra.mxu0 %vm424_vm7, %v5540_v3 }
0x2509   :  { %7688 = vmatprep.subr.bf16.mxu0 %v8363_v2 }
0x250b   :  { %7659 = vmatmul.mubr.msk.f32.vlgmr.msra.gmra.mrb[138].mxu0 %vm424_vm7, %v5530_v38 }
0x250c   :  { %7661 = vmatprep.mubr.msk.f32.mxu0 %vm8364_vm0, %v8363_v2 }
0x250f   :  { %7662 = vmatmul.mubr.msk.f32.gmra.mrb[140].mxu0 %vm424_vm7, %v5532_v19 }
0x2510   :  { %7664 = vmatprep.mubr.msk.f32.mxu0 %vm8364_vm0, %v8363_v2 }
0x2513   :  { %7665 = vmatmul.mubr.msk.f32.gmra.mrb[142].mxu0 %vm424_vm7, %v5534_v54 }
0x2514   :  { %7692 = vmatprep.mubr.msk.bf16.mxu0 %vm8364_vm0, %v8363_v2 }
0x25cd   :  { %v5456_v5 = vpop.f32.mrb[132].mxu0 }
0x25ce   :  { %v7639_v41 = vpop.f32.mrb[133].mxu0 }
0x25d1   :  { %v5461_v51 = vpop.f32.mrb[134].mxu0 }
0x25d2   :  { %v5470_v34 = vpack.c.bf16 %v5461_v51, %v5456_v5  ;;  %v7642_v22 = vpop.f32.mrb[135].mxu0 }
0x25d4   :  { %7648 = vmatprep.mubr.msk.bf16.mxu1 %vm424_vm7, %v5470_v34 }
0x25d5   :  { %v5466_v48 = vpop.f32.mrb[136].mxu0 }
0x25d6   :  { %v5471_v30 = vpack.c.bf16 %v5466_v48, %v5466_v48  ;;  %v7645_v10 = vpop.f32.mrb[137].mxu0 }
0x25d8   :  { %7649 = vmatmul.mubr.msk.bf16.vlgmr.msra.gmra.mrb[136].mxu1 %vm424_vm7, %v5471_v30 }
0x25d9   :  { %7673 = vmatprep.mubr.msk.f32.mxu1 %vm8364_vm0, %v8363_v2 }
0x25de   :  { %v5619_v46 = vpop.f32.mrb[138].mxu0 }
0x25df   :  { %v5633_v52 = vmul.f32 0.35355338, %v5619_v46  ;;  %v7660_v15 = vpop.f32.mrb[139].mxu0 }
0x25e1   :  { %v5636_v55 = vsel %vm520_vm9, %v5633_v52, -inf }
0x25e2   :  { %5637 = vmax.xlane.f32.xlu0 %v5636_v55  ;;  %v5624_v37 = vpop.f32.mrb[140].mxu0  ;;  %v8361_v55 = vld [vmem:[#allocation2 + $0x18] sm:$0xff] }
0x25e3   :  { %v5634_v9 = vmul.f32 0.35355338, %v5624_v37  ;;  %v7663_v57 = vpop.f32.mrb[141].mxu0 }
0x25e5   :  { %v5639_v58 = vsel %vm520_vm9, %v5634_v9, -inf }
0x25e6   :  { %5640 = vmax.xlane.f32.xlu1 %v5639_v58  ;;  %v5629_v32 = vpop.f32.mrb[142].mxu0 }
0x25e7   :  { %v5635_v45 = vmul.f32 0.35355338, %v5629_v32  ;;  %v7666_v50 = vpop.f32.mrb[143].mxu0 }
0x25e9   :  { %v5642_v47 = vsel %vm527_vm10, %v5635_v45, -inf }
0x25ea   :  { %5643 = vmax.xlane.f32.xlu0 %v5642_v47 }
0x266f   :  { %v5638_v1 = vpop.xlane.xlu0 %5637 }
0x2670   :  { %v5645_v21 = vsub.f32 %v5633_v52, %v5638_v1 }
0x2672   :  { %v5648_v63 = vmul.f32 1.442695, %v5645_v21 }
0x2673   :  { %v5641_v16 = vpop.xlane.xlu1 %5640 }
0x2674   :  { %8311 = vpow2.f32 %v5648_v63  ;;  %v5646_v18 = vsub.f32 %v5634_v9, %v5641_v16  ;;  %v8362_v9 = vld [vmem:[#allocation2 + $0x20] sm:$0x3] }
0x2676   :  { %v5650_v62 = vmul.f32 1.442695, %v5646_v18 }
0x2677   :  { %v5644_v14 = vpop.xlane.xlu0 %5643 }
0x2678   :  { %8313 = vpow2.f32 %v5650_v62  ;;  %v5647_v53 = vsub.f32 %v5635_v45, %v5644_v14 }
0x267a   :  { %v5652_v60 = vmul.f32 1.442695, %v5647_v53 }
0x267c   :  { %8315 = vpow2.f32 %v5652_v60 }
0x267e   :  { %v8312_v61 = vpop.eup %8311 }
0x267f   :  { %v5654_v31 = vsel %vm520_vm9, %v8312_v61, 0.0 }
0x2680   :  { %5655 = vadd.xlane.f32.xlu0 %v5654_v31 }
0x2682   :  { %v8314_v17 = vpop.eup %8313 }
0x2683   :  { %v5657_v11 = vsel %vm520_vm9, %v8314_v17, 0.0 }
0x2684   :  { %5658 = vadd.xlane.f32.xlu0 %v5657_v11  ;;  %v6607_v11 = vld [vmem:[%s10056_s14 + $0x28] sm:$0xff] }
0x2686   :  { %v8316_v7 = vpop.eup %8315 }
0x2687   :  { %v5660_v36 = vsel %vm527_vm10, %v8316_v7, 0.0 }
0x2688   :  { %5661 = vadd.xlane.f32.xlu1 %v5660_v36  ;;  %v6608_v36 = vld [vmem:[%s10056_s14 + $0x30] sm:$0xff] }
0x2699   :  { %5673 = vrot.lane.b32.xlu1 %v9563_v6, %s10098_s1 }
0x269a   :  { %8075 = vrot.lane.b32.xlu0 %v9573_v40, %s10098_s1 }
0x26b9   :  { %5860 = vadd.xlane.f32.xlu0 %v5859_v25  ;;  %v6609_v25 = vld [vmem:[%s10056_s14 + $0x38] sm:$0xff] }
0x26bd   :  { %5857 = vadd.xlane.f32.xlu1 %v5856_v26  ;;  %v3250_v26 = vpack.c.bf16 %v6609_v25, %v6608_v36 }
0x270d   :  { %v5656_v27 = vpop.xlane.xlu0 %5655 }
0x270e   :  { %8317 = vrcp.f32 %v5656_v27 }
0x2711   :  { %v5659_v28 = vpop.xlane.xlu0 %5658 }
0x2712   :  { %8319 = vrcp.f32 %v5659_v28 }
0x2715   :  { %v5662_v6 = vpop.xlane.xlu1 %5661  ;;  %v8076_v29 = vpop.permute.xlu0 %8075 }
0x2716   :  { %v8078_v33 = vunpack.i.h.bf16 %v8076_v29  ;;  %v8077_v40 = vunpack.i.l.bf16 %v8076_v29  ;;  %8321 = vrcp.f32 %v5662_v6 }
0x2718   :  { %v7862_v49 = vpack.c.bf16 %v8078_v33, %v8077_v40  ;;  %v8318_v42 = vpop.eup %8317 }
0x2719   :  { %v5664_v56 = vmul.f32 %v8318_v42, %v8312_v61  ;;  %v5674_v20 = vpop.permute.xlu1 %5673 }
0x271a   :  { %7863 = vmatpush3.bf16.msra.mxu1 %v7862_v49 }
0x271b   :  { %7671 = vmatprep.subr.mxu1 %v8363_v2 }
0x271c   :  { %v8320_v0 = vpop.eup %8319 }
0x271d   :  { %v5666_v8 = vmul.f32 %v8320_v0, %v8314_v17  ;;  %v6606_v17 = vld [vmem:[%s10056_s14 + $0x20] sm:$0xff] }
0x271e   :  { %7672 = vmatpush3.msk.msra.mxu1 %vm572_vm11, %v5674_v20 }
0x271f   :  { %7674 = vmatmul.mubr.msk.f32.vlgmr.msra.gmra.mrb[134].mxu1 %vm520_vm9, %v5664_v56  ;;  %7903 = vmatprep.subr.msk.bf16.mxu1 %vm906_vm12, %v9647_v13 }
0x2720   :  { %7676 = vmatprep.mubr.msk.f32.mxu1 %vm8364_vm0, %v8363_v2  ;;  %7683 = vmatpush3.bf16.msra.mxu1 %v9653_v59  ;;  %v8322_v43 = vpop.eup %8321 }
0x2721   :  { %7704 = vmatprep.subr.bf16.mxu1 %v8363_v2  ;;  %v5668_v4 = vmul.f32 %v8322_v43, %v8316_v7  ;;  %v3249_v7 = vpack.c.bf16 %v6607_v11, %v6606_v17 }
0x2723   :  { %7677 = vmatmul.mubr.msk.f32.gmra.mrb[140].mxu1 %vm520_vm9, %v5666_v8  ;;  %7689 = vmatpush3.bf16.msra.mxu0 %v3249_v7 }
0x2724   :  { %7679 = vmatprep.mubr.msk.f32.mxu1 %vm8364_vm0, %v8363_v2  ;;  %7690 = vmatprep.subr.bf16.mxu0 %v8363_v2 }
0x2727   :  { %7680 = vmatmul.mubr.msk.f32.gmra.mrb[142].mxu1 %vm520_vm9, %v5668_v4  ;;  %7691 = vmatpush3.bf16.msra.mxu0 %v3250_v26 }
0x2728   :  { %7720 = vmatprep.subr.bf16.mxu0 %v8363_v2 }
0x2746   :  { %v5861_v32 = vpop.xlane.xlu0 %5860 }
0x2747   :  { %v5872_v47 = vmul.f32 0.03125, %v5861_v32 }
0x2749   :  { %v5877_v63 = vsub.f32 %v9827_v24, %v5872_v47  ;;  %v6612_v47 = vld [vmem:[%s10059_s16 + $0x28] sm:$0xff] }
0x274a   :  { %v5858_v58 = vpop.xlane.xlu1 %5857 }
0x274b   :  { %v5882_v60 = vmul.f32 %v5877_v63, %v5877_v63 }
0x274d   :  { %v5889_v31 = vsel %vm217_vm4, %v5882_v60, 0.0 }
0x27f2   :  { %v5754_v39 = vpop.f32.mrb[134].mxu1 }
0x27f3   :  { %v7675_v12 = vpop.f32.mrb[135].mxu1 }
0x27f6   :  { %v5759_v13 = vpop.f32.mrb[140].mxu1 }
0x27f7   :  { %v5768_v3 = vpack.c.bf16 %v5759_v13, %v5754_v39  ;;  %v7678_v38 = vpop.f32.mrb[141].mxu1 }
0x27f9   :  { %7684 = vmatprep.mubr.msk.bf16.mxu1 %vm424_vm7, %v5768_v3 }
0x27fa   :  { %v5764_v59 = vpop.f32.mrb[142].mxu1 }
0x27fb   :  { %v5769_v19 = vpack.c.bf16 %v5764_v59, %v5764_v59  ;;  %v7681_v54 = vpop.f32.mrb[143].mxu1 }
0x27fd   :  { %7685 = vmatmul.mubr.msk.bf16.vlgmr.msra.gmra.mrb[136].mxu1 %vm424_vm7, %v5769_v19 }
0x27fe   :  { %7708 = vmatprep.mubr.msk.bf16.mxu1 %vm8364_vm0, %v8363_v2 }
0x28d0   :  { %v7686_v5 = vpop.f32.mrb[136].mxu1 }
0x28d1   :  { %v5810_v41 = vpop.f32.mrb[137].mxu1  ;;  %v5833_v48 = vrot.slane %v7686_v5, 7  ;;  %v6722_v5 = vld [vmem:[%s10057_s12 + $0x1] ss:$0 sm:$0xff] }
0x28d2   :  { %v5830_v51 = vrot.slane %v5810_v41, 7  ;;  %v7687_v34 = vpop.f32.mrb[138].mxu1 }
0x28d3   :  { %v5813_v22 = vpop.f32.mrb[139].mxu1  ;;  %v6723_v34 = vld [vmem:[%s10058_s13 + $0x1] ss:$0 sm:$0xff] }
0x28d4   :  { %v5838_v30 = vadd.f32 %v9697_v44, %v5830_v51  ;;  %v5831_v10 = vrot.slane %v5813_v22, 7  ;;  %v5871_v44 = vmul.f32 0.03125, %v5858_v58 }
0x28d6   :  { %v5841_v46 = vadd.f32 %v9694_v35, %v5838_v30  ;;  %v5832_v52 = vsel %vm572_vm11, %v5830_v51, %v5831_v10  ;;  %v5834_v15 = vsel %vm572_vm11, %v5831_v10, %v5833_v48  ;;  %v5876_v1 = vsub.f32 %v9831_v23, %v5871_v44  ;;  %v6611_v44 = vld [vmem:[%s10059_s16 + $0x20] sm:$0xff] }
0x28d7   :  { %v5839_v37 = vadd.f32 %v8361_v55, %v5832_v52  ;;  %v5840_v57 = vadd.f32 %v8362_v9, %v5834_v15 }
0x28d8   :  { %5844 = vst.msk [vmem:[#allocation2 + $0x10] sm:$0xfe] %vm2839_vm13, %v5841_v46  ;;  %v5881_v53 = vmul.f32 %v5876_v1, %v5876_v1 }
0x28d9   :  { %v5842_v45 = vadd.f32 %v9694_v35, %v5839_v37  ;;  %v5843_v50 = vadd.f32 %v9694_v35, %v5840_v57 }
0x28da   :  { %v5886_v61 = vsel %vm217_vm4, %v5881_v53, 0.0 }
0x28db   :  { %5845 = vst.msk [vmem:[#allocation2 + $0x18] sm:$0xff] %vm217_vm4, %v5842_v45 }
0x28dc   :  { %5846 = vst.msk [vmem:[#allocation2 + $0x20] sm:$0x3] %vm270_vm5, %v5843_v50 }
0x28df   :  { %v9862_v21 = vld [vmem:[#allocation2 + $0x10] sm:$0xff] }
0x28e0   :  { %v5862_v16 = vsel %vm217_vm4, %v9862_v21, 0.0 }
0x28e1   :  { %5863 = vadd.xlane.f32.xlu0 %v5862_v16 }
0x28e2   :  { %v9867_v18 = vld [vmem:[#allocation2 + $0x18] sm:$0xff] }
0x28e3   :  { %v9869_v62 = vld [vmem:[#allocation2 + $0x20] sm:$0x3]  ;;  %v5865_v35 = vsel %vm217_vm4, %v9867_v18, 0.0 }
0x28e4   :  { %v5868_v14 = vsel %vm270_vm5, %v9869_v62, 0.0  ;;  %5866 = vadd.xlane.f32.xlu1 %v5865_v35  ;;  %v6613_v35 = vld [vmem:[%s10059_s16 + $0x30] sm:$0xff] }
0x28e5   :  { %5869 = vadd.xlane.f32.xlu0 %v5868_v14  ;;  %v6614_v14 = vld [vmem:[%s10059_s16 + $0x38] sm:$0xff] }
0x28e6   :  { %v3259_v53 = vpack.c.bf16 %v6614_v14, %v6613_v35 }
0x28e8   :  { %5887 = vadd.xlane.f32.xlu1 %v5886_v61 }
0x28e9   :  { %5890 = vadd.xlane.f32.xlu0 %v5889_v31 }
0x296e   :  { %v5864_v27 = vpop.xlane.xlu0 %5863 }
0x296f   :  { %v5873_v28 = vmul.f32 0.03125, %v5864_v27 }
0x2971   :  { %v5878_v6 = vsub.f32 %v9862_v21, %v5873_v28  ;;  %v5867_v29 = vpop.xlane.xlu1 %5866 }
0x2972   :  { %v5874_v33 = vmul.f32 0.03125, %v5867_v29  ;;  %v5870_v40 = vpop.xlane.xlu0 %5869  ;;  %v9929_v29 = vld [vmem:[%s10060_s15 + $0x1] ss:$0 sm:$0xff] }
0x2973   :  { %v5875_v49 = vmul.f32 0.03125, %v5870_v40  ;;  %v5883_v42 = vmul.f32 %v5878_v6, %v5878_v6 }
0x2974   :  { %v5879_v56 = vsub.f32 %v9867_v18, %v5874_v33 }
0x2975   :  { %v5880_v20 = vsub.f32 %v9869_v62, %v5875_v49  ;;  %v5888_v0 = vpop.xlane.xlu1 %5887  ;;  %v5892_v8 = vsel %vm217_vm4, %v5883_v42, 0.0 }
0x2976   :  { %v5901_v43 = vmul.f32 0.03125, %v5888_v0  ;;  %5893 = vadd.xlane.f32.xlu1 %v5892_v8  ;;  %v5891_v4 = vpop.xlane.xlu0 %5890  ;;  %v5884_v39 = vmul.f32 %v5879_v56, %v5879_v56 }
0x2977   :  { %v5902_v12 = vmul.f32 0.03125, %v5891_v4  ;;  %v5885_v13 = vmul.f32 %v5880_v20, %v5880_v20 }
0x2978   :  { %v5906_v3 = vadd.f32 1e-05, %v5901_v43  ;;  %v5895_v38 = vsel %vm217_vm4, %v5884_v39, 0.0 }
0x2979   :  { %v5907_v59 = vadd.f32 1e-05, %v5902_v12  ;;  %5896 = vadd.xlane.f32.xlu0 %v5895_v38  ;;  %v5898_v19 = vsel %vm270_vm5, %v5885_v13, 0.0 }
0x297a   :  { %8323 = vrsqrt.f32 %v5906_v3  ;;  %5899 = vadd.xlane.f32.xlu1 %v5898_v19 }
0x297b   :  { %8325 = vrsqrt.f32 %v5907_v59 }
0x2984   :  { %v8324_v54 = vpop.eup %8323 }
0x2985   :  { %v8326_v41 = vpop.eup %8325  ;;  %v5916_v51 = vmul.f32 %v8324_v54, %v5876_v1  ;;  %v3258_v1 = vpack.c.bf16 %v6612_v47, %v6611_v44 }
0x2986   :  { %v5917_v22 = vmul.f32 %v8326_v41, %v5877_v63 }
0x2987   :  { %v5927_v48 = vmul.f32 %v6722_v5, %v5916_v51  ;;  %7705 = vmatpush3.bf16.msra.mxu1 %v3258_v1 }
0x2988   :  { %v5928_v30 = vmul.f32 %v6722_v5, %v5917_v22  ;;  %7706 = vmatprep.subr.bf16.mxu1 %v8363_v2 }
0x2989   :  { %v5938_v10 = vadd.f32 %v6723_v34, %v5927_v48 }
0x298a   :  { %v5939_v46 = vadd.f32 %v6723_v34, %v5928_v30 }
0x298b   :  { %7707 = vmatpush3.bf16.msra.mxu1 %v3259_v53 }
0x298c   :  { %v5943_v52 = vpack.c.bf16 %v5939_v46, %v5938_v10  ;;  %7728 = vmatprep.subr.bf16.mxu1 %v8363_v2 }
0x298e   :  { %7693 = vmatmul.mubr.msk.bf16.vlgmr.msra.gmra.mrb[144].mxu0 %vm217_vm4, %v5943_v52 }
0x298f   :  { %7696 = vmatprep.mubr.msk.bf16.mxu0 %vm8364_vm0, %v8363_v2 }
0x2a03   :  { %v5894_v15 = vpop.xlane.xlu1 %5893 }
0x2a04   :  { %v5903_v55 = vmul.f32 0.03125, %v5894_v15 }
0x2a06   :  { %v5908_v37 = vadd.f32 1e-05, %v5903_v55  ;;  %v5897_v9 = vpop.xlane.xlu0 %5896 }
0x2a07   :  { %v5904_v57 = vmul.f32 0.03125, %v5897_v9  ;;  %v5900_v58 = vpop.xlane.xlu1 %5899 }
0x2a08   :  { %8327 = vrsqrt.f32 %v5908_v37  ;;  %v5905_v32 = vmul.f32 0.03125, %v5900_v58 }
0x2a09   :  { %v5909_v45 = vadd.f32 1e-05, %v5904_v57 }
0x2a0a   :  { %v5910_v50 = vadd.f32 1e-05, %v5905_v32 }
0x2a0b   :  { %8329 = vrsqrt.f32 %v5909_v45 }
0x2a0c   :  { %8331 = vrsqrt.f32 %v5910_v50 }
0x2a12   :  { %v8328_v63 = vpop.eup %8327 }
0x2a13   :  { %v5918_v16 = vmul.f32 %v8328_v63, %v5878_v6 }
0x2a15   :  { %v8330_v60 = vpop.eup %8329  ;;  %v5929_v17 = vmul.f32 %v6722_v5, %v5918_v16 }
0x2a16   :  { %v8332_v61 = vpop.eup %8331  ;;  %v5919_v31 = vmul.f32 %v8330_v60, %v5879_v56 }
0x2a17   :  { %v5920_v7 = vmul.f32 %v8332_v61, %v5880_v20  ;;  %v5940_v36 = vadd.f32 %v6723_v34, %v5929_v17 }
0x2a18   :  { %v5930_v11 = vmul.f32 %v6722_v5, %v5919_v31 }
0x2a19   :  { %v5931_v27 = vmul.f32 %v6722_v5, %v5920_v7 }
0x2a1a   :  { %v5941_v25 = vadd.f32 %v6723_v34, %v5930_v11 }
0x2a1b   :  { %v5942_v28 = vadd.f32 %v6723_v34, %v5931_v27 }
0x2a1c   :  { %v5944_v26 = vpack.c.bf16 %v5941_v25, %v5940_v36 }
0x2a1d   :  { %v5945_v6 = vpack.c.bf16 %v5942_v28, %v5942_v28 }
0x2a1e   :  { %7697 = vmatmul.mubr.msk.bf16.gmra.mrb[148].mxu0 %vm217_vm4, %v5944_v26 }
0x2a1f   :  { %7700 = vmatprep.mubr.msk.bf16.mxu0 %vm8364_vm0, %v8363_v2 }
0x2a26   :  { %7701 = vmatmul.mubr.msk.bf16.gmra.mrb[152].mxu0 %vm217_vm4, %v5945_v6 }
0x2a27   :  { %7724 = vmatprep.mubr.msk.bf16.mxu0 %vm8364_vm0, %v8363_v2 }
0x2a61   :  { %v5995_v33 = vpop.f32.mrb[144].mxu0 }
0x2a62   :  { %v5996_v40 = vadd.f32 %v9929_v29, %v5995_v33  ;;  %v7694_v49 = vpop.f32.mrb[145].mxu0 }
0x2a63   :  { %v5998_v42 = vpop.f32.mrb[146].mxu0 }
0x2a64   :  { %v6022_v56 = vmul.f32 0.70710677, %v5996_v40  ;;  %v5999_v20 = vadd.f32 %v9929_v29, %v5998_v42  ;;  %v7695_v0 = vpop.f32.mrb[147].mxu0  ;;  %v6017_v36 = vmul.f32 0.5, %v5996_v40 }
0x2a66   :  { %v6027_v8 = vand.u32 2147483647, %v6022_v56  ;;  %v6023_v43 = vmul.f32 0.70710677, %v5999_v20  ;;  %vm6127_vm2 = vcmp.lt.f32.partialorder %v6022_v56, 0.0  ;;  %v6018_v25 = vmul.f32 0.5, %v5999_v20 }
0x2a68   :  { %v6032_v4 = vmul.f32 0.3275911, %v6027_v8  ;;  %v6028_v39 = vand.u32 2147483647, %v6023_v43  ;;  %v6097_v38 = vsub.f32 0.0, %v6027_v8  ;;  %vm6128_vm6 = vcmp.lt.f32.partialorder %v6023_v43, 0.0 }
0x2a6a   :  { %v6037_v12 = vadd.f32 1.0, %v6032_v4  ;;  %v6033_v13 = vmul.f32 0.3275911, %v6028_v39  ;;  %v6098_v59 = vsub.f32 0.0, %v6028_v39  ;;  %v6102_v54 = vmul.f32 %v6097_v38, %v6027_v8 }
0x2a6c   :  { %8333 = vrcp.f32 %v6037_v12  ;;  %v6038_v3 = vadd.f32 1.0, %v6033_v13  ;;  %v6103_v34 = vmul.f32 %v6098_v59, %v6028_v39  ;;  %v6107_v22 = vmul.f32 1.442695, %v6102_v54 }
0x2a6e   :  { %8335 = vrcp.f32 %v6038_v3  ;;  %v6109_v52 = vmul.f32 1.442695, %v6103_v34 }
0x2a6f   :  { %8337 = vpow2.f32 %v6107_v22 }
0x2a70   :  { %8339 = vpow2.f32 %v6109_v52 }
0x2a76   :  { %v8334_v19 = vpop.eup %8333 }
0x2a77   :  { %v6052_v5 = vmul.f32 1.0614054, %v8334_v19 }
0x2a78   :  { %v8336_v41 = vpop.eup %8335 }
0x2a79   :  { %v6057_v51 = vadd.f32 -1.4531521, %v6052_v5  ;;  %v6053_v48 = vmul.f32 1.0614054, %v8336_v41  ;;  %v8338_v47 = vpop.eup %8337 }
0x2a7a   :  { %v8340_v35 = vpop.eup %8339 }
0x2a7b   :  { %v6062_v30 = vmul.f32 %v8334_v19, %v6057_v51  ;;  %v6058_v10 = vadd.f32 -1.4531521, %v6053_v48 }
0x2a7d   :  { %v6067_v46 = vadd.f32 1.4214138, %v6062_v30  ;;  %v6063_v15 = vmul.f32 %v8336_v41, %v6058_v10 }
0x2a7f   :  { %v6072_v55 = vmul.f32 %v8334_v19, %v6067_v46  ;;  %v6068_v37 = vadd.f32 1.4214138, %v6063_v15 }
0x2a81   :  { %v6077_v9 = vadd.f32 -0.28449672, %v6072_v55  ;;  %v6073_v57 = vmul.f32 %v8336_v41, %v6068_v37 }
0x2a83   :  { %v6082_v58 = vmul.f32 %v8334_v19, %v6077_v9  ;;  %v6078_v32 = vadd.f32 -0.28449672, %v6073_v57 }
0x2a85   :  { %v6087_v45 = vadd.f32 0.2548296, %v6082_v58  ;;  %v6083_v50 = vmul.f32 %v8336_v41, %v6078_v32 }
0x2a87   :  { %v6092_v44 = vmul.f32 %v8334_v19, %v6087_v45  ;;  %v6088_v1 = vadd.f32 0.2548296, %v6083_v50 }
0x2a89   :  { %v6117_v63 = vmul.f32 %v8338_v47, %v6092_v44  ;;  %v6093_v16 = vmul.f32 %v8336_v41, %v6088_v1 }
0x2a8b   :  { %v6122_v14 = vsub.f32 1.0, %v6117_v63  ;;  %v6118_v53 = vmul.f32 %v8340_v35, %v6093_v16 }
0x2a8d   :  { %v6132_v60 = vsub.f32 0.0, %v6122_v14  ;;  %v6123_v61 = vsub.f32 1.0, %v6118_v53 }
0x2a8f   :  { %v6137_v31 = vsel %vm6127_vm2, %v6132_v60, %v6122_v14  ;;  %v6133_v17 = vsub.f32 0.0, %v6123_v61 }
0x2a90   :  { %v6142_v11 = vadd.f32 1.0, %v6137_v31 }
0x2a91   :  { %v6138_v7 = vsel %vm6128_vm6, %v6133_v17, %v6123_v61 }
0x2a92   :  { %v6143_v26 = vadd.f32 1.0, %v6138_v7  ;;  %v6147_v27 = vmul.f32 %v6142_v11, %v6017_v36 }
0x2a94   :  { %v6148_v28 = vmul.f32 %v6143_v26, %v6018_v25 }
0x2a96   :  { %v6152_v6 = vpack.c.bf16 %v6148_v28, %v6147_v27 }
0x2a98   :  { %7709 = vmatmul.mubr.msk.bf16.vlgmr.msra.gmra.mrb[144].mxu1 %vm217_vm4, %v6152_v6 }
0x2a99   :  { %7712 = vmatprep.mubr.msk.bf16.mxu1 %vm8364_vm0, %v8363_v2 }
0x2af1   :  { %v6003_v33 = vpop.f32.mrb[148].mxu0 }
0x2af2   :  { %v9937_v49 = vadd.f32 %v9929_v29, %v6003_v33  ;;  %v7698_v42 = vpop.f32.mrb[149].mxu0 }
0x2af3   :  { %v6006_v56 = vpop.f32.mrb[150].mxu0 }
0x2af4   :  { %v9940_v0 = vmul.f32 0.70710677, %v9937_v49  ;;  %v9943_v40 = vadd.f32 %v9929_v29, %v6006_v56  ;;  %v7699_v20 = vpop.f32.mrb[151].mxu0 }
0x2af6   :  { %v6029_v8 = vand.u32 2147483647, %v9940_v0  ;;  %v9947_v43 = vmul.f32 0.70710677, %v9943_v40  ;;  %vm6129_vm7 = vcmp.lt.f32.partialorder %v9940_v0, 0.0 }
0x2af8   :  { %v6034_v4 = vmul.f32 0.3275911, %v6029_v8  ;;  %v6030_v39 = vand.u32 2147483647, %v9947_v43  ;;  %v6099_v22 = vsub.f32 0.0, %v6029_v8  ;;  %vm6130_vm8 = vcmp.lt.f32.partialorder %v9947_v43, 0.0 }
0x2af9   :  { %v6011_v12 = vpop.f32.mrb[152].mxu0 }
0x2afa   :  { %v6039_v13 = vadd.f32 1.0, %v6034_v4  ;;  %v6035_v3 = vmul.f32 0.3275911, %v6030_v39  ;;  %v7702_v38 = vpop.f32.mrb[153].mxu0  ;;  %v9951_v59 = vadd.f32 %v9929_v29, %v6011_v12  ;;  %v6100_v30 = vsub.f32 0.0, %v6030_v39 }
0x2afb   :  { %v6014_v19 = vpop.f32.mrb[154].mxu0  ;;  %v6104_v46 = vmul.f32 %v6099_v22, %v6029_v8 }
0x2afc   :  { %8341 = vrcp.f32 %v6039_v13  ;;  %v6040_v54 = vadd.f32 1.0, %v6035_v3  ;;  %v7703_v5 = vpop.f32.mrb[155].mxu0  ;;  %v9954_v41 = vmul.f32 0.70710677, %v9951_v59  ;;  %v6105_v55 = vmul.f32 %v6100_v30, %v6030_v39 }
0x2afd   :  { %v6111_v37 = vmul.f32 1.442695, %v6104_v46  ;;  %v6020_v30 = vmul.f32 0.5, %v9943_v40  ;;  %v6728_v40 = vld [vmem:[%s10061_s17 + $0x1] ss:$0 sm:$0xff] }
0x2afe   :  { %8343 = vrcp.f32 %v6040_v54  ;;  %v6031_v51 = vand.u32 2147483647, %v9954_v41  ;;  %v6113_v50 = vmul.f32 1.442695, %v6105_v55  ;;  %vm6131_vm10 = vcmp.lt.f32.partialorder %v9954_v41, 0.0 }
0x2b00   :  { %v6036_v34 = vmul.f32 0.3275911, %v6031_v51  ;;  %v6101_v58 = vsub.f32 0.0, %v6031_v51 }
0x2b02   :  { %v6041_v48 = vadd.f32 1.0, %v6036_v34  ;;  %v6106_v63 = vmul.f32 %v6101_v58, %v6031_v51 }
0x2b04   :  { %8345 = vrcp.f32 %v6041_v48  ;;  %v6115_v31 = vmul.f32 1.442695, %v6106_v63  ;;  %v6019_v48 = vmul.f32 0.5, %v9937_v49 }
0x2b05   :  { %8347 = vpow2.f32 %v6111_v37  ;;  %v6021_v37 = vmul.f32 0.5, %v9951_v59 }
0x2b06   :  { %v8342_v10 = vpop.eup %8341  ;;  %8349 = vpow2.f32 %v6113_v50 }
0x2b07   :  { %v6054_v52 = vmul.f32 1.0614054, %v8342_v10  ;;  %8351 = vpow2.f32 %v6115_v31 }
0x2b08   :  { %v8344_v29 = vpop.eup %8343 }
0x2b09   :  { %v6059_v15 = vadd.f32 -1.4531521, %v6054_v52  ;;  %v6055_v9 = vmul.f32 1.0614054, %v8344_v29 }
0x2b0b   :  { %v6064_v57 = vmul.f32 %v8342_v10, %v6059_v15  ;;  %v6060_v32 = vadd.f32 -1.4531521, %v6055_v9 }
0x2b0d   :  { %v6069_v45 = vadd.f32 1.4214138, %v6064_v57  ;;  %v6065_v44 = vmul.f32 %v8344_v29, %v6060_v32 }
0x2b0e   :  { %v8346_v47 = vpop.eup %8345 }
0x2b0f   :  { %v6074_v1 = vmul.f32 %v8342_v10, %v6069_v45  ;;  %v6070_v16 = vadd.f32 1.4214138, %v6065_v44  ;;  %v6056_v35 = vmul.f32 1.0614054, %v8346_v47  ;;  %v8348_v27 = vpop.eup %8347 }
0x2b10   :  { %v8350_v20 = vpop.eup %8349 }
0x2b11   :  { %v6079_v14 = vadd.f32 -0.28449672, %v6074_v1  ;;  %v6075_v53 = vmul.f32 %v8344_v29, %v6070_v16  ;;  %v6061_v60 = vadd.f32 -1.4531521, %v6056_v35  ;;  %v8352_v5 = vpop.eup %8351  ;;  %v8377_v16 = vmov 0   ;;  %v6245_v35 = vld [vmem:[%s10062_s19 + $0x8] sm:$0xff] }
0x2b12   :  { %8080 = vset.pattern.permute.xlu1 %v8377_v16  ;;  %8079 = vset.pattern.permute.xlu0 %v8377_v16 }
0x2b13   :  { %v6084_v61 = vmul.f32 %v8342_v10, %v6079_v14  ;;  %v6080_v17 = vadd.f32 -0.28449672, %v6075_v53  ;;  %v6066_v11 = vmul.f32 %v8346_v47, %v6061_v60  ;;  %6262 = vperm.xlu1 %8080, %v6245_v35   ;;  %v6247_v14 = vld [vmem:[%s10063_s20 + $0x8] sm:$0xff] }
0x2b15   :  { %v6089_v7 = vadd.f32 0.2548296, %v6084_v61  ;;  %v6085_v36 = vmul.f32 %v8344_v29, %v6080_v17  ;;  %v6071_v25 = vadd.f32 1.4214138, %v6066_v11 }
0x2b17   :  { %v6094_v26 = vmul.f32 %v8342_v10, %v6089_v7  ;;  %v6090_v28 = vadd.f32 0.2548296, %v6085_v36  ;;  %v6076_v6 = vmul.f32 %v8346_v47, %v6071_v25 }
0x2b19   :  { %v6119_v33 = vmul.f32 %v8348_v27, %v6094_v26  ;;  %v6095_v42 = vmul.f32 %v8344_v29, %v6090_v28  ;;  %v6081_v56 = vadd.f32 -0.28449672, %v6076_v6 }
0x2b1b   :  { %v6124_v8 = vsub.f32 1.0, %v6119_v33  ;;  %v6120_v4 = vmul.f32 %v8350_v20, %v6095_v42  ;;  %v6086_v39 = vmul.f32 %v8346_v47, %v6081_v56  ;;  %v6269_v20 = vsel %vm572_vm11, 65535, %v8377_v16 }
0x2b1d   :  { %v6134_v12 = vsub.f32 0.0, %v6124_v8  ;;  %v6125_v13 = vsub.f32 1.0, %v6120_v4  ;;  %v6091_v3 = vadd.f32 0.2548296, %v6086_v39 }
0x2b1f   :  { %v6139_v38 = vsel %vm6129_vm7, %v6134_v12, %v6124_v8  ;;  %v6135_v19 = vsub.f32 0.0, %v6125_v13  ;;  %v6096_v54 = vmul.f32 %v8346_v47, %v6091_v3  ;;  %v6241_v8 = vld [vmem:[%s10064_s18] sm:$0xff] }
0x2b20   :  { %v6144_v51 = vadd.f32 1.0, %v6139_v38 }
0x2b21   :  { %v6140_v34 = vsel %vm6130_vm8, %v6135_v19, %v6125_v13  ;;  %v6121_v22 = vmul.f32 %v8352_v5, %v6096_v54 }
0x2b22   :  { %v6145_v10 = vadd.f32 1.0, %v6140_v34  ;;  %v6149_v52 = vmul.f32 %v6144_v51, %v6019_v48 }
0x2b23   :  { %v6126_v46 = vsub.f32 1.0, %v6121_v22 }
0x2b24   :  { %v6150_v29 = vmul.f32 %v6145_v10, %v6020_v30  ;;  %v6248_v10 = vld [vmem:[%s10063_s20 + $0x10] sm:$0xff] }
0x2b25   :  { %v6136_v0 = vsub.f32 0.0, %v6126_v46 }
0x2b26   :  { %v6153_v15 = vpack.c.bf16 %v6150_v29, %v6149_v52 }
0x2b27   :  { %v6141_v55 = vsel %vm6131_vm10, %v6136_v0, %v6126_v46  ;;  %v6249_v46 = vld [vmem:[%s10063_s20 + $0x18] sm:$0xff] }
0x2b28   :  { %v6146_v9 = vadd.f32 1.0, %v6141_v55  ;;  %7713 = vmatmul.mubr.msk.bf16.gmra.mrb[148].mxu1 %vm217_vm4, %v6153_v15  ;;  %v6251_v52 = vpack.c.bf16 %v6249_v46, %v6248_v10 }
0x2b29   :  { %7716 = vmatprep.mubr.msk.bf16.mxu1 %vm8364_vm0, %v8363_v2 }
0x2b2a   :  { %v6151_v49 = vmul.f32 %v6146_v9, %v6021_v37 }
0x2b2c   :  { %v6154_v43 = vpack.c.bf16 %v6151_v49, %v6151_v49 }
0x2b30   :  { %7717 = vmatmul.mubr.msk.bf16.gmra.mrb[152].mxu1 %vm217_vm4, %v6154_v43 }
0x2b31   :  { %7732 = vmatprep.mubr.msk.bf16.mxu1 %vm8364_vm0, %v8363_v2 }
0x2b6b   :  { %v6204_v41 = vpop.f32.mrb[144].mxu1 }
0x2b6c   :  { %v6205_v57 = vadd.f32 %v6728_v40, %v6204_v41  ;;  %v7710_v59 = vpop.f32.mrb[145].mxu1 }
0x2b6d   :  { %v6207_v58 = vpop.f32.mrb[146].mxu1 }
0x2b6e   :  { %v6226_v32 = vadd.f32 %v6205_v57, %v9831_v23  ;;  %v6208_v45 = vadd.f32 %v6728_v40, %v6207_v58  ;;  %v7711_v50 = vpop.f32.mrb[147].mxu1  ;;  %v6244_v23 = vld [vmem:[%s10062_s19] sm:$0xff] }
0x2b6f   :  { %6257 = vperm.xlu0 %8079, %v6244_v23  }
0x2b70   :  { %6231 = vst.msk [vmem:[#allocation2] sm:$0xff] %vm217_vm4, %v6226_v32  ;;  %v6227_v44 = vadd.f32 %v6208_v45, %v9827_v24  ;;  %v6246_v24 = vld [vmem:[%s10063_s20] sm:$0xff] }
0x2b71   :  { %v9989_v53 = vpack.c.bf16 %v6247_v14, %v6246_v24 }
0x2b72   :  { %6232 = vst.msk [vmem:[#allocation2 + $0x8] sm:$0xff] %vm217_vm4, %v6227_v44  ;;  %v6733_v44 = vld [vmem:[%s10065_s21] ss:$0 sm:$0xff] }
0x2b73   :  { %7729 = vmatpush3.bf16.msra.mxu1 %v9989_v53 }
0x2b74   :  { %7730 = vmatprep.subr.bf16.mxu1 %v8363_v2 }
0x2b77   :  { %v6236_v47 = vld [vmem:[#allocation2] sm:$0xff]  ;;  %7731 = vmatpush3.bf16.msra.mxu1 %v6251_v52 }
0x2b78   :  { %7744 = vmatprep.subr.bf16.mxu1 %v8363_v2 }
0x2b79   :  { %v6237_v1 = vld [vmem:[#allocation2 + $0x8] sm:$0xff] }
0x2b7a   :  { %v6253_v63 = vpack.c.bf16 %v6237_v1, %v6236_v47 }
0x2b7c   :  { %7721 = vmatpush3.bf16.msra.mxu0 %v6253_v63 }
0x2b7d   :  { %7722 = vmatprep.subr.bf16.mxu0 %v8363_v2 }
0x2b92   :  { %v6263_v15 = vpop.permute.xlu1 %6262 }
0x2bee   :  { %v6258_v29 = vpop.permute.xlu0 %6257 }
0x2bfb   :  { %v6212_v60 = vpop.f32.mrb[148].mxu1 }
0x2bfc   :  { %v6213_v61 = vadd.f32 %v6728_v40, %v6212_v60  ;;  %v7714_v31 = vpop.f32.mrb[149].mxu1 }
0x2bfd   :  { %v6215_v17 = vpop.f32.mrb[150].mxu1 }
0x2bfe   :  { %v6228_v11 = vadd.f32 %v6213_v61, %v9862_v21  ;;  %v6216_v7 = vadd.f32 %v6728_v40, %v6215_v17  ;;  %v7715_v36 = vpop.f32.mrb[151].mxu1 }
0x2c00   :  { %6233 = vst.msk [vmem:[#allocation2 + $0x10] sm:$0xff] %vm217_vm4, %v6228_v11  ;;  %v6229_v25 = vadd.f32 %v6216_v7, %v9867_v18  ;;  %v6242_v18 = vld [vmem:[%s10064_s18 + $0x8] sm:$0xff] }
0x2c01   :  { %v6243_v13 = vpack.c.bf16 %v6242_v18, %v6241_v8 }
0x2c02   :  { %6234 = vst.msk [vmem:[#allocation2 + $0x18] sm:$0xff] %vm217_vm4, %v6229_v25 }
0x2c03   :  { %v6220_v26 = vpop.f32.mrb[152].mxu1 }
0x2c04   :  { %v6221_v27 = vadd.f32 %v6728_v40, %v6220_v26  ;;  %v7718_v28 = vpop.f32.mrb[153].mxu1 }
0x2c05   :  { %v6223_v6 = vpop.f32.mrb[154].mxu1 }
0x2c06   :  { %v6230_v33 = vadd.f32 %v6221_v27, %v9869_v62  ;;  %v7719_v42 = vpop.f32.mrb[155].mxu1 }
0x2c07   :  { %v6238_v56 = vld [vmem:[#allocation2 + $0x10] sm:$0xff] }
0x2c08   :  { %6235 = vst.msk [vmem:[#allocation2 + $0x20] sm:$0x3] %vm270_vm5, %v6230_v33  ;;  %v6254_v21 = vpack.c.bf16 %v6238_v56, %v6238_v56  ;;  %vm6369_vm5 = vsmask.f32 7424 }
0x2c09   :  { %v6239_v4 = vld [vmem:[#allocation2 + $0x18] sm:$0xff] }
0x2c0a   :  { %v6271_v39 = vand.u32 %v6269_v20, %v6254_v21  ;;  %v6367_v12 = vpack.c.bf16 %v6239_v4, %v6238_v56 }
0x2c0c   :  { %7723 = vmatpush3.bf16.msra.mxu0 %v6271_v39  ;;  %v6373_v62 = vshll.u32 %v6367_v12, 16  ;;  %v6371_v54 = vshrl.u32 %v6367_v12, 16 }
0x2c0d   :  { %7736 = vmatprep.subr.bf16.mxu0 %v8363_v2 }
0x2c0e   :  { %v6375_v19 = vrot.slane %v6373_v62, 1 }
0x2c0f   :  { %7725 = vmatmul.mubr.msk.bf16.vlgmr.msra.gmra.mrb[156].mxu0 %vm520_vm9, %v6243_v13  ;;  %v6240_v3 = vld [vmem:[#allocation2 + $0x20] sm:$0x3] }
0x2c10   :  { %v6368_v38 = vpack.c.bf16 %v6240_v3, %v6240_v3  ;;  %7740 = vmatprep.mubr.msk.bf16.mxu0 %vm8364_vm0, %v8363_v2  ;;  %v6376_v51 = vor.u32 %v6375_v19, %v6371_v54 }
0x2c12   :  { %v6378_v5 = vshll.u32 %v6368_v38, 16  ;;  %v6382_v22 = vshrl.u32 %v6368_v38, 16 }
0x2c14   :  { %v6380_v34 = vrot.slane %v6378_v5, 1  ;;  %v6386_v30 = vand.u32 %v6382_v22, %v6269_v20 }
0x2c16   :  { %v6381_v48 = vsel %vm6369_vm5, %v6376_v51, %v6380_v34 }
0x2c17   :  { %7737 = vmatpush3.bf16.msra.mxu0 %v6381_v48 }
0x2c18   :  { %7738 = vmatprep.subr.bf16.mxu0 %v8363_v2 }
0x2c1b   :  { %7739 = vmatpush3.bf16.msra.mxu0 %v6386_v30 }
0x2c1e   :  { %7741 = vmatmul.mubr.msk.bf16.vlgmr.msra.gmra.mrb[160].mxu0 %vm520_vm9, %v6243_v13 }
0x2ce2   :  { %v6307_v0 = vpop.f32.mrb[156].mxu0 }
0x2ce3   :  { %v7726_v55 = vpop.f32.mrb[157].mxu0  ;;  %v6308_v37 = vadd.f32 %v6307_v0, %v6258_v29 }
0x2ce4   :  { %v6310_v9 = vpop.f32.mrb[158].mxu0 }
0x2ce5   :  { %v6311_v49 = vadd.f32 %v6310_v9, %v6263_v15  ;;  %v7727_v43 = vpop.f32.mrb[159].mxu0 }
0x2ce7   :  { %v6314_v40 = vpack.c.bf16 %v6311_v49, %v6308_v37 }
0x2ce9   :  { %7733 = vmatmul.mubr.msk.bf16.vlgmr.msra.gmra.mrb[156].mxu1 %vm217_vm4, %v6314_v40 }
0x2cea   :  { %7745 = vmatpush3.bf16.msra.mxu1 %v9989_v53  ;;  %7748 = vmatprep.mubr.msk.bf16.mxu1 %vm8364_vm0, %v8363_v2 }
0x2ceb   :  { %7746 = vmatprep.subr.bf16.mxu1 %v8363_v2 }
0x2cee   :  { %7747 = vmatpush3.bf16.msra.mxu1 %v6251_v52 }
0x2cf1   :  { %v6422_v41 = vpop.f32.mrb[160].mxu0 }
0x2cf2   :  { %v7742_v57 = vpop.f32.mrb[161].mxu0  ;;  %v6423_v58 = vadd.f32 %v6422_v41, %v6258_v29 }
0x2cf3   :  { %v6425_v59 = vpop.f32.mrb[162].mxu0 }
0x2cf4   :  { %v6426_v32 = vadd.f32 %v6425_v59, %v6263_v15  ;;  %v7743_v45 = vpop.f32.mrb[163].mxu0 }
0x2cf6   :  { %v6429_v50 = vpack.c.bf16 %v6426_v32, %v6423_v58 }
0x2cf8   :  { %7749 = vmatmul.mubr.msk.bf16.vlgmr.msra.gmra.mrb[160].mxu1 %vm217_vm4, %v6429_v50 }
0x2dbc   :  { %v6358_v47 = vpop.f32.mrb[156].mxu1 }
0x2dbd   :  { %v6359_v1 = vadd.f32 %v6733_v44, %v6358_v47  ;;  %v7734_v63 = vpop.f32.mrb[157].mxu1 }
0x2dbe   :  { %v6361_v16 = vpop.f32.mrb[158].mxu1 }
0x2dbf   :  { %6365 = vst.msk [vmem:[%s10066_s22] sm:$0xff] %vm217_vm4, %v6359_v1  ;;  %v6362_v2 = vadd.f32 %v6733_v44, %v6361_v16  ;;  %v7735_v23 = vpop.f32.mrb[159].mxu1 }
0x2dc1   :  { %6366 = vst.msk [vmem:[%s10066_s22 + $0x8] sm:$0xff] %vm217_vm4, %v6362_v2 }
0x2dcb   :  { %v6467_v35 = vpop.f32.mrb[160].mxu1 }
0x2dcc   :  { %v6468_v24 = vadd.f32 %v6733_v44, %v6467_v35  ;;  %v7750_v14 = vpop.f32.mrb[161].mxu1 }
0x2dcd   :  { %v6470_v53 = vpop.f32.mrb[162].mxu1 }
0x2dce   :  { %6474 = vst.msk [vmem:[%s10066_s22 + $0x10] sm:$0xff] %vm217_vm4, %v6468_v24  ;;  %v6471_v60 = vadd.f32 %v6733_v44, %v6470_v53  ;;  %v7751_v61 = vpop.f32.mrb[163].mxu1 }
0x2dd0   :  { %6475 = vst.msk [vmem:[%s10066_s22 + $0x18] sm:$0xff] %vm217_vm4, %v6471_v60 }

</bundles_post_ra>
